<compile_context>
chip_gen: v6e
topology: v6e:2x2x1
jax: 0.10.0
libtpu: 0.0.40
codegen_flags: <defaults>
</compile_context>

<pallas_src>
import functools

import jax
import jax.numpy as jnp
from jax.experimental import pallas as pl
from jax.experimental.pallas import tpu as pltpu

_EPS = 1e-5


# ----------------------------- fused Pallas kernel -----------------------------

def _bottleneck_kernel(x_ref, w1_ref, b1_ref, w2_ref, b2_ref, w3_ref, b3_ref,
                       o_ref, y1pad_ref, *, W, PAD):
    # x_ref:  (1, M, Cin)        bf16    M = H*W, Cin = 4*planes
    # w1_ref: (Cin, P)           bf16    (BN1 scale folded)
    # w2_ref: (3, 3P, P)         bf16    (BN2 scale folded), rows = kw-major im2col
    # w3_ref: (P, 4P)            bf16    (BN3 scale folded)
    # b*_ref: (1, C)             f32     per-channel BN shifts
    # o_ref:  (1, M, 4P)         bf16
    # y1pad_ref: (M + 2*PAD, P)  f32 scratch (zero halo rows top & bottom)
    M = x_ref.shape[1]
    planes = w1_ref.shape[1]

    x = x_ref[0]                                                  # (M, Cin) bf16

    # ---- conv1 (1x1) + bn1 + relu -------------------------------------------
    y1 = jnp.dot(x, w1_ref[...], preferred_element_type=jnp.float32)
    y1 = jnp.maximum(y1 + b1_ref[...], 0.0)                       # (M, P) f32

    # Stage y1 into the zero-padded scratch so each 3x3 tap is a contiguous,
    # statically-offset sublane slice.  Halo zeroing stays per-step (megacore
    # safety) — it is only a few tens of KB.
    y1pad_ref[pl.ds(0, PAD), :] = jnp.zeros((PAD, planes), jnp.float32)
    y1pad_ref[pl.ds(PAD + M, PAD), :] = jnp.zeros((PAD, planes), jnp.float32)
    y1pad_ref[pl.ds(PAD, M), :] = y1

    # Column-validity masks generated in-kernel (no HBM inputs, no DMA).
    col = jax.lax.broadcasted_iota(jnp.int32, (M, planes), 0) % W
    mask_l = col >= 1          # output column has a valid left neighbour
    mask_r = col <= W - 2      # output column has a valid right neighbour

    # ---- conv2 (3x3, stride=1, pad=1) + bn2 + relu ---------------------------
    # Per-kh im2col slab (M, 3P) x (3P, P): K = 3*planes per matmul.
    acc = None
    for kh in range(3):
        base = PAD + (kh - 1) * W
        p0 = jnp.where(mask_l, y1pad_ref[pl.ds(base - 1, M), :], 0.0)  # kw=0
        p1 = y1pad_ref[pl.ds(base, M), :]                              # kw=1
        p2 = jnp.where(mask_r, y1pad_ref[pl.ds(base + 1, M), :], 0.0)  # kw=2
        slab = jnp.concatenate([p0, p1, p2], axis=-1).astype(jnp.bfloat16)
        part = jnp.dot(slab, w2_ref[kh], preferred_element_type=jnp.float32)
        acc = part if acc is None else acc + part
    y2 = jnp.maximum(acc + b2_ref[...], 0.0)                      # (M, P) f32

    # ---- conv3 (1x1) + bn3 + residual + relu ---------------------------------
    y3 = jnp.dot(y2.astype(jnp.bfloat16), w3_ref[...],
                 preferred_element_type=jnp.float32)              # (M, 4P) f32
    out = jnp.maximum(y3 + b3_ref[...] + x, 0.0)                  # x promotes to f32
    o_ref[0] = out.astype(o_ref.dtype)


# ----------------------------- wrapper -----------------------------

def _fold_bn(gamma, beta, mean, var):
    scale = (gamma / jnp.sqrt(var + _EPS)).astype(jnp.float32)
    shift = (beta - mean * scale).astype(jnp.float32)
    return scale, shift


def bottleneck_forward_nhwc(x_nhwc, params):
    """Fused Bottleneck forward on NHWC activations (preferred TPU layout)."""
    N, H, W, Cin = x_nhwc.shape
    planes = params["w1"].shape[0]
    cexp = 4 * planes
    assert Cin == cexp, "downsample=None requires inplanes == 4 * planes"
    M = H * W
    PAD = ((W + 1 + 7) // 8) * 8          # halo rows (>= W+1, 8-aligned)

    s1, b1 = _fold_bn(*params["bn1"])
    s2, b2 = _fold_bn(*params["bn2"])
    s3, b3 = _fold_bn(*params["bn3"])

    # Fold BN scales into the weights; bf16 for the MXU, shifts stay f32.
    w1 = (params["w1"].reshape(planes, Cin).T * s1).astype(jnp.bfloat16)
    # (out,in,kh,kw) -> (kh, kw, in, out) -> (3, 3*P, P), kw-major rows to match
    # the [p0 | p1 | p2] channel-concatenated slab.
    w2 = (jnp.transpose(params["w2"], (2, 3, 1, 0)).reshape(3, 3 * planes, planes)
          * s2).astype(jnp.bfloat16)
    w3 = (params["w3"].reshape(cexp, planes).T * s3).astype(jnp.bfloat16)
    b1 = b1.reshape(1, planes)
    b2 = b2.reshape(1, planes)
    b3 = b3.reshape(1, cexp)

    # bf16 activation streams through HBM; kernel math stays f32.
    x3 = x_nhwc.reshape(N, M, Cin).astype(jnp.bfloat16)

    flops = 2 * N * M * (Cin * planes + 9 * planes * planes + planes * cexp)
    bytes_accessed = (2 * N * M * (Cin + cexp)
                      + 2 * (Cin * planes + 9 * planes * planes + planes * cexp)
                      + 4 * (2 * planes + cexp))

    kernel = functools.partial(_bottleneck_kernel, W=W, PAD=PAD)

    out = pl.pallas_call(
        kernel,
        out_shape=jax.ShapeDtypeStruct((N, M, cexp), jnp.bfloat16),
        grid_spec=pltpu.PrefetchScalarGridSpec(
            num_scalar_prefetch=0,
            grid=(N,),
            in_specs=[
                pl.BlockSpec((1, M, Cin), lambda n: (n, 0, 0)),              # x
                pl.BlockSpec((Cin, planes), lambda n: (0, 0)),               # w1
                pl.BlockSpec((1, planes), lambda n: (0, 0)),                 # b1
                pl.BlockSpec((3, 3 * planes, planes), lambda n: (0, 0, 0)),  # w2
                pl.BlockSpec((1, planes), lambda n: (0, 0)),                 # b2
                pl.BlockSpec((planes, cexp), lambda n: (0, 0)),              # w3
                pl.BlockSpec((1, cexp), lambda n: (0, 0)),                   # b3
            ],
            out_specs=pl.BlockSpec((1, M, cexp), lambda n: (n, 0, 0)),
            scratch_shapes=[
                pltpu.VMEM((M + 2 * PAD, planes), jnp.float32),  # padded y1
            ],
        ),
        compiler_params=pltpu.CompilerParams(
            dimension_semantics=("parallel",),        # 2nd TC on v7x
            vmem_limit_bytes=32 * 1024 * 1024,        # sized for v7x's 64 MiB VMEM
        ),
        cost_estimate=pl.CostEstimate(flops=flops, transcendentals=0,
                                      bytes_accessed=bytes_accessed),
    )(x3, w1, b1, w2, b2, w3, b3)

    return out.reshape(N, H, W, cexp)


def bottleneck_forward(x_nchw, params):
    """NCHW (PyTorch-layout) interface.

    The two transposes below are the only extra HBM passes; callers that hold
    NHWC data should use `bottleneck_forward_nhwc` directly.
    """
    x_nhwc = jnp.transpose(x_nchw, (0, 2, 3, 1))
    out = bottleneck_forward_nhwc(x_nhwc, params)
    return jnp.transpose(out, (0, 3, 1, 2))


# ----------------------------- pure-JAX reference -----------------------------

def _ref_bn(x, bn):
    gamma, beta, mean, var = bn
    inv = gamma / jnp.sqrt(var + _EPS)
    return x * inv.reshape(1, -1, 1, 1) + (beta - mean * inv).reshape(1, -1, 1, 1)


def _ref_conv(x, w, padding):
    return jax.lax.conv_general_dilated(
        x, w, window_strides=(1, 1), padding=padding,
        dimension_numbers=("NCHW", "OIHW", "NCHW"))


def bottleneck_reference(x, params):
    out = jax.nn.relu(_ref_bn(_ref_conv(x, params["w1"], "VALID"), params["bn1"]))
    out = jax.nn.relu(_ref_bn(_ref_conv(out, params["w2"], ((1, 1), (1, 1))), params["bn2"]))
    out = _ref_bn(_ref_conv(out, params["w3"], "VALID"), params["bn3"])
    return jax.nn.relu(out + x)


# ----------------------------- main -----------------------------

if __name__ == "__main__":
    key = jax.random.PRNGKey(0)
    N, planes, H, W = 2, 32, 16, 16        # planes=32 -> lane-dense 4*planes=128
    inplanes = planes * 4                   # downsample=None requires this

    ks = jax.random.split(key, 13)
    params = {
        "w1": 0.1 * jax.random.normal(ks[0], (planes, inplanes, 1, 1), jnp.float32),
        "w2": 0.1 * jax.random.normal(ks[1], (planes, planes, 3, 3), jnp.float32),
        "w3": 0.1 * jax.random.normal(ks[2], (4 * planes, planes, 1, 1), jnp.float32),
        "bn1": (1.0 + 0.1 * jax.random.normal(ks[3], (planes,), jnp.float32),
                0.1 * jax.random.normal(ks[4], (planes,), jnp.float32),
                0.1 * jax.random.normal(ks[5], (planes,), jnp.float32),
                jnp.abs(jax.random.normal(ks[6], (planes,), jnp.float32)) + 0.5),
        "bn2": (1.0 + 0.1 * jax.random.normal(ks[7], (planes,), jnp.float32),
                0.1 * jax.random.normal(ks[8], (planes,), jnp.float32),
                0.1 * jax.random.normal(ks[9], (planes,), jnp.float32),
                jnp.abs(jax.random.normal(ks[10], (planes,), jnp.float32)) + 0.5),
        "bn3": (jnp.ones((4 * planes,), jnp.float32),
                jnp.zeros((4 * planes,), jnp.float32),
                0.1 * jax.random.normal(ks[11], (4 * planes,), jnp.float32),
                jnp.ones((4 * planes,), jnp.float32)),
    }
    x = jax.random.normal(ks[12], (N, inplanes, H, W), jnp.float32)

    fwd = jax.jit(bottleneck_forward)
    out = jax.block_until_ready(fwd(x, params))
    ref = jax.block_until_ready(bottleneck_reference(x, params))

    assert out.shape == (N, inplanes, H, W), out.shape
    out_f32 = out.astype(jnp.float32)
    max_err = float(jnp.max(jnp.abs(out_f32 - ref)))
    # bf16 HBM I/O + bf16 MXU operands (f32 accumulation) vs pure-f32 reference
    # -> loose tolerance.
    assert jnp.allclose(out_f32, ref, rtol=4e-2, atol=4e-2), max_err
    print("KERNEL_OK")
</pallas_src>

<mosaic_0001>
module attributes {stable_mosaic.version = 11 : i64} {
  func.func @_bottleneck_kernel(%arg0: i32, %arg1: memref<1x256x128xbf16, #tpu.memory_space<vmem>>, %arg2: memref<128x32xbf16, #tpu.memory_space<vmem>>, %arg3: memref<1x32xf32, #tpu.memory_space<vmem>>, %arg4: memref<3x96x32xbf16, #tpu.memory_space<vmem>>, %arg5: memref<1x32xf32, #tpu.memory_space<vmem>>, %arg6: memref<32x128xbf16, #tpu.memory_space<vmem>>, %arg7: memref<1x128xf32, #tpu.memory_space<vmem>>, %arg8: memref<1x256x128xbf16, #tpu.memory_space<vmem>>, %arg9: memref<304x32xf32, #tpu.memory_space<vmem>>) attributes {dimension_semantics = [#tpu.dimension_semantics<parallel>], iteration_bounds = array<i64: 2>, scalar_prefetch = 0 : i64, scratch_operands = 1 : i64, tpu.core_type = #tpu.core_type<tc>, window_params = [{transform_indices = @transform_0, window_bounds = array<i64: 1, 256, 128>}, {pipeline_mode = #tpu.pipeline_mode<synchronous>, transform_indices = @transform_1, window_bounds = array<i64: 128, 32>}, {pipeline_mode = #tpu.pipeline_mode<synchronous>, transform_indices = @transform_2, window_bounds = array<i64: 1, 32>}, {pipeline_mode = #tpu.pipeline_mode<synchronous>, transform_indices = @transform_3, window_bounds = array<i64: 3, 96, 32>}, {pipeline_mode = #tpu.pipeline_mode<synchronous>, transform_indices = @transform_4, window_bounds = array<i64: 1, 32>}, {pipeline_mode = #tpu.pipeline_mode<synchronous>, transform_indices = @transform_5, window_bounds = array<i64: 32, 128>}, {pipeline_mode = #tpu.pipeline_mode<synchronous>, transform_indices = @transform_6, window_bounds = array<i64: 1, 128>}, {transform_indices = @transform_7, window_bounds = array<i64: 1, 256, 128>}]} {
    %c0 = arith.constant 0 : index
    %c0_0 = arith.constant 0 : index
    %c0_1 = arith.constant 0 : index
    %0 = vector.load %arg1[%c0, %c0_0, %c0_1] : memref<1x256x128xbf16, #tpu.memory_space<vmem>>, vector<1x256x128xbf16>
    %1 = vector.shape_cast %0 : vector<1x256x128xbf16> to vector<256x128xbf16>
    %c0_2 = arith.constant 0 : index
    %c0_3 = arith.constant 0 : index
    %2 = vector.load %arg2[%c0_2, %c0_3] : memref<128x32xbf16, #tpu.memory_space<vmem>>, vector<128x32xbf16>
    %cst = arith.constant dense<0.000000e+00> : vector<256x32xf32>
    %3 = tpu.matmul %1, %2, %cst {dimension_numbers = #tpu.dot_dimension_numbers<[1], [0], [0], [1], [0, 0, 1, 1], [], []>} : vector<256x128xbf16>, vector<128x32xbf16>, vector<256x32xf32> -> vector<256x32xf32>
    %c0_4 = arith.constant 0 : index
    %c0_5 = arith.constant 0 : index
    %4 = vector.load %arg3[%c0_4, %c0_5] : memref<1x32xf32, #tpu.memory_space<vmem>>, vector<1x32xf32>
    %5 = vector.broadcast %4 : vector<1x32xf32> to vector<256x32xf32>
    %6 = arith.addf %3, %5 : vector<256x32xf32>
    %cst_6 = arith.constant 0.000000e+00 : f32
    %7 = vector.broadcast %cst_6 : f32 to vector<256x32xf32>
    %8 = arith.maximumf %6, %7 : vector<256x32xf32>
    %cst_7 = arith.constant 0.000000e+00 : f32
    %9 = vector.broadcast %cst_7 : f32 to vector<24x32xf32>
    %c0_8 = arith.constant 0 : index
    %c0_9 = arith.constant 0 : index
    %10 = vector.load %arg9[%c0_8, %c0_9] : memref<304x32xf32, #tpu.memory_space<vmem>>, vector<24x32xf32>
    tpu.vector_store %arg9[%c0_8, %c0_9], %9 {strides = array<i32>} : memref<304x32xf32, #tpu.memory_space<vmem>>, vector<24x32xf32>,
    %cst_10 = arith.constant 0.000000e+00 : f32
    %11 = vector.broadcast %cst_10 : f32 to vector<24x32xf32>
    %c280 = arith.constant 280 : index
    %c0_11 = arith.constant 0 : index
    %12 = vector.load %arg9[%c280, %c0_11] : memref<304x32xf32, #tpu.memory_space<vmem>>, vector<24x32xf32>
    tpu.vector_store %arg9[%c280, %c0_11], %11 {strides = array<i32>} : memref<304x32xf32, #tpu.memory_space<vmem>>, vector<24x32xf32>,
    %c24 = arith.constant 24 : index
    %c0_12 = arith.constant 0 : index
    %13 = vector.load %arg9[%c24, %c0_12] : memref<304x32xf32, #tpu.memory_space<vmem>>, vector<256x32xf32>
    tpu.vector_store %arg9[%c24, %c0_12], %8 {strides = array<i32>} : memref<304x32xf32, #tpu.memory_space<vmem>>, vector<256x32xf32>,
    %14 = tpu.iota {dimensions = array<i32: 0>} : vector<256x32xi32>
    %c16_i32 = arith.constant 16 : i32
    %c0_i32 = arith.constant 0 : i32
    %15 = arith.cmpi eq, %c16_i32, %c0_i32 : i32
    %c1_i32 = arith.constant 1 : i32
    %16 = arith.select %15, %c1_i32, %c16_i32 : i32
    %17 = vector.broadcast %16 : i32 to vector<256x32xi32>
    %18 = arith.remsi %14, %17 : vector<256x32xi32>
    %c0_i32_13 = arith.constant 0 : i32
    %19 = vector.broadcast %c0_i32_13 : i32 to vector<256x32xi32>
    %20 = arith.cmpi ne, %18, %19 : vector<256x32xi32>
    %c0_i32_14 = arith.constant 0 : i32
    %21 = vector.broadcast %c0_i32_14 : i32 to vector<256x32xi32>
    %22 = arith.cmpi slt, %18, %21 : vector<256x32xi32>
    %c0_i32_15 = arith.constant 0 : i32
    %23 = arith.cmpi slt, %16, %c0_i32_15 : i32
    %24 = vector.broadcast %23 : i1 to vector<256x32xi1>
    %25 = vector.broadcast %24 : vector<256x32xi1> to vector<256x32xi1>
    %26 = arith.xori %22, %25 : vector<256x32xi1>
    %27 = arith.andi %26, %20 : vector<256x32xi1>
    %28 = vector.broadcast %16 : i32 to vector<256x32xi32>
    %29 = arith.addi %18, %28 : vector<256x32xi32>
    %30 = arith.select %27, %29, %18 : vector<256x32xi1>, vector<256x32xi32>
    %c1_i32_16 = arith.constant 1 : i32
    %31 = vector.broadcast %c1_i32_16 : i32 to vector<256x32xi32>
    %32 = arith.cmpi sge, %30, %31 : vector<256x32xi32>
    %c14_i32 = arith.constant 14 : i32
    %33 = vector.broadcast %c14_i32 : i32 to vector<256x32xi32>
    %34 = arith.cmpi sle, %30, %33 : vector<256x32xi32>
    %c7 = arith.constant 7 : index
    %c0_17 = arith.constant 0 : index
    %35 = vector.load %arg9[%c7, %c0_17] : memref<304x32xf32, #tpu.memory_space<vmem>>, vector<256x32xf32>
    %cst_18 = arith.constant 0.000000e+00 : f32
    %36 = vector.broadcast %cst_18 : f32 to vector<256x32xf32>
    %37 = arith.select %32, %35, %36 : vector<256x32xi1>, vector<256x32xf32>
    %c8 = arith.constant 8 : index
    %c0_19 = arith.constant 0 : index
    %38 = vector.load %arg9[%c8, %c0_19] : memref<304x32xf32, #tpu.memory_space<vmem>>, vector<256x32xf32>
    %c9 = arith.constant 9 : index
    %c0_20 = arith.constant 0 : index
    %39 = vector.load %arg9[%c9, %c0_20] : memref<304x32xf32, #tpu.memory_space<vmem>>, vector<256x32xf32>
    %cst_21 = arith.constant 0.000000e+00 : f32
    %40 = vector.broadcast %cst_21 : f32 to vector<256x32xf32>
    %41 = arith.select %34, %39, %40 : vector<256x32xi1>, vector<256x32xf32>
    %42 = tpu.concatenate %37, %38, %41 in 1 : vector<256x32xf32>, vector<256x32xf32>, vector<256x32xf32> -> vector<256x96xf32>
    %43 = arith.truncf %42 : vector<256x96xf32> to vector<256x96xbf16>
    %c0_22 = arith.constant 0 : index
    %c0_23 = arith.constant 0 : index
    %c0_24 = arith.constant 0 : index
    %44 = vector.load %arg4[%c0_22, %c0_23, %c0_24] : memref<3x96x32xbf16, #tpu.memory_space<vmem>>, vector<1x96x32xbf16>
    %45 = vector.shape_cast %44 : vector<1x96x32xbf16> to vector<96x32xbf16>
    %cst_25 = arith.constant dense<0.000000e+00> : vector<256x32xf32>
    %46 = tpu.matmul %43, %45, %cst_25 {dimension_numbers = #tpu.dot_dimension_numbers<[1], [0], [0], [1], [0, 0, 1, 1], [], []>} : vector<256x96xbf16>, vector<96x32xbf16>, vector<256x32xf32> -> vector<256x32xf32>
    %c23 = arith.constant 23 : index
    %c0_26 = arith.constant 0 : index
    %47 = vector.load %arg9[%c23, %c0_26] : memref<304x32xf32, #tpu.memory_space<vmem>>, vector<256x32xf32>
    %cst_27 = arith.constant 0.000000e+00 : f32
    %48 = vector.broadcast %cst_27 : f32 to vector<256x32xf32>
    %49 = arith.select %32, %47, %48 : vector<256x32xi1>, vector<256x32xf32>
    %c24_28 = arith.constant 24 : index
    %c0_29 = arith.constant 0 : index
    %50 = vector.load %arg9[%c24_28, %c0_29] : memref<304x32xf32, #tpu.memory_space<vmem>>, vector<256x32xf32>
    %c25 = arith.constant 25 : index
    %c0_30 = arith.constant 0 : index
    %51 = vector.load %arg9[%c25, %c0_30] : memref<304x32xf32, #tpu.memory_space<vmem>>, vector<256x32xf32>
    %cst_31 = arith.constant 0.000000e+00 : f32
    %52 = vector.broadcast %cst_31 : f32 to vector<256x32xf32>
    %53 = arith.select %34, %51, %52 : vector<256x32xi1>, vector<256x32xf32>
    %54 = tpu.concatenate %49, %50, %53 in 1 : vector<256x32xf32>, vector<256x32xf32>, vector<256x32xf32> -> vector<256x96xf32>
    %55 = arith.truncf %54 : vector<256x96xf32> to vector<256x96xbf16>
    %c1 = arith.constant 1 : index
    %c0_32 = arith.constant 0 : index
    %c0_33 = arith.constant 0 : index
    %56 = vector.load %arg4[%c1, %c0_32, %c0_33] : memref<3x96x32xbf16, #tpu.memory_space<vmem>>, vector<1x96x32xbf16>
    %57 = vector.shape_cast %56 : vector<1x96x32xbf16> to vector<96x32xbf16>
    %cst_34 = arith.constant dense<0.000000e+00> : vector<256x32xf32>
    %58 = tpu.matmul %55, %57, %cst_34 {dimension_numbers = #tpu.dot_dimension_numbers<[1], [0], [0], [1], [0, 0, 1, 1], [], []>} : vector<256x96xbf16>, vector<96x32xbf16>, vector<256x32xf32> -> vector<256x32xf32>
    %59 = arith.addf %46, %58 : vector<256x32xf32>
    %c39 = arith.constant 39 : index
    %c0_35 = arith.constant 0 : index
    %60 = vector.load %arg9[%c39, %c0_35] : memref<304x32xf32, #tpu.memory_space<vmem>>, vector<256x32xf32>
    %cst_36 = arith.constant 0.000000e+00 : f32
    %61 = vector.broadcast %cst_36 : f32 to vector<256x32xf32>
    %62 = arith.select %32, %60, %61 : vector<256x32xi1>, vector<256x32xf32>
    %c40 = arith.constant 40 : index
    %c0_37 = arith.constant 0 : index
    %63 = vector.load %arg9[%c40, %c0_37] : memref<304x32xf32, #tpu.memory_space<vmem>>, vector<256x32xf32>
    %c41 = arith.constant 41 : index
    %c0_38 = arith.constant 0 : index
    %64 = vector.load %arg9[%c41, %c0_38] : memref<304x32xf32, #tpu.memory_space<vmem>>, vector<256x32xf32>
    %cst_39 = arith.constant 0.000000e+00 : f32
    %65 = vector.broadcast %cst_39 : f32 to vector<256x32xf32>
    %66 = arith.select %34, %64, %65 : vector<256x32xi1>, vector<256x32xf32>
    %67 = tpu.concatenate %62, %63, %66 in 1 : vector<256x32xf32>, vector<256x32xf32>, vector<256x32xf32> -> vector<256x96xf32>
    %68 = arith.truncf %67 : vector<256x96xf32> to vector<256x96xbf16>
    %c2 = arith.constant 2 : index
    %c0_40 = arith.constant 0 : index
    %c0_41 = arith.constant 0 : index
    %69 = vector.load %arg4[%c2, %c0_40, %c0_41] : memref<3x96x32xbf16, #tpu.memory_space<vmem>>, vector<1x96x32xbf16>
    %70 = vector.shape_cast %69 : vector<1x96x32xbf16> to vector<96x32xbf16>
    %cst_42 = arith.constant dense<0.000000e+00> : vector<256x32xf32>
    %71 = tpu.matmul %68, %70, %cst_42 {dimension_numbers = #tpu.dot_dimension_numbers<[1], [0], [0], [1], [0, 0, 1, 1], [], []>} : vector<256x96xbf16>, vector<96x32xbf16>, vector<256x32xf32> -> vector<256x32xf32>
    %72 = arith.addf %59, %71 : vector<256x32xf32>
    %c0_43 = arith.constant 0 : index
    %c0_44 = arith.constant 0 : index
    %73 = vector.load %arg5[%c0_43, %c0_44] : memref<1x32xf32, #tpu.memory_space<vmem>>, vector<1x32xf32>
    %74 = vector.broadcast %73 : vector<1x32xf32> to vector<256x32xf32>
    %75 = arith.addf %72, %74 : vector<256x32xf32>
    %cst_45 = arith.constant 0.000000e+00 : f32
    %76 = vector.broadcast %cst_45 : f32 to vector<256x32xf32>
    %77 = arith.maximumf %75, %76 : vector<256x32xf32>
    %78 = arith.truncf %77 : vector<256x32xf32> to vector<256x32xbf16>
    %c0_46 = arith.constant 0 : index
    %c0_47 = arith.constant 0 : index
    %79 = vector.load %arg6[%c0_46, %c0_47] : memref<32x128xbf16, #tpu.memory_space<vmem>>, vector<32x128xbf16>
    %cst_48 = arith.constant dense<0.000000e+00> : vector<256x128xf32>
    %80 = tpu.matmul %78, %79, %cst_48 {dimension_numbers = #tpu.dot_dimension_numbers<[1], [0], [0], [1], [0, 0, 1, 1], [], []>} : vector<256x32xbf16>, vector<32x128xbf16>, vector<256x128xf32> -> vector<256x128xf32>
    %c0_49 = arith.constant 0 : index
    %c0_50 = arith.constant 0 : index
    %81 = vector.load %arg7[%c0_49, %c0_50] : memref<1x128xf32, #tpu.memory_space<vmem>>, vector<1x128xf32>
    %82 = vector.broadcast %81 : vector<1x128xf32> to vector<256x128xf32>
    %83 = arith.addf %80, %82 : vector<256x128xf32>
    %84 = arith.extf %1 : vector<256x128xbf16> to vector<256x128xf32>
    %85 = arith.addf %83, %84 : vector<256x128xf32>
    %cst_51 = arith.constant 0.000000e+00 : f32
    %86 = vector.broadcast %cst_51 : f32 to vector<256x128xf32>
    %87 = arith.maximumf %85, %86 : vector<256x128xf32>
    %88 = arith.truncf %87 : vector<256x128xf32> to vector<256x128xbf16>
    %c0_52 = arith.constant 0 : index
    %c0_53 = arith.constant 0 : index
    %c0_54 = arith.constant 0 : index
    %89 = vector.load %arg8[%c0_52, %c0_53, %c0_54] : memref<1x256x128xbf16, #tpu.memory_space<vmem>>, vector<1x256x128xbf16>
    %90 = vector.shape_cast %89 : vector<1x256x128xbf16> to vector<256x128xbf16>
    %91 = vector.shape_cast %88 : vector<256x128xbf16> to vector<1x256x128xbf16>
    tpu.vector_store %arg8[%c0_52, %c0_53, %c0_54], %91 {strides = array<i32>} : memref<1x256x128xbf16, #tpu.memory_space<vmem>>, vector<1x256x128xbf16>,
    return
  }
  func.func @transform_0(%arg0: i32) -> (i32, i32, i32) {
    %c0_i32 = arith.constant 0 : i32
    %c0_i32_0 = arith.constant 0 : i32
    %c0_i32_1 = arith.constant 0 : i32
    return %arg0, %c0_i32, %c0_i32_0 : i32, i32, i32
  }
  func.func @transform_1(%arg0: i32) -> (i32, i32) {
    %c0_i32 = arith.constant 0 : i32
    %c0_i32_0 = arith.constant 0 : i32
    %c0_i32_1 = arith.constant 0 : i32
    return %c0_i32, %c0_i32_0 : i32, i32
  }
  func.func @transform_2(%arg0: i32) -> (i32, i32) {
    %c0_i32 = arith.constant 0 : i32
    %c0_i32_0 = arith.constant 0 : i32
    %c0_i32_1 = arith.constant 0 : i32
    return %c0_i32, %c0_i32_0 : i32, i32
  }
  func.func @transform_3(%arg0: i32) -> (i32, i32, i32) {
    %c0_i32 = arith.constant 0 : i32
    %c0_i32_0 = arith.constant 0 : i32
    %c0_i32_1 = arith.constant 0 : i32
    %c0_i32_2 = arith.constant 0 : i32
    return %c0_i32, %c0_i32_0, %c0_i32_1 : i32, i32, i32
  }
  func.func @transform_4(%arg0: i32) -> (i32, i32) {
    %c0_i32 = arith.constant 0 : i32
    %c0_i32_0 = arith.constant 0 : i32
    %c0_i32_1 = arith.constant 0 : i32
    return %c0_i32, %c0_i32_0 : i32, i32
  }
  func.func @transform_5(%arg0: i32) -> (i32, i32) {
    %c0_i32 = arith.constant 0 : i32
    %c0_i32_0 = arith.constant 0 : i32
    %c0_i32_1 = arith.constant 0 : i32
    return %c0_i32, %c0_i32_0 : i32, i32
  }
  func.func @transform_6(%arg0: i32) -> (i32, i32) {
    %c0_i32 = arith.constant 0 : i32
    %c0_i32_0 = arith.constant 0 : i32
    %c0_i32_1 = arith.constant 0 : i32
    return %c0_i32, %c0_i32_0 : i32, i32
  }
  func.func @transform_7(%arg0: i32) -> (i32, i32, i32) {
    %c0_i32 = arith.constant 0 : i32
    %c0_i32_0 = arith.constant 0 : i32
    %c0_i32_1 = arith.constant 0 : i32
    return %arg0, %c0_i32, %c0_i32_0 : i32, i32, i32
  }
}

</mosaic_0001>

<bundles_post_ra>
// kernel: bottleneck_forward.1
= control target key start
LH: loop header
LB: loop body
LE: loop exit
PB: predicated region body
PF: predicated region fallthrough
CT: control target
= control target key end

     0   :  { %12 = vsyncpa [#allocation4], 0  ;;  %s7007_s0 = inlined_call_operand.vmem [shape: bf16[2,256,128], index: 0, kind: input, shape index: {}]   ;;  %s7008_s1 = inlined_call_operand.vmem [shape: bf16[128,32], index: 1, kind: input, shape index: {}]   ;;  %s7009_s2 = inlined_call_operand.vmem [shape: f32[1,32], index: 2, kind: input, shape index: {}]   ;;  %s7010_s3 = inlined_call_operand.vmem [shape: bf16[3,96,32], index: 3, kind: input, shape index: {}]   ;;  %s7011_s4 = inlined_call_operand.vmem [shape: f32[1,32], index: 4, kind: input, shape index: {}]   ;;  %s7012_s5 = inlined_call_operand.vmem [shape: bf16[32,128], index: 5, kind: input, shape index: {}]   ;;  %s7013_s6 = inlined_call_operand.vmem [shape: f32[1,128], index: 6, kind: input, shape index: {}]   ;;  %s7014_s7 = inlined_call_operand.hbm [shape: bf16[2,256,128], index: 7, kind: output, shape index: {}]  }
   0x1   :  { %14 = vsyncpa [#allocation4 + $0x1], 0  ;;  %s5213_s24 = smov 0   ;;  %s5215_s25 = smov 0  }
   0x2   :  { %s5217_s26 = smov 0   ;;  %s5219_s27 = smov 0  }
   0x3 LB: > { %s5234_s28 = sadd.s32 4294967295, %s5166_s27   ;;  %s3926_s29 = sadd.s32 4294967294, %s5166_s27   ;;  %s5166_s27 = sphi %s5219_s27, %s7462_s27   ;;  %s5162_s26 = sphi %s5217_s26, %s7461_s26   ;;  %s5158_s25 = sphi %s5215_s25, %s7460_s25   ;;  %s5154_s24 = sphi %s5213_s24, %s7459_s24  }
   0x4   : > { %s5238_s30 = sadd.s32 1, %s5166_s27   ;;  %s179_s8 = sadd.s32 1, %s5162_s26 }
   0x5   : > { %s176_s9 = ssub.s32 %s5166_s27, %s5238_s30  ;;  %p189_p0 = scmp.ne.s32.totalorder %s5162_s26, %s5158_s25 }
   0x6   : > { %p177_p1 = scmp.eq.s32.totalorder %s176_s9, 0  ;;  %p190_p2 = scmp.eq.s32.totalorder %s5234_s28, 1 }
   0x7   : > { %p195_p3 = scmp.ne.s32.totalorder %s5158_s25, %s5154_s24  ;;  %p196_p4 = scmp.eq.s32.totalorder %s3926_s29, 1 }
   0x8   : > { %s5249_s10 = scalar_select %p177_p1, %s5162_s26, %s179_s8  }
   0x9   : > { %p5251_p5 = por %p190_p2, %p189_p0  ;;  %p5255_p6 = por %p196_p4, %p195_p3 }
   0xa   : > { %p3929_p7 = scmp.ge.s32.totalorder %s5166_s27, 1  ;;  %p240_p8 = scmp.lt.s32.totalorder %s5166_s27, 3 }
   0xc   : > { %p241_p9 = pnand %p3929_p7, %p240_p8 }
   0xe   : > { %244 = sbr.rel (%p241_p9) target bundleno = 995 (0x3e3), region = 48 }
  0x13   : > { %v5018_v0 = vld [vmem:[%s7008_s1 + $0x38] sm:$0xff]   ;;  %p272_p10 = scmp.lt.s32.totalorder %s5234_s28, 1  ;;  %v5019_v1 = vld [vmem:[%s7008_s1 + $0x30] sm:$0xff]   ;;  %v5020_v2 = vld [vmem:[%s7008_s1 + $0x28] sm:$0xff]   ;;  %vm7015_vm0 = vcmask 261120   ;;  %v5168_v24 = vmov 0.0   ;;  %v709_v28 = vlaneseq }
  0x14   : > { %4342 = vmatprep.subr.bf16.mxu0 %v5018_v0  ;;  %v5021_v3 = vld [vmem:[%s7008_s1 + $0x20] sm:$0xff]   ;;  %v5022_v5 = vld [vmem:[%s7008_s1 + $0x18] sm:$0xff]   ;;  %v5023_v6 = vld [vmem:[%s7008_s1 + $0x10] sm:$0xff]   ;;  %672 = vst.msk [vmem:[#allocation2 + $0x8] sm:$0xff] %vm7015_vm0, %v5168_v24  ;;  %s5170_s18 = smov 64   ;;  %s269_s21 = sand.u32 1, %s5158_s25  }
  0x15   : > { %s273_s17 = scalar_select %p272_p10, %s5234_s28, 1  ;;  %4343 = vmatpush3.bf16.msra.mxu0 %v5018_v0  ;;  %v5024_v7 = vld [vmem:[%s7008_s1 + $0x8] sm:$0xff]   ;;  %v5025_v8 = vld [vmem:[%s7008_s1] sm:$0xff]   ;;  %673 = vst.msk [vmem:[#allocation2 + $0x10] sm:$0xff] %vm7015_vm0, %v5168_v24  ;;  %671 = vst.msk [vmem:[#allocation2] sm:$0xff] %vm7015_vm0, %v5168_v24  ;;  %v5323_v32 = vshrl.u32 %v709_v28, 7 }
  0x16   : > { %4344 = vmatprep.subr.bf16.mxu0 %v5019_v1  ;;  %674 = vst.msk [vmem:[#allocation2 + $0x118] sm:$0xff] %vm7015_vm0, %v5168_v24  ;;  %675 = vst.msk [vmem:[#allocation2 + $0x120] sm:$0xff] %vm7015_vm0, %v5168_v24  ;;  %v5318_v29 = vld [vmem:[%s7009_s2] ss:$0 sm:$0xff]  ;;  %v5042_v30 = vld [vmem:[%s7010_s3 + $0x58] sm:$0xff]   ;;  %s3930_s22 = sshll.u32 %s269_s21, 7 }
  0x17   : > { %s4105_s20 = sshll.u32 %s273_s17, 7  ;;  %676 = vst.msk [vmem:[#allocation2 + $0x128] sm:$0xff] %vm7015_vm0, %v5168_v24  ;;  %4558 = vmatprep.subr.bf16.mxu1 %v5042_v30  ;;  %v711_v38 = vadd.s32 8, %v5323_v32  ;;  %v5043_v41 = vld [vmem:[%s7010_s3 + $0x50] sm:$0xff]   ;;  %v712_v42 = vadd.s32 16, %v5323_v32  ;;  %v714_v50 = vadd.s32 32, %v5323_v32 }
  0x18   : > { %s5275_s23 = scalar_lea.vmem %s7007_s0, %s4105_s20  ;;  %s5169_s20 = smov 32   ;;  %4564 = vmatpush3.bf16.msra.mxu1 %v5042_v30  ;;  %v713_v53 = vadd.s32 24, %v5323_v32  ;;  %v5044_v54 = vld [vmem:[%s7010_s3 + $0x48] sm:$0xff]  }
  0x19   : > { %4345 = vmatpush3.bf16.msra.mxu0 %v5019_v1  ;;  %v278_v4 = vld [vmem:[%s5275_s23] sm:$0xff]   ;;  %v280_v9 = vld [vmem:[%s5275_s23 + $0x8] sm:$0xff]   ;;  %v282_v10 = vld [vmem:[%s5275_s23 + $0x10] sm:$0xff]   ;;  %4559 = vmatprep.subr.bf16.mxu1 %v5043_v41  ;;  %v753_v47 = vand.u32 15, %v711_v38  ;;  %v760_v51 = vand.u32 15, %v712_v42  ;;  %v774_v62 = vand.u32 15, %v714_v50 }
  0x1a   : > { %4346 = vmatprep.subr.bf16.mxu0 %v5020_v2  ;;  %4358 = vmatprep.mubr.bf16.mxu0 %v278_v4  ;;  %v284_v11 = vld [vmem:[%s5275_s23 + $0x18] sm:$0xff]   ;;  %v286_v12 = vld [vmem:[%s5275_s23 + $0x20] sm:$0xff]   ;;  %v288_v13 = vld [vmem:[%s5275_s23 + $0x28] sm:$0xff]   ;;  %s6898_s29 = scalar_lea.vmem [#allocation3], %s3930_s22  ;;  %s6965_s14 = scalar_lea.sflag [#allocation4], %s269_s21 }
  0x1b   : > { %v290_v14 = vld [vmem:[%s5275_s23 + $0x30] sm:$0xff]   ;;  %v292_v15 = vld [vmem:[%s5275_s23 + $0x38] sm:$0xff]   ;;  %v294_v16 = vld [vmem:[%s5275_s23 + $0x40] sm:$0xff]   ;;  %vm5345_vm1 = vcmp.le.s32.totalorder %v753_v47, 14  ;;  %vm5351_vm2 = vcmp.ge.s32.totalorder %v760_v51, 1  ;;  %vm5370_vm3 = vcmp.ge.s32.totalorder %v774_v62, 1 }
  0x1c   : > { %v296_v17 = vld [vmem:[%s5275_s23 + $0x48] sm:$0xff]   ;;  %v298_v18 = vld [vmem:[%s5275_s23 + $0x50] sm:$0xff]   ;;  %v300_v19 = vld [vmem:[%s5275_s23 + $0x58] sm:$0xff]   ;;  %4565 = vmatpush3.bf16.msra.mxu1 %v5043_v41  ;;  %v722_v47 = vadd.s32 96, %v5323_v32  ;;  %s3864_s8 = sshll.u32 %s6898_s29, 4  ;;  %s5171_s15 = smov [#allocation3]   ;;  %s6960_s8 = int_to_ptr.vmem [resolvable:$true] %s3864_s8 }
  0x1d   : > { %4347 = vmatpush3.bf16.msra.mxu0 %v5020_v2  ;;  %v302_v20 = vld [vmem:[%s5275_s23 + $0x60] sm:$0xff]   ;;  %v304_v21 = vld [vmem:[%s5275_s23 + $0x68] sm:$0xff]   ;;  %v306_v22 = vld [vmem:[%s5275_s23 + $0x70] sm:$0xff]   ;;  %4560 = vmatprep.subr.bf16.mxu1 %v5044_v54  ;;  %v767_v2 = vand.u32 15, %v713_v53  ;;  %s5110_s16 = sshll.u32 %s5171_s15, 4  ;;  %s5111_s16 = int_to_ptr.vmem [resolvable:$false] %s5110_s16 }
  0x1e   : > { %4348 = vmatprep.subr.bf16.mxu0 %v5021_v3  ;;  %v308_v23 = vld [vmem:[%s5275_s23 + $0x78] sm:$0xff]   ;;  %v1254_v25 = vld [vmem:[#allocation2 + $0x8] sm:$0xff]  ;;  %v1255_v26 = vld [vmem:[#allocation2 + $0x10] sm:$0xff]  ;;  %s5112_s17 = scalar_lea.vmem %s5111_s16, 4096  ;;  %p5113_p0 = scmp.lt.s32.totalorder %s6960_s8, %s5111_s16 }
  0x1f   : > { %v4613_v27 = vpack.i.bf16 %v1255_v26, %v1254_v25  ;;  %v1286_v61 = vld [vmem:[#allocation2 + $0x9] sm:$0xff]  ;;  %vm5375_vm4 = vcmp.le.s32.totalorder %v767_v2, 14  ;;  %v5046_v26 = vld [vmem:[%s7010_s3 + $0x38] sm:$0xff]  }
  0x20   : > { %4566 = vmatpush3.bf16.msra.mxu1 %v5044_v54  ;;  %v5047_v42 = vld [vmem:[%s7010_s3 + $0x30] sm:$0xff]  }
  0x21   : > { %4349 = vmatpush3.bf16.msra.mxu0 %v5021_v3  ;;  %4614 = vrot.lane.b32.xlu0 %v4613_v27, %s5169_s20  ;;  %v5045_v3 = vld [vmem:[%s7010_s3 + $0x40] sm:$0xff]  }
  0x22   : > { %4350 = vmatprep.subr.bf16.mxu0 %v5022_v5  ;;  %4561 = vmatprep.subr.bf16.mxu1 %v5045_v3 }
  0x24   : > { %4567 = vmatpush3.bf16.msra.mxu1 %v5045_v3 }
  0x25   : > { %4351 = vmatpush3.bf16.msra.mxu0 %v5022_v5  ;;  %4562 = vmatprep.subr.bf16.mxu1 %v5046_v26 }
  0x26   : > { %4352 = vmatprep.subr.bf16.mxu0 %v5023_v6 }
  0x28   : > { %4568 = vmatpush3.bf16.msra.mxu1 %v5046_v26 }
  0x29   : > { %4353 = vmatpush3.bf16.msra.mxu0 %v5023_v6  ;;  %4563 = vmatprep.subr.bf16.mxu1 %v5047_v42 }
  0x2a   : > { %4354 = vmatprep.subr.bf16.mxu0 %v5024_v7 }
  0x2c   : > { %4569 = vmatpush3.bf16.msra.mxu1 %v5047_v42 }
  0x2d   : > { %4355 = vmatpush3.bf16.msra.mxu0 %v5024_v7 }
  0x2e   : > { %4356 = vmatprep.subr.bf16.mxu0 %v5025_v8 }
  0x31   : > { %4357 = vmatpush3.bf16.msra.mxu0 %v5025_v8  ;;  %v716_v8 = vadd.s32 48, %v5323_v32 }
  0x32   : > { %4390 = vmatprep.subr.bf16.mxu0 %v5042_v30 }
  0x33   : > { %v788_v27 = vand.u32 15, %v716_v8 }
  0x34   : > { %4359 = vmatmul.mubr.bf16.vlgmr.msra.gmra.mxu0 %v280_v9 }
  0x35   : > { %4362 = vmatprep.mubr.bf16.mxu0 %v282_v10  ;;  %4391 = vmatpush3.bf16.msra.mxu0 %v5042_v30  ;;  %vm5406_vm5 = vcmp.ge.s32.totalorder %v788_v27, 1 }
  0x36   : > { %4392 = vmatprep.subr.bf16.mxu0 %v5043_v41 }
  0x39   : > { %4393 = vmatpush3.bf16.msra.mxu0 %v5043_v41 }
  0x3a   : > { %4394 = vmatprep.subr.bf16.mxu0 %v5044_v54 }
  0x3c   : > { %4363 = vmatmul.mubr.bf16.gmra.mxu0 %v284_v11 }
  0x3d   : > { %4366 = vmatprep.mubr.bf16.mxu0 %v286_v12  ;;  %4395 = vmatpush3.bf16.msra.mxu0 %v5044_v54 }
  0x3e   : > { %4396 = vmatprep.subr.bf16.mxu0 %v5045_v3 }
  0x41   : > { %4397 = vmatpush3.bf16.msra.mxu0 %v5045_v3 }
  0x42   : > { %4398 = vmatprep.subr.bf16.mxu0 %v5046_v26 }
  0x44   : > { %4367 = vmatmul.mubr.bf16.gmra.mxu0 %v288_v13 }
  0x45   : > { %4370 = vmatprep.mubr.bf16.mxu0 %v290_v14  ;;  %4399 = vmatpush3.bf16.msra.mxu0 %v5046_v26 }
  0x46   : > { %4400 = vmatprep.subr.bf16.mxu0 %v5047_v42 }
  0x49   : > { %4401 = vmatpush3.bf16.msra.mxu0 %v5047_v42 }
  0x4c   : > { %4371 = vmatmul.mubr.bf16.gmra.mxu0 %v292_v15 }
  0x4d   : > { %4374 = vmatprep.mubr.bf16.mxu0 %v294_v16 }
  0x54   : > { %4375 = vmatmul.mubr.bf16.gmra.mxu0 %v296_v17 }
  0x55   : > { %4378 = vmatprep.mubr.bf16.mxu0 %v298_v18 }
  0x5c   : > { %4379 = vmatmul.mubr.bf16.gmra.mxu0 %v300_v19 }
  0x5d   : > { %4382 = vmatprep.mubr.bf16.mxu0 %v302_v20  ;;  %v715_v20 = vadd.s32 40, %v5323_v32 }
  0x64   : > { %4383 = vmatmul.mubr.bf16.gmra.mxu0 %v304_v21 }
  0x65   : > { %4386 = vmatprep.mubr.bf16.mxu0 %v306_v22 }
  0x6c   : > { %4387 = vmatmul.mubr.bf16.gmra.mxu0 %v308_v23 }
  0xf4   : > { %v4360_v31 = vpop.f32.mrf.mxu0 }
  0xf5   : > { %v520_v33 = vadd.f32 %v4360_v31, %v5318_v29 }
  0xf6   : > { %v511_v34 = vpop.f32.mrf.mxu0 }
  0xf7   : > { %v640_v35 = vmax.f32 %v520_v33, 0.0  ;;  %v512_v36 = vadd.f32 %v5318_v29, %v511_v34  ;;  %v720_v34 = vadd.s32 80, %v5323_v32 }
  0xf8   : > { %v4361_v37 = vpop.f32.mrf.mxu0 }
  0xf9   : > { %679 = vst.msk [vmem:[#allocation2 + $0x28] sm:$0xff] %vm7015_vm0, %v640_v35  ;;  %v638_v39 = vmax.f32 %v512_v36, 0.0  ;;  %v523_v40 = vadd.f32 %v4361_v37, %v5318_v29 }
  0xfa   : > { %v514_v43 = vpop.f32.mrf.mxu0 }
  0xfb   : > { %677 = vst.msk [vmem:[#allocation2 + $0x18] sm:$0xff] %vm7015_vm0, %v638_v39  ;;  %v641_v44 = vmax.f32 %v523_v40, 0.0  ;;  %v515_v45 = vadd.f32 %v5318_v29, %v514_v43  ;;  %v7111_v43 = vmov 0 }
  0xfc   : > { %v4364_v46 = vpop.f32.mrf.mxu0  ;;  %v7112_v43 = vsel %vm5406_vm5, 4294967295, %v7111_v43 }
  0xfd   : > { %680 = vst.msk [vmem:[#allocation2 + $0x30] sm:$0xff] %vm7015_vm0, %v641_v44  ;;  %v639_v48 = vmax.f32 %v515_v45, 0.0  ;;  %v536_v49 = vadd.f32 %v4364_v46, %v5318_v29  ;;  %7113 = vst [vmem:[#allocation7_spill] sm:$0xff] %v7112_v43  ;;  %v781_v46 = vand.u32 15, %v715_v20 }
  0xfe   : > { %v527_v52 = vpop.f32.mrf.mxu0 }
  0xff   : > { %678 = vst.msk [vmem:[#allocation2 + $0x20] sm:$0xff] %vm7015_vm0, %v639_v48  ;;  %v644_v55 = vmax.f32 %v536_v49, 0.0  ;;  %v528_v56 = vadd.f32 %v5318_v29, %v527_v52  ;;  %v816_v48 = vand.u32 15, %v720_v34  ;;  %vm5427_vm6 = vcmp.le.s32.totalorder %v781_v46, 14 }
 0x100   : > { %v4365_v57 = vpop.f32.mrf.mxu0  ;;  %v1258_v24 = vld [vmem:[#allocation2 + $0x28] sm:$0xff] }
 0x101   : > { %683 = vst.msk [vmem:[#allocation2 + $0x48] sm:$0xff] %vm7015_vm0, %v644_v55  ;;  %v642_v59 = vmax.f32 %v528_v56, 0.0  ;;  %v539_v60 = vadd.f32 %v4365_v57, %v5318_v29  ;;  %v717_v57 = vadd.s32 56, %v5323_v32  ;;  %vm5431_vm7 = vcmp.ge.s32.totalorder %v816_v48, 1 }
 0x102   : > { %v530_v0 = vpop.f32.mrf.mxu0  ;;  %v1287_v1 = vld [vmem:[#allocation2 + $0x11] sm:$0xff] }
 0x103   : > { %681 = vst.msk [vmem:[#allocation2 + $0x38] sm:$0xff] %vm7015_vm0, %v642_v59  ;;  %v645_v4 = vmax.f32 %v539_v60, 0.0  ;;  %v531_v5 = vadd.f32 %v5318_v29, %v530_v0  ;;  %v1319_v6 = vsel %vm5345_vm1, %v1287_v1, 0.0  ;;  %v5362_v7 = vld [vmem:[#allocation2 + $0x17] sm:$0xff] }
 0x104   : > { %v4368_v9 = vpop.f32.mrf.mxu0  ;;  %v4618_v10 = vpack.i.bf16 %v1319_v6, %v1286_v61  ;;  %v1259_v14 = vld [vmem:[#allocation2 + $0x30] sm:$0xff]  ;;  %v1256_v0 = vld [vmem:[#allocation2 + $0x18] sm:$0xff] }
 0x105   : > { %684 = vst.msk [vmem:[#allocation2 + $0x50] sm:$0xff] %vm7015_vm0, %v645_v4  ;;  %v643_v12 = vmax.f32 %v531_v5, 0.0  ;;  %v552_v13 = vadd.f32 %v4368_v9, %v5318_v29  ;;  %v4623_v31 = vpack.i.bf16 %v1259_v14, %v1258_v24  ;;  %v830_v4 = vand.u32 15, %v722_v47 }
 0x106   : > { %v543_v16 = vpop.f32.mrf.mxu0  ;;  %4619 = vrot.lane.b32.xlu1 %v4618_v10, %s5170_s18  ;;  %v1288_v17 = vld [vmem:[#allocation2 + $0x19] sm:$0xff]  ;;  %v1289_v18 = vld [vmem:[#allocation2 + $0x21] sm:$0xff]  ;;  %v7116_v5 = vmov 0  ;;  %v795_v14 = vand.u32 15, %v717_v57 }
 0x107   : > { %682 = vst.msk [vmem:[#allocation2 + $0x40] sm:$0xff] %vm7015_vm0, %v643_v12  ;;  %v648_v21 = vmax.f32 %v552_v13, 0.0  ;;  %v544_v22 = vadd.f32 %v5318_v29, %v543_v16  ;;  %v1738_v23 = vsel %vm5345_vm1, %v1289_v18, 0.0  ;;  %v5384_v25 = vld [vmem:[#allocation2 + $0x27] sm:$0xff]  ;;  %v1321_v37 = vsel %vm5375_vm4, %v1289_v18, 0.0 }
 0x108   : > { %v4369_v28 = vpop.f32.mrf.mxu0  ;;  %v4638_v30 = vpack.i.bf16 %v1738_v23, %v1288_v17  ;;  %v4643_v45 = vpack.i.bf16 %v1321_v37, %v1288_v17  ;;  %v1257_v52 = vld [vmem:[#allocation2 + $0x20] sm:$0xff]  ;;  %v7117_v5 = vsel %vm5431_vm7, 4294967295, %v7116_v5  ;;  %v719_v16 = vadd.s32 72, %v5323_v32 }
 0x109   : > { %687 = vst.msk [vmem:[#allocation2 + $0x68] sm:$0xff] %vm7015_vm0, %v648_v21  ;;  %v646_v35 = vmax.f32 %v544_v22, 0.0  ;;  %v555_v36 = vadd.f32 %v4369_v28, %v5318_v29  ;;  %v4633_v2 = vpack.i.bf16 %v1257_v52, %v1256_v0  ;;  %7118 = vst [vmem:[#allocation8_spill] sm:$0xff] %v7117_v5  ;;  %v1290_v21 = vld [vmem:[#allocation2 + $0x29] sm:$0xff]  ;;  %v724_v22 = vadd.s32 112, %v5323_v32 }
 0x10a   : > { %v546_v38 = vpop.f32.mrf.mxu0  ;;  %4639 = vrot.lane.b32.xlu0 %v4638_v30, %s5170_s18  ;;  %4624 = vrot.lane.b32.xlu1 %v4623_v31, %s5169_s20  ;;  %v5401_v41 = vld [vmem:[#allocation2 + $0x37] sm:$0xff]  ;;  %v726_v23 = vadd.s32 128, %v5323_v32  ;;  %vm5453_vm8 = vcmp.ge.s32.totalorder %v830_v4, 1  ;;  %v7120_v28 = vmov 0  ;;  %vm5470_vm9 = vcmp.le.s32.totalorder %v795_v14, 14 }
 0x10b   : > { %685 = vst.msk [vmem:[#allocation2 + $0x58] sm:$0xff] %vm7015_vm0, %v646_v35  ;;  %v649_v39 = vmax.f32 %v555_v36, 0.0  ;;  %v547_v40 = vadd.f32 %v5318_v29, %v546_v38  ;;  %7110 = vst [vmem:[#allocation6_spill] sm:$0xff] %v5401_v41  ;;  %v2555_v51 = vld [vmem:[#allocation2 + $0x38] sm:$0xff]  ;;  %v7121_v28 = vsel %vm5453_vm8, 4294967295, %v7120_v28  ;;  %v844_v58 = vand.u32 15, %v724_v22 }
 0x10c   : > { %v4372_v44 = vpop.f32.mrf.mxu0  ;;  %v5417_v56 = vld [vmem:[#allocation2 + $0x31] sm:$0xff]  ;;  %7122 = vst [vmem:[#allocation10_spill] sm:$0xff] %v7121_v28  ;;  %v7128_v4 = vmov 0  ;;  %v7132_v14 = vmov 0  ;;  %vm7153_vm7 = vcmask 261120   ;;  %v741_v5 = vadd.s32 248, %v5323_v32 }
 0x10d   : > { %688 = vst.msk [vmem:[#allocation2 + $0x70] sm:$0xff] %vm7015_vm0, %v649_v39  ;;  %v647_v49 = vmax.f32 %v547_v40, 0.0  ;;  %v568_v50 = vadd.f32 %v4372_v44, %v5318_v29  ;;  %v1740_v12 = vsel %vm5375_vm4, %v5417_v56, 0.0  ;;  %v2618_v36 = vsel %vm5345_vm1, %v5417_v56, 0.0 }
 0x10e   : > { %v559_v53 = vpop.f32.mrf.mxu0  ;;  %4644 = vrot.lane.b32.xlu0 %v4643_v45, %s5170_s18  ;;  %4629 = vrot.lane.b32.xlu1 %v4623_v31, %s5169_s20  ;;  %v2556_v54 = vld [vmem:[#allocation2 + $0x40] sm:$0xff]  ;;  %v4648_v27 = vpack.i.bf16 %v1740_v12, %v1290_v21  ;;  %v809_v39 = vand.u32 15, %v719_v16  ;;  %v5475_v40 = vadd.s32 88, %v5323_v32  ;;  %v858_v44 = vand.u32 15, %v726_v23  ;;  %v1263_v23 = vld [vmem:[#allocation2 + $0x50] sm:$0xff] }
 0x10f   : > { %v5415_v55 = vld [vmem:[#allocation2 + $0x41] sm:$0xff]  ;;  %686 = vst.msk [vmem:[#allocation2 + $0x60] sm:$0xff] %vm7015_vm0, %v647_v49  ;;  %v652_v60 = vmax.f32 %v568_v50, 0.0  ;;  %v560_v61 = vadd.f32 %v5318_v29, %v559_v53  ;;  %v5425_v62 = vpack.i.bf16 %v2556_v54, %v2555_v51  ;;  %v1292_v9 = vld [vmem:[#allocation2 + $0x39] sm:$0xff]  ;;  %v4653_v48 = vpack.i.bf16 %v2618_v36, %v1290_v21 }
 0x110   : > { %v4373_v1 = vpop.f32.mrf.mxu0  ;;  %v1742_v10 = vsel %vm5427_vm6, %v5415_v55, 0.0  ;;  %v2620_v35 = vsel %vm5375_vm4, %v5415_v55, 0.0  ;;  %v728_v49 = vadd.s32 144, %v5323_v32  ;;  %v1325_v53 = vsel %vm5470_vm9, %v5415_v55, 0.0  ;;  %v1262_v36 = vld [vmem:[#allocation2 + $0x48] sm:$0xff] }
 0x111   : > { %691 = vst.msk [vmem:[#allocation2 + $0x88] sm:$0xff] %vm7015_vm0, %v652_v60  ;;  %v650_v6 = vmax.f32 %v560_v61, 0.0  ;;  %v571_v8 = vadd.f32 %v4373_v1, %v5318_v29  ;;  %v4678_v26 = vpack.i.bf16 %v1742_v10, %v1292_v9  ;;  %v4683_v47 = vpack.i.bf16 %v2620_v35, %v1292_v9  ;;  %v1266_v30 = vld [vmem:[#allocation2 + $0x68] sm:$0xff] }
 0x112   : > { %v562_v13 = vpop.f32.mrf.mxu0  ;;  %4674 = vrot.lane.b32.xlu0 %v5425_v62, %s5169_s20  ;;  %4634 = vrot.lane.b32.xlu1 %v4633_v2, %s5169_s20  ;;  %v5447_v17 = vld [vmem:[#allocation2 + $0x57] sm:$0xff]  ;;  %v1323_v54 = vsel %vm5427_vm6, %v5417_v56, 0.0  ;;  %vm5495_vm10 = vcmp.le.s32.totalorder %v809_v39, 14  ;;  %v823_v0 = vand.u32 15, %v5475_v40  ;;  %v725_v1 = vadd.s32 120, %v5323_v32 }
 0x113   : > { %7119 = vst [vmem:[#allocation9_spill] sm:$0xff] %v5447_v17  ;;  %689 = vst.msk [vmem:[#allocation2 + $0x78] sm:$0xff] %vm7015_vm0, %v650_v6  ;;  %v653_v18 = vmax.f32 %v571_v8, 0.0  ;;  %v563_v20 = vadd.f32 %v5318_v29, %v562_v13  ;;  %v5506_v2 = vadd.s32 104, %v5323_v32  ;;  %vm5508_vm11 = vcmp.ge.s32.totalorder %v844_v58, 1 }
 0x114   : > { %v4376_v24 = vpop.f32.mrf.mxu0  ;;  %v7129_v4 = vsel %vm5508_vm11, 4294967295, %v7128_v4  ;;  %v4688_v10 = vpack.i.bf16 %v1325_v53, %v1292_v9  ;;  %v4658_v12 = vpack.i.bf16 %v1323_v54, %v1290_v21  ;;  %v729_v13 = vadd.s32 152, %v5323_v32 }
 0x115   : > { %692 = vst.msk [vmem:[#allocation2 + $0x90] sm:$0xff] %vm7015_vm0, %v653_v18  ;;  %v651_v31 = vmax.f32 %v563_v20, 0.0  ;;  %v584_v34 = vadd.f32 %v4376_v24, %v5318_v29  ;;  %7130 = vst [vmem:[#allocation12_spill] sm:$0xff] %v7129_v4  ;;  %vm5515_vm12 = vcmp.ge.s32.totalorder %v858_v44, 1  ;;  %v872_v9 = vand.u32 15, %v728_v49 }
 0x116   : > { %v575_v37 = vpop.f32.mrf.mxu0  ;;  %4679 = vrot.lane.b32.xlu0 %v4678_v26, %s5170_s18  ;;  %4649 = vrot.lane.b32.xlu1 %v4648_v27, %s5170_s18  ;;  %v5479_v45 = vld [vmem:[#allocation2 + $0x67] sm:$0xff]  ;;  %v7133_v14 = vsel %vm5515_vm12, 4294967295, %v7132_v14  ;;  %v5521_v20 = vld [vmem:[#allocation2 + $0x59] sm:$0xff]  ;;  %v851_v24 = vand.u32 15, %v725_v1  ;;  %v730_v27 = vadd.s32 160, %v5323_v32  ;;  %v5555_v54 = vadd.s32 168, %v5323_v32 }
 0x117   : > { %690 = vst.msk [vmem:[#allocation2 + $0x80] sm:$0xff] %vm7015_vm0, %v651_v31  ;;  %v656_v19 = vmax.f32 %v584_v34, 0.0  ;;  %v576_v42 = vadd.f32 %v5318_v29, %v575_v37  ;;  %7125 = vst [vmem:[#allocation11_spill] sm:$0xff] %v5479_v45  ;;  %v5499_v61 = vld [vmem:[#allocation2 + $0x61] sm:$0xff]  ;;  %v732_v31 = vadd.s32 176, %v5323_v32  ;;  %v5536_v37 = vadd.s32 136, %v5323_v32 }
 0x118   : > { %v4377_v46 = vpop.f32.mrf.mxu0  ;;  %7134 = vst [vmem:[#allocation14_spill] sm:$0xff] %v7133_v14  ;;  %v1746_v22 = vsel %vm5495_vm10, %v5499_v61, 0.0  ;;  %vm5558_vm13 = vcmp.ge.s32.totalorder %v872_v9, 1  ;;  %vm5567_vm14 = vcmp.le.s32.totalorder %v851_v24, 14  ;;  %vm5610_vm1 = vcmp.le.s32.totalorder %v823_v0, 14  ;;  %v5626_v0 = vld [vmem:[#allocation2 + $0x49] sm:$0xff] }
 0x119   : > { %695 = vst.msk [vmem:[#allocation2 + $0xa8] sm:$0xff] %vm7015_vm0, %v656_v19  ;;  %v654_v51 = vmax.f32 %v576_v42, 0.0  ;;  %v587_v52 = vadd.f32 %v4377_v46, %v5318_v29  ;;  %v5544_v42 = vld [vmem:[%s7010_s3 + $0x88] sm:$0xff]   ;;  %v4708_v44 = vpack.i.bf16 %v1746_v22, %v5521_v20  ;;  %v5547_v46 = vpack.i.bf16 %v1263_v23, %v1262_v36 }
 0x11a   : > { %v578_v57 = vpop.f32.mrf.mxu0  ;;  %4684 = vrot.lane.b32.xlu0 %v4683_v47, %s5170_s18  ;;  %4654 = vrot.lane.b32.xlu1 %v4653_v48, %s5170_s18  ;;  %v5512_v6 = vld [vmem:[#allocation2 + $0x77] sm:$0xff]  ;;  %7136 = vst [vmem:[#allocation16_spill] sm:$0xff] %v5544_v42  ;;  %v879_v47 = vand.u32 15, %v729_v13  ;;  %v900_v13 = vand.u32 15, %v732_v31  ;;  %v5579_v22 = vadd.s32 200, %v5323_v32  ;;  %v5582_v23 = vadd.s32 192, %v5323_v32 }
 0x11b   : > { %693 = vst.msk [vmem:[#allocation2 + $0x98] sm:$0xff] %vm7015_vm0, %v654_v51  ;;  %v657_v55 = vmax.f32 %v587_v52, 0.0  ;;  %v579_v56 = vadd.f32 %v5318_v29, %v578_v57  ;;  %7131 = vst [vmem:[#allocation13_spill] sm:$0xff] %v5512_v6  ;;  %v1270_v52 = vld [vmem:[#allocation2 + $0x88] sm:$0xff]  ;;  %4478 = vmatprep.subr.bf16.mxu0 %v5544_v42  ;;  %v7137_v57 = vmov 0  ;;  %v865_v24 = vand.u32 15, %v5536_v37 }
 0x11c   : > { %v4380_v8 = vpop.f32.mrf.mxu0  ;;  %v1271_v53 = vld [vmem:[#allocation2 + $0x90] sm:$0xff]  ;;  %v7138_v57 = vsel %vm5558_vm13, 4294967295, %v7137_v57  ;;  %vm5587_vm15 = vcmp.le.s32.totalorder %v879_v47, 14  ;;  %v1268_v36 = vld [vmem:[#allocation2 + $0x78] sm:$0xff]  ;;  %v893_v37 = vand.u32 15, %v5555_v54  ;;  %v7147_v54 = vmov 0 }
 0x11d   : > { %696 = vst.msk [vmem:[#allocation2 + $0xb0] sm:$0xff] %vm7015_vm0, %v657_v55  ;;  %v655_v16 = vmax.f32 %v579_v56, 0.0  ;;  %v600_v18 = vadd.f32 %v4380_v8, %v5318_v29  ;;  %7139 = vst [vmem:[#allocation17_spill] sm:$0xff] %v7138_v57  ;;  %v5565_v55 = vld [vmem:[#allocation2 + $0x51] sm:$0xff]  ;;  %v5572_v8 = vadd.s32 184, %v5323_v32  ;;  %vm5652_vm8 = vcmp.le.s32.totalorder %v865_v24, 14 }
 0x11e   : > { %v591_v21 = vpop.f32.mrf.mxu0  ;;  %4689 = vrot.lane.b32.xlu0 %v4688_v10, %s5170_s18  ;;  %4659 = vrot.lane.b32.xlu1 %v4658_v12, %s5170_s18  ;;  %v5539_v19 = vld [vmem:[#allocation2 + $0x87] sm:$0xff]  ;;  %v886_v12 = vand.u32 15, %v730_v27  ;;  %vm5664_vm13 = vcmp.le.s32.totalorder %v893_v37, 14  ;;  %vm7167_vm12 = vcmask 261120   ;;  %v746_v56 = vand.u32 15, %v5323_v32 }
 0x11f   : > { %694 = vst.msk [vmem:[#allocation2 + $0xa0] sm:$0xff] %vm7015_vm0, %v655_v16  ;;  %v660_v34 = vmax.f32 %v600_v18, 0.0  ;;  %v592_v35 = vadd.f32 %v5318_v29, %v591_v21  ;;  %7135 = vst [vmem:[#allocation15_spill] sm:$0xff] %v5539_v19  ;;  %v5584_v21 = vpack.i.bf16 %v1271_v53, %v1270_v52  ;;  %v907_v53 = vand.u32 15, %v5572_v8  ;;  %v5743_v17 = vld [vmem:[#allocation2 + $0x81] sm:$0xff] }
 0x120   : > { %v4381_v58 = vpop.f32.mrf.mxu0  ;;  %vm5615_vm4 = vcmp.ge.s32.totalorder %v886_v12, 1  ;;  %v914_v8 = vand.u32 15, %v5582_v23 }
 0x121   : > { %699 = vst.msk [vmem:[#allocation2 + $0xc8] sm:$0xff] %vm7015_vm0, %v660_v34  ;;  %v658_v49 = vmax.f32 %v592_v35, 0.0  ;;  %v603_v51 = vadd.f32 %v4381_v58, %v5318_v29  ;;  %v1269_v58 = vld [vmem:[#allocation2 + $0x80] sm:$0xff]  ;;  %v7148_v54 = vsel %vm5615_vm4, 4294967295, %v7147_v54  ;;  %vm5668_vm11 = vcmp.le.s32.totalorder %v907_v53, 14 }
 0x122   : > { %4709 = vrot.lane.b32.xlu0 %v4708_v44, %s5170_s18  ;;  %4664 = vrot.lane.b32.xlu1 %v5547_v46, %s5169_s20  ;;  %v594_v1 = vpop.f32.mrf.mxu0  ;;  %v5574_v10 = vld [vmem:[#allocation2 + $0x97] sm:$0xff]  ;;  %v1744_v44 = vsel %vm5470_vm9, %v5565_v55, 0.0  ;;  %7149 = vst [vmem:[#allocation19_spill] sm:$0xff] %v7148_v54  ;;  %v5630_v12 = vpack.i.bf16 %v1269_v58, %v1268_v36  ;;  %vm5696_vm5 = vcmp.ge.s32.totalorder %v914_v8, 1  ;;  %v740_v8 = vadd.s32 240, %v5323_v32 }
 0x123   : > { %7142 = vst [vmem:[#allocation18_spill] sm:$0xff] %v5574_v10  ;;  %697 = vst.msk [vmem:[#allocation2 + $0xb8] sm:$0xff] %vm7015_vm0, %v658_v49  ;;  %v661_v16 = vmax.f32 %v603_v51, 0.0  ;;  %v595_v18 = vadd.f32 %v5318_v29, %v594_v1  ;;  %v7150_v1 = vmov 0  ;;  %v1272_v36 = vld [vmem:[#allocation2 + $0x98] sm:$0xff] }
 0x124   : > { %v4384_v9 = vpop.f32.mrf.mxu0  ;;  %v1275_v42 = vld [vmem:[#allocation2 + $0xb0] sm:$0xff] }
 0x125   : > { %700 = vst.msk [vmem:[#allocation2 + $0xd0] sm:$0xff] %vm7015_vm0, %v661_v16  ;;  %v659_v31 = vmax.f32 %v595_v18, 0.0  ;;  %v616_v35 = vadd.f32 %v4384_v9, %v5318_v29  ;;  %vm5619_vm0 = vcmp.ge.s32.totalorder %v900_v13, 1  ;;  %v921_v18 = vand.u32 15, %v5579_v22 }
 0x126   : > { %4719 = vrot.lane.b32.xlu0 %v5584_v21, %s5169_s20  ;;  %4669 = vrot.lane.b32.xlu1 %v5425_v62, %s5169_s20  ;;  %v607_v47 = vpop.f32.mrf.mxu0  ;;  %v5604_v49 = vld [vmem:[#allocation2 + $0x99] sm:$0xff]  ;;  %v5606_v51 = vld [vmem:[#allocation2 + $0xa1] sm:$0xff]  ;;  %v7151_v1 = vsel %vm5619_vm0, 4294967295, %v7150_v1  ;;  %v736_v62 = vadd.s32 208, %v5323_v32  ;;  %v4693_v13 = vpack.i.bf16 %v1744_v44, %v5626_v0  ;;  %v1267_v44 = vld [vmem:[#allocation2 + $0x70] sm:$0xff]  ;;  %vm7174_vm0 = vcmask 261120  }
 0x127   : > { %7152 = vst [vmem:[#allocation20_spill] sm:$0xff] %v7151_v1  ;;  %698 = vst.msk [vmem:[#allocation2 + $0xc0] sm:$0xff] %vm7153_vm7, %v659_v31  ;;  %v664_v16 = vmax.f32 %v616_v35, 0.0  ;;  %v608_v40 = vadd.f32 %v5318_v29, %v607_v47  ;;  %v2632_v50 = vsel %vm5567_vm14, %v5606_v51, 0.0  ;;  %v1337_v31 = vsel %vm5587_vm15, %v5606_v51, 0.0  ;;  %v5639_v35 = vld [vmem:[#allocation2 + $0xa7] sm:$0xff] }
 0x128   : > { %v4385_v9 = vpop.f32.mrf.mxu0  ;;  %7154 = vst [vmem:[#allocation21_spill] sm:$0xff] %v5639_v35  ;;  %v1273_v58 = vld [vmem:[#allocation2 + $0xa0] sm:$0xff]  ;;  %v5644_v47 = vpack.i.bf16 %v2632_v50, %v5604_v49  ;;  %v5647_v27 = vpack.i.bf16 %v1337_v31, %v5604_v49  ;;  %v928_v31 = vand.u32 15, %v736_v62  ;;  %v5674_v33 = vpack.i.bf16 %v1267_v44, %v1266_v30  ;;  %v1264_v50 = vld [vmem:[#allocation2 + $0x58] sm:$0xff] }
 0x129   : > { %703 = vst.msk [vmem:[#allocation2 + $0xe8] sm:$0xff] %vm7153_vm7, %v664_v16  ;;  %v662_v22 = vmax.f32 %v608_v40, 0.0  ;;  %v619_v23 = vadd.f32 %v4385_v9, %v5318_v29  ;;  %v737_v40 = vadd.s32 216, %v5323_v32  ;;  %v5672_v11 = vpack.i.bf16 %v1273_v58, %v1272_v36  ;;  %v1265_v62 = vld [vmem:[#allocation2 + $0x60] sm:$0xff]  ;;  %v5676_v35 = vld [vmem:[#allocation2 + $0x71] sm:$0xff] }
 0x12a   : > { %4724 = vrot.lane.b32.xlu0 %v5630_v12, %s5169_s20  ;;  %4694 = vrot.lane.b32.xlu1 %v4693_v13, %s5170_s18  ;;  %v610_v26 = vpop.f32.mrf.mxu0  ;;  %v5657_v9 = vld [vmem:[#allocation2 + $0xb7] sm:$0xff]  ;;  %vm5684_vm4 = vcmp.le.s32.totalorder %v921_v18, 14  ;;  %v7168_v36 = vmov 0  ;;  %v1748_v54 = vsel %vm5610_vm1, %v5676_v35, 0.0 }
 0x12b   : > { %7157 = vst [vmem:[#allocation22_spill] sm:$0xff] %v5657_v9  ;;  %701 = vst.msk [vmem:[#allocation2 + $0xd8] sm:$0xff] %vm7153_vm7, %v662_v22  ;;  %v665_v59 = vmax.f32 %v619_v23, 0.0  ;;  %v611_v48 = vadd.f32 %v5318_v29, %v610_v26  ;;  %v7162_v22 = vand.u32 15, %v5506_v2  ;;  %v1754_v2 = vsel %vm5652_vm8, %v5606_v51, 0.0  ;;  %v1190_v26 = vld [vmem:[#allocation2 + $0x7] sm:$0xff] }
 0x12c   : > { %v4388_v39 = vpop.f32.mrf.mxu0  ;;  %v7169_v36 = vsel %vm5696_vm5, 4294967295, %v7168_v36  ;;  %v7171_v51 = vmov 0  ;;  %vm7179_vm5 = vcmask 261120  }
 0x12d   : > { %vm5680_vm7 = vcmp.le.s32.totalorder %v7162_v22, 14  ;;  %704 = vst.msk [vmem:[#allocation2 + $0xf0] sm:$0xff] %vm7167_vm12, %v665_v59  ;;  %v663_v53 = vmax.f32 %v611_v48, 0.0  ;;  %v632_v23 = vadd.f32 %v4388_v39, %v5318_v29  ;;  %7170 = vst [vmem:[#allocation23_spill] sm:$0xff] %v7169_v36  ;;  %v935_v39 = vand.u32 15, %v737_v40 }
 0x12e   : > { %4744 = vrot.lane.b32.xlu0 %v5672_v11, %s5169_s20  ;;  %4699 = vrot.lane.b32.xlu1 %v5674_v33, %s5169_s20  ;;  %v623_v18 = vpop.f32.mrf.mxu0  ;;  %v5704_v58 = vld [vmem:[#allocation2 + $0xb9] sm:$0xff]  ;;  %v5706_v59 = vld [vmem:[#allocation2 + $0xc1] sm:$0xff]  ;;  %v739_v48 = vadd.s32 232, %v5323_v32  ;;  %vm5709_vm12 = vcmp.ge.s32.totalorder %v928_v31, 1  ;;  %v4703_v22 = vpack.i.bf16 %v1265_v62, %v1264_v50  ;;  %v4748_v40 = vpack.i.bf16 %v1754_v2, %v5604_v49 }
 0x12f   : > { %v7172_v51 = vsel %vm5709_vm12, 4294967295, %v7171_v51  ;;  %702 = vst.msk [vmem:[#allocation2 + $0xe0] sm:$0xff] %vm7174_vm0, %v663_v53  ;;  %v668_v44 = vmax.f32 %v632_v23, 0.0  ;;  %v624_v30 = vadd.f32 %v5318_v29, %v623_v18  ;;  %v5719_v9 = vld [vmem:[#allocation2 + $0xc7] sm:$0xff]  ;;  %v2636_v1 = vsel %vm5587_vm15, %v5706_v59, 0.0 }
 0x130   : > { %7173 = vst [vmem:[#allocation24_spill] sm:$0xff] %v7172_v51  ;;  %7175 = vst [vmem:[#allocation25_spill] sm:$0xff] %v5719_v9  ;;  %v4389_v31 = vpop.f32.mrf.mxu0  ;;  %v1341_v53 = vsel %vm5668_vm11, %v5706_v59, 0.0  ;;  %v5733_v18 = vld [vmem:[#allocation2 + $0xc9] sm:$0xff]  ;;  %v5736_v49 = vpack.i.bf16 %v2636_v1, %v5704_v58  ;;  %v956_v1 = vand.u32 15, %v740_v8  ;;  %v1758_v41 = vsel %vm5664_vm13, %v5706_v59, 0.0 }
 0x131   : > { %707 = vst.msk [vmem:[#allocation2 + $0x108] sm:$0xff] %vm7174_vm0, %v668_v44  ;;  %v666_v62 = vmax.f32 %v624_v30, 0.0  ;;  %v635_v23 = vadd.f32 %v4389_v31, %v5318_v29  ;;  %v5739_v2 = vpack.i.bf16 %v1341_v53, %v5704_v58  ;;  %vm5747_vm0 = vcmp.le.s32.totalorder %v935_v39, 14  ;;  %v5754_v53 = vld [vmem:[#allocation2 + $0x69] sm:$0xff] }
 0x132   : > { %4749 = vrot.lane.b32.xlu0 %v4748_v40, %s5170_s18  ;;  %4704 = vrot.lane.b32.xlu1 %v4703_v22, %s5169_s20  ;;  %v626_v50 = vpop.f32.mrf.mxu0  ;;  %v5745_v36 = vld [vmem:[#allocation2 + $0xd1] sm:$0xff]  ;;  %v949_v44 = vand.u32 15, %v739_v48  ;;  %v4713_v45 = vpack.i.bf16 %v1748_v54, %v5754_v53  ;;  %v1750_v54 = vsel %vm5680_vm7, %v5743_v17, 0.0  ;;  %v5052_v30 = vld [vmem:[%s7010_s3 + $0x68] sm:$0xff]  }
 0x133   : > { %v5751_v31 = vld [vmem:[#allocation2 + $0xd7] sm:$0xff]  ;;  %705 = vst.msk [vmem:[#allocation2 + $0xf8] sm:$0xff] %vm7179_vm5, %v666_v62  ;;  %v669_v40 = vmax.f32 %v635_v23, 0.0  ;;  %v627_v9 = vadd.f32 %v5318_v29, %v626_v50  ;;  %v2638_v39 = vsel %vm5664_vm13, %v5745_v36, 0.0  ;;  %v1343_v8 = vsel %vm5684_vm4, %v5745_v36, 0.0 }
 0x134   : > { %7178 = vst [vmem:[#allocation26_spill] sm:$0xff] %v5751_v31  ;;  %v5763_v48 = vpack.i.bf16 %v2638_v39, %v5733_v18  ;;  %v2624_v29 = vsel %vm5470_vm9, %v5499_v61, 0.0  ;;  %v5774_v50 = vld [vmem:[#allocation2 + $0x79] sm:$0xff]  ;;  %v5781_v39 = vpack.i.bf16 %v1343_v8, %v5733_v18  ;;  %v5785_v62 = vld [vmem:[#allocation2 + $0x91] sm:$0xff]  ;;  %vm7180_vm9 = vmmov %vm7179_vm5  ;;  %v963_v31 = vand.u32 15, %v741_v5 }
 0x135   : > { %708 = vst.msk [vmem:[#allocation2 + $0x110] sm:$0xff] %vm7179_vm5, %v669_v40  ;;  %v667_v23 = vmax.f32 %v627_v9, 0.0  ;;  %vm5792_vm12 = vcmp.le.s32.totalorder %v949_v44, 14  ;;  %vm5804_vm5 = vcmp.ge.s32.totalorder %v956_v1, 1  ;;  %v7184_v8 = vmov 0  ;;  %v1276_v5 = vld [vmem:[#allocation2 + $0xb8] sm:$0xff] }
 0x136   : > { %4764 = vrot.lane.b32.xlu0 %v4703_v22, %s5169_s20  ;;  %4714 = vrot.lane.b32.xlu1 %v4713_v45, %s5170_s18  ;;  %v5787_v38 = vld [vmem:[#allocation2 + $0xd9] sm:$0xff]  ;;  %v5789_v51 = vld [vmem:[#allocation2 + $0xe1] sm:$0xff]  ;;  %v4778_v22 = vpack.i.bf16 %v2624_v29, %v5521_v20  ;;  %v4728_v45 = vpack.i.bf16 %v1750_v54, %v5774_v50  ;;  %v7185_v8 = vsel %vm5804_vm5, 4294967295, %v7184_v8  ;;  %v1314_v10 = vld [vmem:[#allocation2 + $0xe9] sm:$0xff] }
 0x137   : > { %706 = vst.msk [vmem:[#allocation2 + $0x100] sm:$0xff] %vm7180_vm9, %v667_v23  ;;  %v1345_v9 = vsel %vm5747_vm0, %v5789_v51, 0.0  ;;  %7186 = vst [vmem:[#allocation28_spill] sm:$0xff] %v7185_v8  ;;  %v1277_v44 = vld [vmem:[#allocation2 + $0xc0] sm:$0xff]  ;;  %v1752_v23 = vsel %vm5567_vm14, %v5785_v62, 0.0  ;;  %vm5817_vm9 = vcmp.le.s32.totalorder %v963_v31, 14 }
 0x138   : > { %v5802_v40 = vpack.i.bf16 %v1345_v9, %v5787_v38  ;;  %v5815_v9 = vld [vmem:[#allocation2 + $0x89] sm:$0xff]  ;;  %v2615_v1 = vld [vmem:[#allocation2 + $0x119] sm:$0xff] }
 0x139   : > { %v4733_v4 = vpack.i.bf16 %v1752_v23, %v5815_v9  ;;  %v1283_v37 = vld [vmem:[#allocation2 + $0xf0] sm:$0xff] }
 0x13a   : > { %7183 = vst [vmem:[#allocation27_spill] sm:$0xff] %v5802_v40  ;;  %4779 = vrot.lane.b32.xlu0 %v4778_v22, %s5170_s18  ;;  %4729 = vrot.lane.b32.xlu1 %v4728_v45, %s5170_s18  ;;  %v1315_v29 = vld [vmem:[#allocation2 + $0xf1] sm:$0xff]  ;;  %v5828_v45 = vpack.i.bf16 %v1277_v44, %v1276_v5  ;;  %v1274_v40 = vld [vmem:[#allocation2 + $0xa8] sm:$0xff]  ;;  %v4788_v22 = vpack.i.bf16 %v1758_v41, %v5704_v58  ;;  %v1329_v58 = vsel %vm5610_vm1, %v5499_v61, 0.0  ;;  %v1762_v61 = vsel %vm5684_vm4, %v5789_v51, 0.0 }
 0x13b   : > { %v5813_v54 = vld [vmem:[#allocation2 + $0xf7] sm:$0xff]  ;;  %v2642_v57 = vsel %vm5684_vm4, %v1315_v29, 0.0  ;;  %v1347_v6 = vsel %vm5792_vm12, %v1315_v29, 0.0  ;;  %v5843_v5 = vld [vmem:[%s7010_s3 + $0x28] sm:$0xff]   ;;  %v4808_v34 = vpack.i.bf16 %v1329_v58, %v5521_v20  ;;  %v2622_v20 = vsel %vm5427_vm6, %v5565_v55, 0.0 }
 0x13c   : > { %7187 = vst [vmem:[#allocation29_spill] sm:$0xff] %v5813_v54  ;;  %v1735_v19 = vld [vmem:[#allocation2 + $0x109] sm:$0xff]  ;;  %v1736_v14 = vld [vmem:[#allocation2 + $0x111] sm:$0xff]  ;;  %v5831_v31 = vpack.i.bf16 %v2642_v57, %v1314_v10  ;;  %v5833_v43 = vpack.i.bf16 %v1347_v6, %v1314_v10  ;;  %7191 = vst [vmem:[#allocation31_spill] sm:$0xff] %v5843_v5  ;;  %4434 = vmatprep.subr.bf16.mxu1 %v5843_v5  ;;  %v5861_v54 = vpack.i.bf16 %v1275_v42, %v1274_v40 }
 0x13d   : > { %v2646_v8 = vsel %vm5792_vm12, %v1736_v14, 0.0  ;;  %v5848_v6 = vld [vmem:[#allocation2 + $0xb1] sm:$0xff]  ;;  %v5875_v5 = vld [vmem:[#allocation2 + $0xa9] sm:$0xff]  ;;  %vm5972_vm6 = vcmp.ge.s32.totalorder %v746_v56, 1 }
 0x13e   : > { %7190 = vst [vmem:[#allocation30_spill] sm:$0xff] %v5833_v43  ;;  %4784 = vrot.lane.b32.xlu0 %v5828_v45, %s5169_s20  ;;  %4734 = vrot.lane.b32.xlu1 %v4733_v4, %s5170_s18  ;;  %v5850_v57 = vld [vmem:[#allocation2 + $0xf9] sm:$0xff]  ;;  %v5852_v59 = vld [vmem:[#allocation2 + $0x101] sm:$0xff]  ;;  %v5854_v44 = vpack.i.bf16 %v2646_v8, %v1735_v19  ;;  %v1760_v43 = vsel %vm5668_vm11, %v5745_v36, 0.0  ;;  %v1756_v8 = vsel %vm5587_vm15, %v5848_v6, 0.0  ;;  %vm7088_vm15 = vcmask 523264  }
 0x13f   : > { %v1349_v23 = vsel %vm5817_vm9, %v5852_v59, 0.0  ;;  %v4793_v41 = vpack.i.bf16 %v1760_v43, %v5733_v18  ;;  %v4753_v42 = vpack.i.bf16 %v1756_v8, %v5875_v5  ;;  %v1278_v36 = vld [vmem:[#allocation2 + $0xc8] sm:$0xff]  ;;  %v1280_v40 = vld [vmem:[#allocation2 + $0xd8] sm:$0xff]  ;;  %v4773_v8 = vpack.i.bf16 %v2622_v20, %v5626_v0 }
 0x140   : > { %v5864_v4 = vpack.i.bf16 %v1349_v23, %v5850_v57  ;;  %v1279_v23 = vld [vmem:[#allocation2 + $0xd0] sm:$0xff] }
 0x141   : > { %v5890_v18 = vpack.i.bf16 %v1279_v23, %v1278_v36  ;;  %v1327_v36 = vsel %vm5495_vm10, %v5565_v55, 0.0  ;;  %v1284_v23 = vld [vmem:[#allocation2 + $0xf8] sm:$0xff]  ;;  %v1766_v55 = vsel %vm5792_vm12, %v5852_v59, 0.0  ;;  %vm7084_vm12 = vcmask 785408  }
 0x142   : > { %4789 = vrot.lane.b32.xlu0 %v4788_v22, %s5170_s18  ;;  %4739 = vrot.lane.b32.xlu1 %v5861_v54, %s5169_s20  ;;  %v1281_v22 = vld [vmem:[#allocation2 + $0xe0] sm:$0xff] }
 0x143   : > { %v5888_v43 = vpack.i.bf16 %v1281_v22, %v1280_v40  ;;  %v4803_v40 = vpack.i.bf16 %v1327_v36, %v5626_v0  ;;  %v1733_v22 = vld [vmem:[#allocation2 + $0x108] sm:$0xff]  ;;  %v2626_v0 = vsel %vm5495_vm10, %v5676_v35, 0.0  ;;  %vm7194_vm10 = vcmask 261120  }
 0x144   : > { %v4858_v28 = vpack.i.bf16 %v2626_v0, %v5754_v53 }
 0x146   : > { %4794 = vrot.lane.b32.xlu0 %v4793_v41, %s5170_s18  ;;  %4754 = vrot.lane.b32.xlu1 %v4753_v42, %s5170_s18  ;;  %v1764_v41 = vsel %vm5747_vm0, %v1315_v29, 0.0  ;;  %v1282_v42 = vld [vmem:[#allocation2 + $0xe8] sm:$0xff] }
 0x147   : > { %v4823_v3 = vpack.i.bf16 %v1764_v41, %v1314_v10  ;;  %v5908_v58 = vpack.i.bf16 %v1283_v37, %v1282_v42  ;;  %v1285_v10 = vld [vmem:[#allocation2 + $0x100] sm:$0xff] }
 0x14a   : > { %4809 = vrot.lane.b32.xlu0 %v4808_v34, %s5170_s18  ;;  %4759 = vrot.lane.b32.xlu1 %v5547_v46, %s5169_s20  ;;  %v4818_v46 = vpack.i.bf16 %v1762_v61, %v5787_v38  ;;  %v1768_v34 = vsel %vm5817_vm9, %v1736_v14, 0.0  ;;  %v1734_v61 = vld [vmem:[#allocation2 + $0x110] sm:$0xff]  ;;  %v5921_v14 = vpack.i.bf16 %v1285_v10, %v1284_v23 }
 0x14b   : > { %v4838_v29 = vpack.i.bf16 %v1768_v34, %v1735_v19  ;;  %v5923_v20 = vpack.i.bf16 %v1734_v61, %v1733_v22  ;;  %v4848_v19 = vpack.i.bf16 %v1766_v55, %v5850_v57  ;;  %v1222_v34 = vsel %vm5972_vm6, %v1190_v26, 0.0  ;;  %v6270_v23 = vld [vmem:[#allocation2 + $0x6f] sm:$0xff] }
 0x14e   : > { %4814 = vrot.lane.b32.xlu0 %v5888_v43, %s5169_s20  ;;  %4769 = vrot.lane.b32.xlu1 %v5890_v18, %s5169_s20 }
 0x152   : > { %4819 = vrot.lane.b32.xlu0 %v4818_v46, %s5170_s18  ;;  %4774 = vrot.lane.b32.xlu1 %v4773_v8, %s5170_s18  ;;  %v2628_v46 = vsel %vm5610_vm1, %v5743_v17, 0.0  ;;  %v1331_v8 = vsel %vm5680_vm7, %v5676_v35, 0.0 }
 0x153   : > { %v4863_v60 = vpack.i.bf16 %v2628_v46, %v5774_v50  ;;  %v4868_v41 = vpack.i.bf16 %v1331_v8, %v5754_v53  ;;  %v4615_v53 = vpop.permute.xlu0 %4614 }
 0x154   : > { %v4616_v37 = vunpack.i.l.bf16 %v4615_v53 }
 0x156   : > { %4824 = vrot.lane.b32.xlu0 %v4823_v3, %s5170_s18  ;;  %4799 = vrot.lane.b32.xlu1 %v5908_v58, %s5169_s20  ;;  %v1191_v3 = vld [vmem:[#allocation2 + $0xf] sm:$0xff] }
 0x15a   : > { %4839 = vrot.lane.b32.xlu0 %v4838_v29, %s5170_s18  ;;  %4804 = vrot.lane.b32.xlu1 %v4803_v40, %s5170_s18  ;;  %v2634_v40 = vsel %vm5652_vm8, %v5848_v6, 0.0 }
 0x15b   : > { %v4918_v16 = vpack.i.bf16 %v2634_v40, %v5875_v5 }
 0x15e   : > { %4844 = vrot.lane.b32.xlu0 %v5921_v14, %s5169_s20  ;;  %4829 = vrot.lane.b32.xlu1 %v5923_v20, %s5169_s20 }
 0x162   : > { %4849 = vrot.lane.b32.xlu0 %v4848_v19, %s5170_s18  ;;  %4834 = vrot.lane.b32.xlu1 %v5674_v33, %s5169_s20  ;;  %v1333_v33 = vsel %vm5567_vm14, %v5743_v17, 0.0  ;;  %v1335_v17 = vsel %vm5652_vm8, %v5785_v62, 0.0  ;;  %vm7195_vm14 = vmmov %vm7194_vm10 }
 0x163   : > { %v4873_v52 = vpack.i.bf16 %v1333_v33, %v5774_v50  ;;  %v4898_v50 = vpack.i.bf16 %v1335_v17, %v5815_v9  ;;  %vm7197_vm8 = vmmov %vm7194_vm10  ;;  %v1701_v17 = vsel %vm5972_vm6, %v5362_v7, 0.0 }
 0x164   : > { %vm7200_vm1 = vmmov %vm7197_vm8 }
 0x165   : > { %vm7201_vm4 = vmmov %vm7200_vm1 }
 0x166   : > { %4854 = vrot.lane.b32.xlu0 %v5630_v12, %s5169_s20  ;;  %4859 = vrot.lane.b32.xlu1 %v4858_v28, %s5170_s18  ;;  %v2630_v12 = vsel %vm5680_vm7, %v5785_v62, 0.0  ;;  %vm7202_vm7 = vmmov %vm7200_vm1 }
 0x167   : > { %v4888_v35 = vpack.i.bf16 %v2630_v12, %v5815_v9  ;;  %v1193_v12 = vld [vmem:[#allocation2 + $0x1f] sm:$0xff] }
 0x16a   : > { %4864 = vrot.lane.b32.xlu0 %v4863_v60, %s5170_s18  ;;  %4869 = vrot.lane.b32.xlu1 %v4868_v41, %s5170_s18 }
 0x16e   : > { %4874 = vrot.lane.b32.xlu0 %v4873_v52, %s5170_s18  ;;  %4879 = vrot.lane.b32.xlu1 %v5584_v21, %s5169_s20  ;;  %v4617_v21 = vunpack.i.h.bf16 %v4615_v53 }
 0x170   : > { %v1607_v62 = vsel %vm7195_vm14, %v1191_v3, %v4617_v21  ;;  %v1703_v3 = vsel %vm5351_vm2, %v5384_v25, 0.0  ;;  %vm7208_vm14 = vmmov %vm7200_vm1 }
 0x172   : > { %4884 = vrot.lane.b32.xlu0 %v5672_v11, %s5169_s20  ;;  %4889 = vrot.lane.b32.xlu1 %v4888_v35, %s5170_s18  ;;  %v1606_v11 = vsel %vm7194_vm10, %v1222_v34, %v4616_v37  ;;  %v6043_v37 = vld [vmem:[#allocation2 + $0x2f] sm:$0xff]  ;;  %vm7203_vm10 = vmmov %vm7200_vm1 }
 0x176   : > { %4894 = vrot.lane.b32.xlu0 %v5644_v47, %s5170_s18  ;;  %4899 = vrot.lane.b32.xlu1 %v4898_v50, %s5170_s18 }
 0x178   : > { %v4620_v9 = vpop.permute.xlu1 %4619 }
 0x179   : > { %v4622_v36 = vunpack.i.h.bf16 %v4620_v9  ;;  %v4621_v29 = vunpack.i.l.bf16 %v4620_v9 }
 0x17a   : > { %4904 = vrot.lane.b32.xlu0 %v5647_v27, %s5170_s18  ;;  %4909 = vrot.lane.b32.xlu1 %v5861_v54, %s5169_s20  ;;  %v1339_v27 = vsel %vm5664_vm13, %v5848_v6, 0.0  ;;  %v7196_v54 = vsel %vm5370_vm3, %v5384_v25, 0.0  ;;  %vm7199_vm13 = vmmov %vm7197_vm8 }
 0x17b   : > { %v5991_v47 = vsel %vm7088_vm15, %v1607_v62, %v4622_v36  ;;  %v5994_v22 = vsel %vm7088_vm15, %v1606_v11, %v4621_v29  ;;  %v4928_v46 = vpack.i.bf16 %v1339_v27, %v5875_v5  ;;  %v2640_v11 = vsel %vm5668_vm11, %v5789_v51, 0.0 }
 0x17c   : > { %v4640_v10 = vpop.permute.xlu0 %4639  ;;  %v4625_v61 = vpop.permute.xlu1 %4624 }
 0x17d   : > { %v4626_v55 = vunpack.i.l.bf16 %v4625_v61  ;;  %v4642_v60 = vunpack.i.h.bf16 %v4640_v10  ;;  %v4627_v41 = vunpack.i.h.bf16 %v4625_v61  ;;  %v4641_v5 = vunpack.i.l.bf16 %v4640_v10 }
 0x17e   : > { %4914 = vrot.lane.b32.xlu0 %v5828_v45, %s5169_s20  ;;  %4919 = vrot.lane.b32.xlu1 %v4918_v16, %s5170_s18  ;;  %v4953_v61 = vpack.i.bf16 %v2640_v11, %v5787_v38 }
 0x17f   : > { %v6010_v19 = vsel %vm7197_vm8, %v7196_v54, %v4626_v55  ;;  %v1611_v62 = vsel %vm7202_vm7, %v6043_v37, %v4627_v41  ;;  %v1907_v36 = vsel %vm7203_vm10, %v1703_v3, %v4626_v55  ;;  %v7204_v54 = vld [vmem:[#allocation16_spill] sm:$0xff]  ;;  %vm7220_vm7 = vmmov %vm7200_vm1 }
 0x180   : > { %v4645_v0 = vpop.permute.xlu0 %4644  ;;  %v6012_v28 = vpop.permute.xlu1 %4629  ;;  %vm7221_vm10 = vmmov %vm7200_vm1 }
 0x181   : > { %v4647_v33 = vunpack.i.h.bf16 %v4645_v0  ;;  %v4646_v52 = vunpack.i.l.bf16 %v4645_v0 }
 0x182   : > { %4924 = vrot.lane.b32.xlu0 %v5736_v49, %s5170_s18  ;;  %4929 = vrot.lane.b32.xlu1 %v4928_v46, %s5170_s18  ;;  %v7198_v49 = vsel %vm5351_vm2, %v5362_v7, 0.0  ;;  %v5050_v46 = vld [vmem:[%s7010_s3 + $0x78] sm:$0xff]  }
 0x184   : > { %v6018_v13 = vpop.permute.xlu0 %4674  ;;  %v4635_v45 = vpop.permute.xlu1 %4634 }
 0x185   : > { %v4637_v6 = vunpack.i.h.bf16 %v4635_v45  ;;  %v4636_v8 = vunpack.i.l.bf16 %v4635_v45 }
 0x186   : > { %4934 = vrot.lane.b32.xlu0 %v5739_v2, %s5170_s18  ;;  %4939 = vrot.lane.b32.xlu1 %v5890_v18, %s5169_s20 }
 0x187   : > { %v1608_v35 = vsel %vm7199_vm13, %v7198_v49, %v4636_v8  ;;  %v1609_v56 = vsel %vm7200_vm1, %v1193_v12, %v4637_v6  ;;  %v1905_v18 = vsel %vm7201_vm4, %v1701_v17, %v4636_v8  ;;  %v7205_v6 = vld [vmem:[#allocation27_spill] sm:$0xff]  ;;  %v6100_v12 = vld [vmem:[#allocation2 + $0x47] sm:$0xff]  ;;  %v5051_v49 = vld [vmem:[%s7010_s3 + $0x70] sm:$0xff]   ;;  %v2644_v17 = vsel %vm5747_vm0, %v5852_v59, 0.0 }
 0x188   : > { %v6034_v53 = vsel %vm7088_vm15, %v1608_v35, %v4646_v52  ;;  %v6037_v2 = vsel %vm7088_vm15, %v1609_v56, %v4647_v33  ;;  %v6040_v26 = vpop.permute.xlu0 %4679  ;;  %v4650_v50 = vpop.permute.xlu1 %4649  ;;  %v1938_v21 = vsel %vm7088_vm15, %v1609_v56, %v4642_v60  ;;  %v1937_v25 = vsel %vm7088_vm15, %v1905_v18, %v4641_v5  ;;  %v2583_v8 = vld [vmem:[#allocation2 + $0x118] sm:$0xff]  ;;  %v2584_v60 = vld [vmem:[#allocation2 + $0x120] sm:$0xff]  ;;  %vm7217_vm13 = vmmov %vm7200_vm1 }
 0x189   : > { %v4652_v34 = vunpack.i.h.bf16 %v4650_v50  ;;  %v4651_v9 = vunpack.i.l.bf16 %v4650_v50  ;;  %v1969_v40 = vpack.c.bf16 %v1938_v21, %v1937_v25  ;;  %v4993_v35 = vpack.i.bf16 %v2584_v60, %v2583_v8  ;;  %v7209_v21 = vld [vmem:[#allocation6_spill] sm:$0xff]  ;;  %v6129_v59 = vld [vmem:[#allocation2 + $0x3f] sm:$0xff]  ;;  %vm7219_vm4 = vmmov %vm7200_vm1 }
 0x18a   : > { %4944 = vrot.lane.b32.xlu0 %v5888_v43, %s5169_s20  ;;  %4949 = vrot.lane.b32.xlu1 %v5763_v48, %s5170_s18  ;;  %v718_v43 = vadd.s32 64, %v5323_v32  ;;  %v5049_v48 = vld [vmem:[%s7010_s3 + $0x80] sm:$0xff]   ;;  %v5082_v52 = vld [vmem:[#allocation2 + $0x77] sm:$0xff] }
 0x18b   : > { %v1940_v29 = vsel %vm7088_vm15, %v1611_v62, %v4652_v34  ;;  %v1939_v24 = vsel %vm7088_vm15, %v1907_v36, %v4651_v9  ;;  %4402 = vmatprep.mubr.msk.bf16.mxu0 %vm7084_vm12, %v1969_v40  ;;  %v4682_v9 = vunpack.i.h.bf16 %v6040_v26  ;;  %v7210_v36 = vld [vmem:[#allocation7_spill] sm:$0xff]  ;;  %v7212_v40 = vld [vmem:[#allocation30_spill] sm:$0xff] }
 0x18c   : > { %v6063_v51 = vpop.permute.xlu0 %4684  ;;  %v6065_v10 = vpop.permute.xlu1 %4654  ;;  %v1970_v16 = vpack.c.bf16 %v1940_v29, %v1939_v24  ;;  %v802_v38 = vand.u32 15, %v718_v43  ;;  %vm7211_vm0 = vnez %v7210_v36  ;;  %v4998_v24 = vpack.i.bf16 %v2644_v17, %v5850_v57  ;;  %v7274_v36 = vld [vmem:[#allocation25_spill] sm:$0xff] }
 0x18d   : > { %v1707_v29 = vsel %vm7211_vm0, %v6100_v12, 0.0  ;;  %v7218_v57 = vsel %vm7211_vm0, %v7209_v21, 0.0  ;;  %v4656_v42 = vunpack.i.l.bf16 %v6065_v10 }
 0x18e   : > { %4954 = vrot.lane.b32.xlu0 %v4953_v61, %s5170_s18  ;;  %4959 = vrot.lane.b32.xlu1 %v5781_v39, %s5170_s18  ;;  %vm6096_vm11 = vcmp.ge.s32.totalorder %v802_v38, 1  ;;  %v4681_v61 = vunpack.i.l.bf16 %v6040_v26 }
 0x18f   : > { %4403 = vmatmul.mubr.msk.bf16.vlgmr.msra.gmra.mxu0 %vm7084_vm12, %v1970_v16  ;;  %v1230_v56 = vsel %vm6096_vm11, %v6100_v12, 0.0  ;;  %v7213_v16 = vld [vmem:[#allocation14_spill] sm:$0xff] }
 0x190   : > { %v6077_v55 = vpop.permute.xlu0 %4689  ;;  %v4660_v27 = vpop.permute.xlu1 %4659  ;;  %4479 = vmatpush3.bf16.msra.mxu0 %v7204_v54  ;;  %vm7214_vm8 = vnez %v7213_v16  ;;  %v5086_v16 = vld [vmem:[#allocation2 + $0xb7] sm:$0xff] }
 0x191   : > { %v4662_v0 = vunpack.i.h.bf16 %v4660_v27  ;;  %4480 = vmatprep.subr.bf16.mxu0 %v5049_v48  ;;  %v4661_v45 = vunpack.i.l.bf16 %v4660_v27  ;;  %v4692_v25 = vunpack.i.h.bf16 %v6077_v55  ;;  %v4691_v43 = vunpack.i.l.bf16 %v6077_v55 }
 0x192   : > { %4964 = vrot.lane.b32.xlu0 %v7205_v6, %s5170_s18  ;;  %4969 = vrot.lane.b32.xlu1 %v5908_v58, %s5169_s20 }
 0x193   : > { %v6088_v39 = vsel %vm7088_vm15, %v1611_v62, %v4662_v0  ;;  %v6092_v41 = vsel %vm7088_vm15, %v6010_v19, %v4661_v45  ;;  %v2616_v0 = vld [vmem:[#allocation2 + $0x121] sm:$0xff] }
 0x194   : > { %v6094_v33 = vpop.permute.xlu0 %4709  ;;  %v4665_v5 = vpop.permute.xlu1 %4664  ;;  %4481 = vmatpush3.bf16.msra.mxu0 %v5049_v48  ;;  %v7215_v48 = vld [vmem:[#allocation15_spill] sm:$0xff] }
 0x195   : > { %4482 = vmatprep.subr.bf16.mxu0 %v5050_v46  ;;  %v4666_v19 = vunpack.i.l.bf16 %v4665_v5  ;;  %v7216_v27 = vsel %vm7214_vm8, %v7215_v48, 0.0 }
 0x196   : > { %4974 = vrot.lane.b32.xlu0 %v5921_v14, %s5169_s20  ;;  %4979 = vrot.lane.b32.xlu1 %v5831_v31, %s5170_s18  ;;  %v1705_v14 = vsel %vm5370_vm3, %v7209_v21, 0.0  ;;  %v4667_v31 = vunpack.i.h.bf16 %v4665_v5  ;;  %v5053_v21 = vld [vmem:[%s7010_s3 + $0x60] sm:$0xff]  }
 0x197   : > { %v6118_v18 = vsel %vm7208_vm14, %v1230_v56, %v4666_v19  ;;  %vm7222_vm14 = vmmov %vm7200_vm1 }
 0x198   : > { %v6120_v50 = vpop.permute.xlu0 %4719  ;;  %v4670_v3 = vpop.permute.xlu1 %4669  ;;  %4483 = vmatpush3.bf16.msra.mxu0 %v5050_v46  ;;  %v6153_v46 = vld [vmem:[#allocation2 + $0x4f] sm:$0xff] }
 0x199   : > { %v7082_v34 = vunpack.i.l.bf16 %v6120_v50  ;;  %v4672_v11 = vunpack.i.h.bf16 %v4670_v3  ;;  %v4671_v62 = vunpack.i.l.bf16 %v4670_v3  ;;  %4484 = vmatprep.subr.bf16.mxu0 %v5051_v49  ;;  %v6169_v5 = vsel %vm7221_vm10, %v6153_v46, %v4667_v31  ;;  %vm7237_vm10 = vmmov %vm7200_vm1 }
 0x19a   : > { %4994 = vrot.lane.b32.xlu0 %v4993_v35, %s5169_s20  ;;  %4984 = vrot.lane.b32.xlu1 %v7212_v40, %s5170_s18  ;;  %v2648_v3 = vsel %vm5817_vm9, %v2616_v0, 0.0  ;;  %v4632_v0 = vunpack.i.h.bf16 %v6012_v28 }
 0x19b   : > { %v6149_v38 = vsel %vm7217_vm13, %v7216_v27, %v7082_v34  ;;  %v1613_v54 = vsel %vm7200_vm1, %v6129_v59, %v4672_v11  ;;  %v1612_v26 = vsel %vm7219_vm4, %v7218_v57, %v4671_v62  ;;  %v1909_v55 = vsel %vm7220_vm7, %v1705_v14, %v4671_v62  ;;  %v7223_v11 = vld [vmem:[#allocation12_spill] sm:$0xff]  ;;  %v7225_v62 = vld [vmem:[#allocation13_spill] sm:$0xff]  ;;  %vm7231_vm4 = vmmov %vm7200_vm1 }
 0x19c   : > { %v6161_v45 = vpop.permute.xlu0 %4724  ;;  %v4695_v6 = vpop.permute.xlu1 %4694  ;;  %v1942_v8 = vsel %vm7088_vm15, %v1613_v54, %v4682_v9  ;;  %4485 = vmatpush3.bf16.msra.mxu0 %v5051_v49  ;;  %v6165_v60 = vsel %vm7088_vm15, %v1613_v54, %v4692_v25  ;;  %v1911_v14 = vsel %vm7222_vm14, %v1707_v29, %v4666_v19  ;;  %v1941_v49 = vsel %vm7088_vm15, %v1909_v55, %v4681_v61  ;;  %v7229_v55 = vld [vmem:[#allocation18_spill] sm:$0xff]  ;;  %vm7241_vm14 = vmmov %vm7200_vm1 }
 0x19d   : > { %v7083_v35 = vunpack.i.l.bf16 %v6161_v45  ;;  %v4697_v56 = vunpack.i.h.bf16 %v4695_v6  ;;  %v4696_v17 = vunpack.i.l.bf16 %v4695_v6  ;;  %4486 = vmatprep.subr.bf16.mxu0 %v5052_v30  ;;  %v6183_v31 = vsel %vm7088_vm15, %v1612_v26, %v4691_v43  ;;  %v7227_v26 = vld [vmem:[#allocation17_spill] sm:$0xff]  ;;  %v6244_v43 = vld [vmem:[#allocation2 + $0x5f] sm:$0xff] }
 0x19e   : > { %4999 = vrot.lane.b32.xlu0 %v4998_v24, %s5170_s18  ;;  %4989 = vrot.lane.b32.xlu1 %v5923_v20, %s5169_s20  ;;  %vm7224_vm13 = vnez %v7223_v11  ;;  %v1971_v29 = vpack.c.bf16 %v1942_v8, %v1941_v49  ;;  %v5013_v57 = vpack.i.bf16 %v2648_v3, %v2615_v1  ;;  %vm7228_vm9 = vnez %v7227_v26  ;;  %v7235_v49 = vld [vmem:[#allocation11_spill] sm:$0xff] }
 0x19f   : > { %v7226_v9 = vsel %vm7224_vm13, %v7225_v62, 0.0  ;;  %v1943_v25 = vsel %vm7088_vm15, %v1911_v14, %v4696_v17  ;;  %v1944_v20 = vsel %vm7088_vm15, %v6169_v5, %v4697_v56  ;;  %v7230_v6 = vsel %vm7228_vm9, %v7229_v55, 0.0  ;;  %v5078_v56 = vld [vmem:[#allocation2 + $0x27] sm:$0xff]  ;;  %v5079_v17 = vld [vmem:[#allocation2 + $0x37] sm:$0xff] }
 0x1a0   : > { %v6192_v19 = vsel %vm7200_vm1, %v7226_v9, %v7083_v35  ;;  %v1972_v40 = vpack.c.bf16 %v1944_v20, %v1943_v25  ;;  %v6197_v24 = vpop.permute.xlu0 %4744  ;;  %v4700_v61 = vpop.permute.xlu1 %4699  ;;  %4487 = vmatpush3.bf16.msra.mxu0 %v5052_v30  ;;  %4406 = vmatprep.mubr.msk.bf16.mxu0 %vm7084_vm12, %v1971_v29  ;;  %v4631_v30 = vunpack.i.l.bf16 %v6012_v28  ;;  %v4657_v28 = vunpack.i.h.bf16 %v6065_v10  ;;  %v7233_v14 = vld [vmem:[#allocation10_spill] sm:$0xff] }
 0x1a1   : > { %v7081_v27 = vunpack.i.l.bf16 %v6197_v24  ;;  %v4701_v54 = vunpack.i.l.bf16 %v4700_v61  ;;  %4488 = vmatprep.subr.bf16.mxu0 %v5053_v21  ;;  %vm7234_vm7 = vnez %v7233_v14  ;;  %v6234_v29 = vld [vmem:[#allocation2 + $0x57] sm:$0xff]  ;;  %v4727_v34 = vunpack.i.h.bf16 %v6161_v45 }
 0x1a2   : > { %5004 = vrot.lane.b32.xlu0 %v5864_v4, %s5170_s18  ;;  %5009 = vrot.lane.b32.xlu1 %v5854_v44, %s5170_s18  ;;  %v2521_v4 = vsel %vm5972_vm6, %v5078_v56, 0.0  ;;  %v2523_v44 = vsel %vm5351_vm2, %v5079_v17, 0.0  ;;  %v7236_v3 = vsel %vm7234_vm7, %v7235_v49, 0.0  ;;  %v1709_v63 = vsel %vm6096_vm11, %v6234_v29, 0.0  ;;  %vm7238_vm2 = vmmov %vm7200_vm1  ;;  %v7239_v56 = vld [vmem:[#allocation8_spill] sm:$0xff] }
 0x1a3   : > { %v6216_v8 = vsel %vm7231_vm4, %v7230_v6, %v7081_v27  ;;  %4407 = vmatmul.mubr.msk.bf16.gmra.mxu0 %vm7084_vm12, %v1972_v40  ;;  %v6229_v9 = vsel %vm7237_vm10, %v7236_v3, %v4701_v54  ;;  %v2906_v6 = vsel %vm7238_vm2, %v6043_v37, %v4632_v0  ;;  %vm7240_vm6 = vnez %v7239_v56  ;;  %v7242_v0 = vld [vmem:[#allocation9_spill] sm:$0xff]  ;;  %vm7244_vm4 = vmmov %vm7200_vm1 }
 0x1a4   : > { %7232 = vst [vmem:[#allocation16_spill] sm:$0xff] %v6216_v8  ;;  %v6231_v25 = vpop.permute.xlu0 %4749  ;;  %v4705_v20 = vpop.permute.xlu1 %4704  ;;  %4489 = vmatpush3.bf16.msra.mxu0 %v5053_v21  ;;  %v1711_v17 = vsel %vm7240_vm6, %v7235_v49, 0.0  ;;  %v4702_v3 = vunpack.i.h.bf16 %v4700_v61  ;;  %v1713_v10 = vsel %vm7234_vm7, %v7225_v62, 0.0  ;;  %v2905_v21 = vsel %vm7241_vm14, %v2521_v4, %v4631_v30  ;;  %vm7245_vm10 = vmmov %vm7200_vm1 }
 0x1a5   : > { %v4707_v1 = vunpack.i.h.bf16 %v4705_v20  ;;  %v4706_v40 = vunpack.i.l.bf16 %v4705_v20  ;;  %v4712_v20 = vunpack.i.h.bf16 %v6094_v33  ;;  %v7243_v61 = vsel %vm7240_vm6, %v7242_v0, 0.0  ;;  %vm7246_vm2 = vmmov %vm7200_vm1 }
 0x1a6   : > { %5014 = vrot.lane.b32.xlu0 %v5013_v57, %s5170_s18  ;;  %v4676_v57 = vunpack.i.l.bf16 %v6018_v13  ;;  %v2938_v58 = vsel %vm7088_vm15, %v2906_v6, %v4657_v28  ;;  %v4711_v62 = vunpack.i.l.bf16 %v6094_v33  ;;  %v6277_v28 = vsel %vm7246_vm2, %v6270_v23, %v4702_v3  ;;  %vm7247_vm14 = vmmov %vm7200_vm1 }
 0x1a7   : > { %v6254_v37 = vsel %vm7200_vm1, %v6244_v43, %v4707_v1  ;;  %v6261_v49 = vsel %vm7244_vm4, %v7243_v61, %v4706_v40  ;;  %v1913_v30 = vsel %vm7245_vm10, %v1709_v63, %v4706_v40  ;;  %v2937_v1 = vsel %vm7088_vm15, %v2905_v21, %v4656_v42  ;;  %vm7248_vm4 = vmmov %vm7200_vm1 }
 0x1a8   : > { %v6267_v4 = vpop.permute.xlu0 %4764  ;;  %v4715_v7 = vpop.permute.xlu1 %4714  ;;  %v1946_v61 = vsel %vm7088_vm15, %v6254_v37, %v4712_v20  ;;  %v1915_v33 = vsel %vm7247_vm14, %v1711_v17, %v4701_v54  ;;  %v1945_v63 = vsel %vm7088_vm15, %v1913_v30, %v4711_v62  ;;  %v4677_v40 = vunpack.i.h.bf16 %v6018_v13  ;;  %vm7250_vm10 = vmmov %vm7200_vm1 }
 0x1a9   : > { %v4717_v27 = vunpack.i.h.bf16 %v4715_v7  ;;  %v4716_v0 = vunpack.i.l.bf16 %v4715_v7  ;;  %v1715_v42 = vsel %vm7224_vm13, %v7215_v48, 0.0  ;;  %v2907_v21 = vsel %vm7200_vm1, %v2523_v44, %v4676_v57  ;;  %v6293_v48 = vld [vmem:[#allocation2 + $0x7f] sm:$0xff]  ;;  %vm7251_vm2 = vmmov %vm7200_vm1 }
 0x1aa   : > { %v4686_v3 = vunpack.i.l.bf16 %v6063_v51  ;;  %v1973_v35 = vpack.c.bf16 %v1946_v61, %v1945_v63  ;;  %v4687_v13 = vunpack.i.h.bf16 %v6063_v51  ;;  %v2969_v62 = vpack.c.bf16 %v2938_v58, %v2937_v1  ;;  %vm7252_vm14 = vmmov %vm7200_vm1 }
 0x1ab   : > { %v1947_v7 = vsel %vm7088_vm15, %v1915_v33, %v4716_v0  ;;  %v1948_v6 = vsel %vm7088_vm15, %v6277_v28, %v4717_v27  ;;  %v4722_v0 = vunpack.i.h.bf16 %v6120_v50  ;;  %v4747_v27 = vunpack.i.h.bf16 %v6197_v24 }
 0x1ac   : > { %v1974_v20 = vpack.c.bf16 %v1948_v6, %v1947_v7  ;;  %v6290_v54 = vpop.permute.xlu0 %4779  ;;  %v4730_v17 = vpop.permute.xlu1 %4729  ;;  %4410 = vmatprep.mubr.msk.bf16.mxu0 %vm7084_vm12, %v1973_v35  ;;  %v6300_v44 = vsel %vm7248_vm4, %v6293_v48, %v4727_v34  ;;  %v7249_v57 = vunpack.i.l.bf16 %v6161_v45  ;;  %v4752_v51 = vunpack.i.h.bf16 %v6231_v25  ;;  %v6321_v6 = vld [vmem:[#allocation2 + $0x9f] sm:$0xff]  ;;  %vm7254_vm4 = vmmov %vm7200_vm1 }
 0x1ad   : > { %v4732_v30 = vunpack.i.h.bf16 %v4730_v17  ;;  %v4731_v8 = vunpack.i.l.bf16 %v4730_v17  ;;  %v4751_v58 = vunpack.i.l.bf16 %v6231_v25  ;;  %v2908_v35 = vsel %vm7251_vm2, %v6129_v59, %v4677_v40 }
 0x1ae   : > { %v1917_v61 = vsel %vm7250_vm10, %v1713_v10, %v7249_v57  ;;  %4411 = vmatmul.mubr.msk.bf16.gmra.mxu0 %vm7084_vm12, %v1974_v20  ;;  %v2939_v34 = vsel %vm7088_vm15, %v2907_v21, %v4686_v3  ;;  %v1717_v45 = vsel %vm7214_vm8, %v7229_v55, 0.0  ;;  %v2940_v7 = vsel %vm7088_vm15, %v2908_v35, %v4687_v13  ;;  %vm7257_vm10 = vmmov %vm7200_vm1  ;;  %v7258_v57 = vld [vmem:[#allocation20_spill] sm:$0xff] }
 0x1af   : > { %v1949_v1 = vsel %vm7088_vm15, %v1917_v61, %v4731_v8  ;;  %v1950_v33 = vsel %vm7088_vm15, %v6300_v44, %v4732_v30  ;;  %4490 = vmatprep.mubr.msk.bf16.mxu0 %vm7084_vm12, %v2969_v62  ;;  %v6319_v8 = vld [vmem:[#allocation2 + $0x8f] sm:$0xff]  ;;  %v7253_v55 = vunpack.i.l.bf16 %v6120_v50  ;;  %v6332_v3 = vsel %vm7254_vm4, %v6321_v6, %v4747_v27 }
 0x1b0   : > { %v4785_v10 = vpop.permute.xlu0 %4784  ;;  %v4735_v25 = vpop.permute.xlu1 %4734  ;;  %v1975_v63 = vpack.c.bf16 %v1950_v33, %v1949_v1  ;;  %v6325_v40 = vsel %vm7252_vm14, %v6319_v8, %v4722_v0  ;;  %7255 = vst [vmem:[#allocation27_spill] sm:$0xff] %v6332_v3  ;;  %v7256_v13 = vunpack.i.l.bf16 %v6197_v24  ;;  %v1954_v0 = vsel %vm7088_vm15, %v6332_v3, %v4752_v51  ;;  %v7260_v50 = vld [vmem:[#allocation22_spill] sm:$0xff]  ;;  %vm7262_vm14 = vmmov %vm7200_vm1  ;;  %v5055_v51 = vld [vmem:[%s7010_s3 + $0x20] sm:$0xff]  }
 0x1b1   : > { %v4786_v20 = vunpack.i.l.bf16 %v4785_v10  ;;  %v4737_v17 = vunpack.i.h.bf16 %v4735_v25  ;;  %v4736_v59 = vunpack.i.l.bf16 %v4735_v25  ;;  %v1919_v21 = vsel %vm7200_vm1, %v1715_v42, %v7253_v55 }
 0x1b2   : > { %v1921_v62 = vsel %vm7257_vm10, %v1717_v45, %v7256_v13  ;;  %4414 = vmatprep.mubr.msk.bf16.mxu1 %vm7084_vm12, %v1975_v63  ;;  %vm7259_vm2 = vnez %v7258_v57  ;;  %v738_v35 = vadd.s32 224, %v5323_v32  ;;  %v4787_v63 = vunpack.i.h.bf16 %v4785_v10  ;;  %vm7269_vm10 = vmmov %vm7254_vm4 }
 0x1b3   : > { %v1953_v30 = vsel %vm7088_vm15, %v1921_v62, %v4751_v58  ;;  %v7261_v61 = vsel %vm7259_vm2, %v7260_v50, 0.0  ;;  %v1952_v27 = vsel %vm7088_vm15, %v6325_v40, %v4737_v17  ;;  %v1951_v24 = vsel %vm7088_vm15, %v1919_v21, %v4736_v59  ;;  %v7264_v17 = vld [vmem:[#allocation19_spill] sm:$0xff]  ;;  %v7266_v59 = vld [vmem:[#allocation21_spill] sm:$0xff] }
 0x1b4   : > { %v6346_v42 = vsel %vm7262_vm14, %v7261_v61, %v4786_v20  ;;  %v4790_v1 = vpop.permute.xlu0 %4789  ;;  %v4740_v33 = vpop.permute.xlu1 %4739  ;;  %v2970_v58 = vpack.c.bf16 %v2940_v7, %v2939_v34  ;;  %v1976_v45 = vpack.c.bf16 %v1952_v27, %v1951_v24  ;;  %v1977_v25 = vpack.c.bf16 %v1954_v0, %v1953_v30  ;;  %v7268_v21 = vld [vmem:[#allocation31_spill] sm:$0xff]  ;;  %v6373_v24 = vld [vmem:[#allocation2 + $0xaf] sm:$0xff]  ;;  %vm7271_vm14 = vmmov %vm7254_vm4 }
 0x1b5   : > { %7263 = vst [vmem:[#allocation6_spill] sm:$0xff] %v6346_v42  ;;  %v4742_v55 = vunpack.i.h.bf16 %v4740_v33  ;;  %v4741_v13 = vunpack.i.l.bf16 %v4740_v33  ;;  %v4792_v62 = vunpack.i.h.bf16 %v4790_v1  ;;  %v4791_v61 = vunpack.i.l.bf16 %v4790_v1  ;;  %v6368_v0 = vld [vmem:[#allocation2 + $0xbf] sm:$0xff] }
 0x1b6   : > { %4415 = vmatmul.mubr.msk.bf16.vlgmr.msra.gmra.mxu1 %vm7084_vm12, %v1976_v45  ;;  %4491 = vmatmul.mubr.msk.bf16.vlgmr.msra.gmra.mxu0 %vm7084_vm12, %v2970_v58  ;;  %vm7265_vm1 = vnez %v7264_v17  ;;  %v942_v30 = vand.u32 15, %v738_v35  ;;  %v1719_v1 = vsel %vm7228_vm9, %v7266_v59, 0.0  ;;  %v5056_v45 = vld [vmem:[%s7010_s3 + $0x18] sm:$0xff]   ;;  %v6383_v35 = vsel %vm7269_vm10, %v6368_v0, %v4787_v63 }
 0x1b7   : > { %v7267_v32 = vsel %vm7265_vm1, %v7266_v59, 0.0  ;;  %4418 = vmatprep.mubr.msk.bf16.mxu1 %vm7084_vm12, %v1977_v25  ;;  %4435 = vmatpush3.bf16.msra.mxu1 %v7268_v21  ;;  %v1721_v27 = vsel %vm7265_vm1, %v7260_v50, 0.0  ;;  %7270 = vst [vmem:[#allocation7_spill] sm:$0xff] %v6383_v35  ;;  %v6388_v50 = vsel %vm7254_vm4, %v6373_v24, %v4742_v55  ;;  %vm7272_vm12 = vmmov %vm7254_vm4  ;;  %v4767_v63 = vunpack.i.h.bf16 %v6267_v4 }
 0x1b8   : > { %v6362_v34 = vsel %vm7254_vm4, %v7267_v32, %v4741_v13  ;;  %v6365_v7 = vpop.permute.xlu0 %4794  ;;  %v4755_v10 = vpop.permute.xlu1 %4754  ;;  %4436 = vmatprep.subr.bf16.mxu1 %v5055_v51  ;;  %v1925_v25 = vsel %vm7271_vm14, %v1721_v27, %v4786_v20  ;;  %v1923_v32 = vsel %vm7272_vm12, %v1719_v1, %v4741_v13  ;;  %v4766_v55 = vunpack.i.l.bf16 %v6267_v4 }
 0x1b9   : > { %v4757_v33 = vunpack.i.h.bf16 %v4755_v10  ;;  %v4756_v58 = vunpack.i.l.bf16 %v4755_v10  ;;  %v1957_v59 = vsel %vm7088_vm15, %v1925_v25, %v4791_v61  ;;  %v1958_v10 = vsel %vm7088_vm15, %v6383_v35, %v4792_v62  ;;  %v5057_v62 = vld [vmem:[%s7010_s3 + $0x10] sm:$0xff]  }
 0x1ba   : > { %v2527_v61 = vsel %vm7211_vm0, %v6234_v29, 0.0  ;;  %v4781_v1 = vunpack.i.l.bf16 %v6290_v54  ;;  %v4782_v4 = vunpack.i.h.bf16 %v6290_v54  ;;  %vm7273_vm12 = vcmask 785408   ;;  %v7281_v54 = vld [vmem:[#allocation23_spill] sm:$0xff] }
 0x1bb   : > { %v1955_v21 = vsel %vm7088_vm15, %v1923_v32, %v4756_v58  ;;  %v1956_v42 = vsel %vm7088_vm15, %v6388_v50, %v4757_v33  ;;  %4437 = vmatpush3.bf16.msra.mxu1 %v5055_v51  ;;  %v1979_v33 = vpack.c.bf16 %v1958_v10, %v1957_v59  ;;  %v1723_v29 = vsel %vm7259_vm2, %v7274_v36, 0.0  ;;  %vm7279_vm10 = vmmov %vm7273_vm12 }
 0x1bc   : > { %v1978_v3 = vpack.c.bf16 %v1956_v42, %v1955_v21  ;;  %v4810_v20 = vpop.permute.xlu0 %4809  ;;  %v4760_v27 = vpop.permute.xlu1 %4759  ;;  %4438 = vmatprep.subr.bf16.mxu1 %v5056_v45  ;;  %v2525_v42 = vsel %vm5370_vm3, %v6100_v12, 0.0  ;;  %vm6422_vm0 = vcmp.ge.s32.totalorder %v942_v30, 1  ;;  %v7275_v25 = vmov 0  ;;  %vm7278_vm3 = vmmov %vm7254_vm4  ;;  %v6440_v12 = vld [vmem:[#allocation2 + $0xcf] sm:$0xff] }
 0x1bd   : > { %v4812_v17 = vunpack.i.h.bf16 %v4810_v20  ;;  %v4811_v13 = vunpack.i.l.bf16 %v4810_v20  ;;  %v7276_v25 = vsel %vm6422_vm0, 4294967295, %v7275_v25  ;;  %v2912_v15 = vsel %vm7278_vm3, %v6244_v43, %v4767_v63  ;;  %vm7283_vm4 = vmmov %vm7278_vm3  ;;  %v5058_v43 = vld [vmem:[%s7010_s3 + $0x8] sm:$0xff]  }
 0x1be   : > { %4419 = vmatmul.mubr.msk.bf16.gmra.mxu1 %vm7273_vm12, %v1978_v3  ;;  %7277 = vst [vmem:[#allocation30_spill] sm:$0xff] %v7276_v25  ;;  %vm7282_vm14 = vnez %v7281_v54  ;;  %v2911_v30 = vsel %vm7283_vm4, %v2527_v61, %v4766_v55  ;;  %v4797_v20 = vunpack.i.h.bf16 %v6365_v7  ;;  %v4796_v55 = vunpack.i.l.bf16 %v6365_v7  ;;  %v7284_v61 = vld [vmem:[#allocation24_spill] sm:$0xff]  ;;  %vm7290_vm4 = vmmov %vm7278_vm3 }
 0x1bf   : > { %v6412_v51 = vsel %vm7088_vm15, %v6261_v49, %v4811_v13  ;;  %v6416_v58 = vsel %vm7088_vm15, %v6254_v37, %v4812_v17  ;;  %v4762_v49 = vunpack.i.h.bf16 %v4760_v27  ;;  %4422 = vmatprep.mubr.msk.bf16.mxu1 %vm7279_vm10, %v1979_v33  ;;  %v7280_v37 = vld [vmem:[#allocation26_spill] sm:$0xff]  ;;  %4439 = vmatpush3.bf16.msra.mxu1 %v5056_v45  ;;  %v2943_v63 = vsel %vm7088_vm15, %v2911_v30, %v4781_v1  ;;  %vm7288_vm10 = vmmov %vm7278_vm3 }
 0x1c0   : > { %v1725_v3 = vsel %vm7282_vm14, %v7280_v37, 0.0  ;;  %v4815_v17 = vpop.permute.xlu0 %4814  ;;  %v4770_v32 = vpop.permute.xlu1 %4769  ;;  %4440 = vmatprep.subr.bf16.mxu1 %v5057_v62  ;;  %v4761_v13 = vunpack.i.l.bf16 %v4760_v27  ;;  %v2944_v45 = vsel %vm7088_vm15, %v2912_v15, %v4782_v4  ;;  %vm7285_vm12 = vnez %v7284_v61  ;;  %vm7292_vm15 = vmmov %vm7278_vm3 }
 0x1c1   : > { %v4816_v59 = vunpack.i.l.bf16 %v4815_v17  ;;  %v4772_v10 = vunpack.i.h.bf16 %v4770_v32  ;;  %v4771_v21 = vunpack.i.l.bf16 %v4770_v32  ;;  %v4817_v33 = vunpack.i.h.bf16 %v4815_v17  ;;  %vm7294_vm2 = vmmov %vm7278_vm3 }
 0x1c2   : > { %v7286_v32 = vsel %vm7285_vm12, %v7280_v37, 0.0  ;;  %v2910_v27 = vsel %vm7290_vm4, %v6153_v46, %v4762_v49  ;;  %v7291_v4 = vsel %vm7282_vm14, %v7274_v36, 0.0  ;;  %v5059_v36 = vld [vmem:[%s7010_s3] sm:$0xff]  }
 0x1c3   : > { %v6449_v35 = vsel %vm7278_vm3, %v7286_v32, %v4816_v59  ;;  %v6453_v1 = vsel %vm7288_vm10, %v6440_v12, %v4772_v10  ;;  %v6462_v7 = vsel %vm7292_vm15, %v7291_v4, %v4771_v21  ;;  %v1927_v15 = vsel %vm7294_vm2, %v1723_v29, %v4771_v21  ;;  %4441 = vmatpush3.bf16.msra.mxu1 %v5057_v62  ;;  %v6467_v10 = vld [vmem:[#allocation2 + $0xdf] sm:$0xff]  ;;  %vm7297_vm15 = vmmov %vm7294_vm2 }
 0x1c4   : > { %7287 = vst [vmem:[#allocation14_spill] sm:$0xff] %v6449_v35  ;;  %7289 = vst [vmem:[#allocation15_spill] sm:$0xff] %v6453_v1  ;;  %v4820_v37 = vpop.permute.xlu0 %4819  ;;  %v4775_v17 = vpop.permute.xlu1 %4774  ;;  %vm7295_vm3 = vcmask 523264   ;;  %4442 = vmatprep.subr.bf16.mxu1 %v5058_v43  ;;  %v2909_v4 = vsel %vm7297_vm15, %v2525_v42, %v4761_v13  ;;  %v6475_v29 = vsel %vm7294_vm2, %v6467_v10, %v4817_v33  ;;  %v2972_v42 = vpack.c.bf16 %v2944_v45, %v2943_v63 }
 0x1c5   : > { %7293 = vst [vmem:[#allocation12_spill] sm:$0xff] %v6462_v7  ;;  %v1960_v30 = vsel %vm7295_vm3, %v6453_v1, %v4797_v20  ;;  %7296 = vst [vmem:[#allocation13_spill] sm:$0xff] %v6467_v10  ;;  %v4822_v32 = vunpack.i.h.bf16 %v4820_v37  ;;  %v4821_v35 = vunpack.i.l.bf16 %v4820_v37  ;;  %v4777_v46 = vunpack.i.h.bf16 %v4775_v17  ;;  %v6484_v1 = vld [vmem:[#allocation2 + $0xe7] sm:$0xff] }
 0x1c6   : > { %v4776_v49 = vunpack.i.l.bf16 %v4775_v17  ;;  %vm7298_vm10 = vmmov %vm7294_vm2  ;;  %vm7303_vm15 = vcmask 785408  }
 0x1c7   : > { %v1929_v21 = vsel %vm7298_vm10, %v1725_v3, %v4816_v59  ;;  %vm7299_vm4 = vmmov %vm7295_vm3  ;;  %4443 = vmatpush3.bf16.msra.mxu1 %v5058_v43 }
 0x1c8   : > { %v1959_v62 = vsel %vm7299_vm4, %v1927_v15, %v4796_v55  ;;  %v1961_v20 = vsel %vm7295_vm3, %v1929_v21, %v4821_v35  ;;  %vm7300_vm14 = vmmov %vm7295_vm3  ;;  %v4825_v10 = vpop.permute.xlu0 %4824  ;;  %v4800_v57 = vpop.permute.xlu1 %4799  ;;  %4444 = vmatprep.subr.bf16.mxu1 %v5059_v36  ;;  %v6487_v15 = vld [vmem:[#allocation2 + $0xef] sm:$0xff] }
 0x1c9   : > { %v1962_v37 = vsel %vm7300_vm14, %v6475_v29, %v4822_v32  ;;  %vm7301_vm1 = vmmov %vm7295_vm3  ;;  %v1980_v33 = vpack.c.bf16 %v1960_v30, %v1959_v62  ;;  %v4827_v3 = vunpack.i.h.bf16 %v4825_v10  ;;  %v4826_v59 = vunpack.i.l.bf16 %v4825_v10 }
 0x1ca   : > { %v2941_v17 = vsel %vm7301_vm1, %v2909_v4, %v4776_v49  ;;  %vm7302_vm9 = vmmov %vm7301_vm1  ;;  %v1981_v13 = vpack.c.bf16 %v1962_v37, %v1961_v20  ;;  %v4802_v55 = vunpack.i.h.bf16 %v4800_v57  ;;  %v4801_v35 = vunpack.i.l.bf16 %v4800_v57  ;;  %v6519_v37 = vld [vmem:[#allocation2 + $0x107] sm:$0xff] }
 0x1cb   : > { %v2942_v54 = vsel %vm7302_vm9, %v2910_v27, %v4777_v46  ;;  %4423 = vmatmul.mubr.msk.bf16.gmra.mxu1 %vm7303_vm15, %v1980_v33  ;;  %v1250_v27 = vsel %vm6422_vm0, %v6484_v1, 0.0  ;;  %vm7304_vm9 = vmmov %vm7303_vm15 }
 0x1cc   : > { %v2971_v7 = vpack.c.bf16 %v2942_v54, %v2941_v17  ;;  %v1727_v54 = vsel %vm7285_vm12, %v6484_v1, 0.0  ;;  %vm7305_vm1 = vmmov %vm7294_vm2  ;;  %v4840_v45 = vpop.permute.xlu0 %4839  ;;  %v4805_v30 = vpop.permute.xlu1 %4804  ;;  %4445 = vmatpush3.bf16.msra.mxu1 %v5059_v36 }
 0x1cd   : > { %v6498_v43 = vsel %vm7305_vm1, %v6487_v15, %v4802_v55  ;;  %vm7306_vm14 = vmmov %vm7305_vm1  ;;  %v4807_v32 = vunpack.i.h.bf16 %v4805_v30  ;;  %v4806_v46 = vunpack.i.l.bf16 %v4805_v30  ;;  %v6536_v30 = vld [vmem:[#allocation2 + $0xff] sm:$0xff] }
 0x1ce   : > { %4494 = vmatprep.mubr.msk.bf16.mxu0 %vm7304_vm9, %v2971_v7  ;;  %v6501_v57 = vsel %vm7306_vm14, %v1250_v27, %v4801_v35  ;;  %vm7307_vm2 = vmmov %vm7305_vm1 }
 0x1cf   : > { %v1931_v63 = vsel %vm7307_vm2, %v1727_v54, %v4801_v35  ;;  %vm7308_vm10 = vmmov %vm7304_vm9  ;;  %v1731_v35 = vsel %vm5804_vm5, %v6519_v37, 0.0  ;;  %v4842_v54 = vunpack.i.h.bf16 %v4840_v45 }
 0x1d0   : > { %4426 = vmatprep.mubr.msk.bf16.mxu1 %vm7308_vm10, %v1981_v13  ;;  %vm7309_vm4 = vmmov %vm7304_vm9  ;;  %v1963_v10 = vsel %vm7295_vm3, %v1931_v63, %v4826_v59  ;;  %v4845_v20 = vpop.permute.xlu0 %4844  ;;  %v4830_v17 = vpop.permute.xlu1 %4829  ;;  %v7316_v59 = vld [vmem:[#allocation29_spill] sm:$0xff]  ;;  %v4841_v63 = vunpack.i.l.bf16 %v4840_v45 }
 0x1d1   : > { %4495 = vmatmul.mubr.msk.bf16.gmra.mxu0 %vm7309_vm4, %v2972_v42  ;;  %vm7310_vm15 = vmmov %vm7295_vm3  ;;  %v4847_v42 = vunpack.i.h.bf16 %v4845_v20  ;;  %v4846_v36 = vunpack.i.l.bf16 %v4845_v20  ;;  %v4832_v13 = vunpack.i.h.bf16 %v4830_v17  ;;  %v4831_v33 = vunpack.i.l.bf16 %v4830_v17 }
 0x1d2   : > { %v1964_v7 = vsel %vm7310_vm15, %v6498_v43, %v4827_v3  ;;  %vm7311_vm9 = vmmov %vm7295_vm3  ;;  %v6522_v3 = vld [vmem:[#allocation2 + $0x10f] sm:$0xff] }
 0x1d3   : > { %v1982_v49 = vpack.c.bf16 %v1964_v7, %v1963_v10  ;;  %v6511_v4 = vsel %vm7311_vm9, %v6118_v18, %v4806_v46  ;;  %vm7312_vm1 = vmmov %vm7295_vm3  ;;  %7314 = vst [vmem:[#allocation17_spill] sm:$0xff] %v6522_v3  ;;  %v1729_v10 = vsel %vm6422_vm0, %v7316_v59, 0.0 }
 0x1d4   : > { %v6515_v21 = vsel %vm7312_vm1, %v6169_v5, %v4807_v32  ;;  %vm7313_vm14 = vmmov %vm7309_vm4  ;;  %v7317_v5 = vsel %vm5804_vm5, %v7316_v59, 0.0  ;;  %v4850_v32 = vpop.permute.xlu0 %4849  ;;  %v4835_v46 = vpop.permute.xlu1 %4834 }
 0x1d5   : > { %4427 = vmatmul.mubr.msk.bf16.gmra.mxu1 %vm7313_vm14, %v1982_v49  ;;  %v6529_v55 = vsel %vm7307_vm2, %v7317_v5, %v4846_v36  ;;  %vm7319_vm10 = vmmov %vm7307_vm2  ;;  %v4852_v17 = vunpack.i.h.bf16 %v4850_v32  ;;  %v4837_v5 = vunpack.i.h.bf16 %v4835_v46  ;;  %v4836_v45 = vunpack.i.l.bf16 %v4835_v46 }
 0x1d6   : > { %7318 = vst [vmem:[#allocation18_spill] sm:$0xff] %v6529_v55  ;;  %v1936_v27 = vsel %vm7319_vm10, %v6522_v3, %v4832_v13  ;;  %vm7320_vm4 = vmmov %vm7307_vm2  ;;  %v4851_v13 = vunpack.i.l.bf16 %v4850_v32 }
 0x1d7   : > { %v1935_v7 = vsel %vm7320_vm4, %v1731_v35, %v4831_v33  ;;  %vm7321_vm3 = vmmov %vm7307_vm2  ;;  %v1968_v18 = vsel %vm7312_vm1, %v1936_v27, %v4842_v54 }
 0x1d8   : > { %v6544_v49 = vsel %vm7321_vm3, %v6536_v30, %v4847_v42  ;;  %vm7322_vm15 = vmmov %vm7307_vm2  ;;  %v4855_v55 = vpop.permute.xlu0 %4854  ;;  %v4860_v3 = vpop.permute.xlu1 %4859  ;;  %v5081_v42 = vld [vmem:[#allocation2 + $0x67] sm:$0xff] }
 0x1d9   : > { %v1933_v20 = vsel %vm7322_vm15, %v1729_v10, %v4846_v36  ;;  %vm7323_vm9 = vmmov %vm7312_vm1  ;;  %v2529_v36 = vsel %vm6096_vm11, %v5081_v42, 0.0  ;;  %v4862_v10 = vunpack.i.h.bf16 %v4860_v3  ;;  %v4861_v32 = vunpack.i.l.bf16 %v4860_v3 }
 0x1da   : > { %v1967_v62 = vsel %vm7323_vm9, %v1935_v7, %v4841_v63  ;;  %vm7324_vm14 = vmmov %vm7312_vm1  ;;  %v4857_v54 = vunpack.i.h.bf16 %v4855_v55  ;;  %v4856_v7 = vunpack.i.l.bf16 %v4855_v55  ;;  %v2531_v3 = vsel %vm7240_vm6, %v5082_v52, 0.0 }
 0x1db   : > { %v1965_v59 = vsel %vm7324_vm14, %v1933_v20, %v4851_v13  ;;  %vm7325_vm2 = vmmov %vm7312_vm1  ;;  %v1984_v25 = vpack.c.bf16 %v1968_v18, %v1967_v62  ;;  %v7346_v52 = vpack.c.bf16 %v6088_v39, %v6092_v41  ;;  %v5084_v39 = vld [vmem:[#allocation2 + $0x97] sm:$0xff] }
 0x1dc   : > { %v1966_v33 = vsel %vm7325_vm2, %v6544_v49, %v4852_v17  ;;  %vm7326_vm10 = vmmov %vm7321_vm3  ;;  %v4865_v18 = vpop.permute.xlu0 %4864  ;;  %v4870_v17 = vpop.permute.xlu1 %4869  ;;  %v2535_v41 = vsel %vm7224_vm13, %v5084_v39, 0.0 }
 0x1dd   : > { %v1983_v35 = vpack.c.bf16 %v1966_v33, %v1965_v59  ;;  %v2914_v63 = vsel %vm7326_vm10, %v6270_v23, %v4837_v5  ;;  %vm7327_vm4 = vmmov %vm7321_vm3  ;;  %vm7328_vm3 = vcmask 785408   ;;  %v7332_v23 = vpack.c.bf16 %v5991_v47, %v5994_v22 }
 0x1de   : > { %v2913_v27 = vsel %vm7327_vm4, %v2529_v36, %v4836_v45  ;;  %vm7329_vm15 = vmmov %vm7312_vm1  ;;  %v4867_v55 = vunpack.i.h.bf16 %v4865_v18  ;;  %v4866_v13 = vunpack.i.l.bf16 %v4865_v18  ;;  %v4872_v5 = vunpack.i.h.bf16 %v4870_v17 }
 0x1df   : > { %4430 = vmatprep.mubr.msk.bf16.mxu1 %vm7328_vm3, %v1983_v35  ;;  %v2945_v46 = vsel %vm7329_vm15, %v2913_v27, %v4861_v32  ;;  %vm7330_vm9 = vmmov %vm7312_vm1  ;;  %v4871_v45 = vunpack.i.l.bf16 %v4870_v17 }
 0x1e0   : > { %v2946_v20 = vsel %vm7330_vm9, %v2914_v63, %v4862_v10  ;;  %vm7331_vm1 = vmmov %vm7328_vm3  ;;  %v4875_v42 = vpop.permute.xlu0 %4874  ;;  %v4880_v36 = vpop.permute.xlu1 %4879 }
 0x1e1   : > { %4431 = vmatmul.mubr.msk.bf16.gmra.mxu1 %vm7331_vm1, %v1984_v25  ;;  %v2973_v62 = vpack.c.bf16 %v2946_v20, %v2945_v46  ;;  %vm7333_vm11 = vmmov %vm7331_vm1  ;;  %v4877_v10 = vunpack.i.h.bf16 %v4875_v42  ;;  %v4876_v32 = vunpack.i.l.bf16 %v4875_v42  ;;  %v4882_v63 = vunpack.i.h.bf16 %v4880_v36 }
 0x1e2   : > { %4446 = vmatprep.mubr.msk.bf16.mxu1 %vm7333_vm11, %v7332_v23  ;;  %vm7334_vm14 = vmmov %vm7327_vm4  ;;  %v4881_v27 = vunpack.i.l.bf16 %v4880_v36 }
 0x1e3   : > { %v2916_v59 = vsel %vm7334_vm14, %v6293_v48, %v4857_v54  ;;  %vm7335_vm2 = vmmov %vm7327_vm4  ;;  %v7344_v54 = vpack.c.bf16 %v6037_v2, %v6034_v53 }
 0x1e4   : > { %v2915_v25 = vsel %vm7335_vm2, %v2531_v3, %v4856_v7  ;;  %vm7336_vm10 = vmmov %vm7331_vm1  ;;  %v4885_v46 = vpop.permute.xlu0 %4884  ;;  %v4890_v20 = vpop.permute.xlu1 %4889 }
 0x1e5   : > { %4498 = vmatprep.mubr.msk.bf16.mxu0 %vm7336_vm10, %v2973_v62  ;;  %vm7337_vm6 = vmmov %vm7330_vm9  ;;  %v4892_v3 = vunpack.i.h.bf16 %v4890_v20  ;;  %v4891_v62 = vunpack.i.l.bf16 %v4890_v20  ;;  %vm7348_vm10 = vcmask 261120   ;;  %v4887_v18 = vunpack.i.h.bf16 %v4885_v46 }
 0x1e6   : > { %v2947_v56 = vsel %vm7337_vm6, %v2915_v25, %v4866_v13  ;;  %vm7338_vm4 = vmmov %vm7337_vm6  ;;  %v2918_v53 = vsel %vm7348_vm10, %v6319_v8, %v4882_v63  ;;  %v4886_v17 = vunpack.i.l.bf16 %v4885_v46 }
 0x1e7   : > { %v2948_v33 = vsel %vm7338_vm4, %v2916_v59, %v4867_v55  ;;  %vm7339_vm3 = vmmov %vm7338_vm4 }
 0x1e8   : > { %v6575_v47 = vsel %vm7339_vm3, %v6229_v9, %v4871_v45  ;;  %vm7340_vm15 = vmmov %vm7339_vm3  ;;  %v2974_v35 = vpack.c.bf16 %v2948_v33, %v2947_v56  ;;  %v4895_v14 = vpop.permute.xlu0 %4894 }
 0x1e9   : > { %v6579_v22 = vsel %vm7340_vm15, %v6277_v28, %v4872_v5  ;;  %vm7341_vm9 = vmmov %vm7331_vm1  ;;  %v4900_v5 = vpop.permute.xlu1 %4899  ;;  %v4897_v45 = vunpack.i.h.bf16 %v4895_v14  ;;  %v4896_v59 = vunpack.i.l.bf16 %v4895_v14 }
 0x1ea   : > { %v1677_v48 = vpack.c.bf16 %v6579_v22, %v6575_v47  ;;  %4499 = vmatmul.mubr.msk.bf16.gmra.mxu0 %vm7341_vm9, %v2974_v35  ;;  %vm7342_vm1 = vmmov %vm7339_vm3  ;;  %v4902_v25 = vunpack.i.h.bf16 %v4900_v5  ;;  %v4901_v56 = vunpack.i.l.bf16 %v4900_v5 }
 0x1eb   : > { %v6586_v9 = vsel %vm7342_vm1, %v6192_v19, %v4876_v32  ;;  %vm7343_vm11 = vmmov %vm7342_vm1  ;;  %v5083_v19 = vld [vmem:[#allocation2 + $0x87] sm:$0xff] }
 0x1ec   : > { %v6590_v28 = vsel %vm7343_vm11, %v6300_v44, %v4877_v10  ;;  %vm7345_vm14 = vmmov %vm7341_vm9  ;;  %v2533_v44 = vsel %vm7234_vm7, %v5083_v19, 0.0  ;;  %v7358_v10 = vpack.c.bf16 %v6165_v60, %v6183_v31  ;;  %v4905_v63 = vpop.permute.xlu0 %4904 }
 0x1ed   : > { %4447 = vmatmul.mubr.msk.bf16.vlgmr.msra.gmra.mxu1 %vm7345_vm14, %v7344_v54  ;;  %v1678_v7 = vpack.c.bf16 %v6590_v28, %v6586_v9  ;;  %vm7347_vm2 = vmmov %vm7341_vm9  ;;  %v7359_v54 = vpack.c.bf16 %v6515_v21, %v6511_v4 }
 0x1ee   : > { %4450 = vmatprep.mubr.msk.bf16.mxu1 %vm7347_vm2, %v7346_v52  ;;  %vm7349_vm6 = vmmov %vm7348_vm10  ;;  %v5085_v52 = vld [vmem:[#allocation2 + $0xa7] sm:$0xff] }
 0x1ef   : > { %v2917_v2 = vsel %vm7349_vm6, %v2533_v44, %v4881_v27  ;;  %vm7350_vm4 = vmmov %vm7342_vm1  ;;  %v4910_v27 = vpop.permute.xlu1 %4909  ;;  %v2537_v60 = vsel %vm7214_vm8, %v5085_v52, 0.0  ;;  %vm7368_vm8 = vnez %v7227_v26  ;;  %v7389_v52 = vld [vmem:[#allocation20_spill] sm:$0xff] }
 0x1f0   : > { %v2949_v23 = vsel %vm7350_vm4, %v2917_v2, %v4891_v62  ;;  %vm7351_vm3 = vmmov %vm7342_vm1  ;;  %v4912_v46 = vunpack.i.h.bf16 %v4910_v27  ;;  %v4911_v20 = vunpack.i.l.bf16 %v4910_v27  ;;  %v7366_v2 = vpack.c.bf16 %v6416_v58, %v6412_v51  ;;  %v5060_v51 = vld [vmem:[%s7012_s5 + $0x8] sm:$0xff]  }
 0x1f1   : > { %v2950_v55 = vsel %vm7351_vm3, %v2918_v53, %v4892_v3  ;;  %vm7352_vm7 = vmmov %vm7349_vm6  ;;  %4522 = vmatprep.subr.bf16.mxu1 %v5060_v51 }
 0x1f2   : > { %v2975_v13 = vpack.c.bf16 %v2950_v55, %v2949_v23  ;;  %v2920_v8 = vsel %vm7352_vm7, %v6321_v6, %v4887_v18  ;;  %vm7353_vm15 = vmmov %vm7349_vm6  ;;  %v2539_v18 = vsel %vm7368_vm8, %v5086_v16, 0.0  ;;  %4523 = vmatpush3.bf16.msra.mxu1 %v5060_v51 }
 0x1f3   : > { %v2919_v33 = vsel %vm7353_vm15, %v2535_v41, %v4886_v17  ;;  %vm7354_vm9 = vmmov %vm7347_vm2 }
 0x1f4   : > { %4502 = vmatprep.mubr.msk.bf16.mxu0 %vm7354_vm9, %v2975_v13  ;;  %v2951_v35 = vsel %vm7342_vm1, %v2919_v33, %v4896_v59  ;;  %vm7355_vm11 = vmmov %vm7342_vm1 }
 0x1f5   : > { %v2952_v42 = vsel %vm7355_vm11, %v2920_v8, %v4897_v45  ;;  %vm7356_vm13 = vmmov %vm7342_vm1  ;;  %4451 = vmatmul.mubr.msk.bf16.gmra.mxu1 %vm7347_vm2, %v7358_v10 }
 0x1f6   : > { %v1656_v11 = vsel %vm7356_vm13, %v6325_v40, %v4902_v25  ;;  %vm7357_vm14 = vmmov %vm7342_vm1  ;;  %v2976_v6 = vpack.c.bf16 %v2952_v42, %v2951_v35  ;;  %v4915_v40 = vpop.permute.xlu0 %4914  ;;  %v7379_v35 = vld [vmem:[#allocation19_spill] sm:$0xff] }
 0x1f7   : > { %v1655_v36 = vsel %vm7357_vm14, %v6149_v38, %v4901_v56  ;;  %vm7360_vm10 = vmmov %vm7347_vm2  ;;  %v4920_v38 = vpop.permute.xlu1 %4919  ;;  %v4917_v4 = vunpack.i.h.bf16 %v4915_v40  ;;  %v4916_v21 = vunpack.i.l.bf16 %v4915_v40  ;;  %v4906_v56 = vunpack.i.l.bf16 %v4905_v63 }
 0x1f8   : > { %v1679_v32 = vpack.c.bf16 %v1656_v11, %v1655_v36  ;;  %4454 = vmatprep.mubr.msk.bf16.mxu1 %vm7360_vm10, %v7359_v54  ;;  %vm7361_vm6 = vmmov %vm7347_vm2  ;;  %v4922_v31 = vunpack.i.h.bf16 %v4920_v38  ;;  %v4921_v19 = vunpack.i.l.bf16 %v4920_v38  ;;  %v7382_v36 = vld [vmem:[#allocation16_spill] sm:$0xff]  ;;  %v5088_v38 = vld [vmem:[#allocation2 + $0xd7] sm:$0xff] }
 0x1f9   : > { %4503 = vmatmul.mubr.msk.bf16.gmra.mxu0 %vm7361_vm6, %v2976_v6  ;;  %vm7362_vm4 = vmmov %vm7352_vm7  ;;  %v7384_v6 = vld [vmem:[#allocation27_spill] sm:$0xff] }
 0x1fa   : > { %v2922_v44 = vsel %vm7362_vm4, %v6373_v24, %v4912_v46  ;;  %vm7363_vm3 = vmmov %vm7362_vm4  ;;  %v4925_v23 = vpop.permute.xlu0 %4924 }
 0x1fb   : > { %v2921_v3 = vsel %vm7363_vm3, %v2537_v60, %v4911_v20  ;;  %vm7364_vm7 = vmmov %vm7342_vm1  ;;  %v4930_v24 = vpop.permute.xlu1 %4929  ;;  %v4927_v55 = vunpack.i.h.bf16 %v4925_v23  ;;  %v4926_v39 = vunpack.i.l.bf16 %v4925_v23 }
 0x1fc   : > { %v2953_v62 = vsel %vm7364_vm7, %v2921_v3, %v4921_v19  ;;  %vm7365_vm15 = vmmov %vm7342_vm1  ;;  %v4932_v41 = vunpack.i.h.bf16 %v4930_v24  ;;  %v4931_v13 = vunpack.i.l.bf16 %v4930_v24  ;;  %v7396_v24 = vld [vmem:[#allocation12_spill] sm:$0xff] }
 0x1fd   : > { %v2954_v53 = vsel %vm7365_vm15, %v2922_v44, %v4922_v31  ;;  %vm7367_vm9 = vmmov %vm7347_vm2  ;;  %vm7380_vm15 = vnez %v7379_v35 }
 0x1fe   : > { %4455 = vmatmul.mubr.msk.bf16.gmra.mxu1 %vm7367_vm9, %v7366_v2  ;;  %v2977_v17 = vpack.c.bf16 %v2954_v53, %v2953_v62  ;;  %vm7369_vm1 = vmmov %vm7347_vm2  ;;  %v4935_v59 = vpop.permute.xlu0 %4934  ;;  %v7391_v2 = vld [vmem:[#allocation13_spill] sm:$0xff] }
 0x1ff   : > { %4458 = vmatprep.mubr.msk.bf16.mxu1 %vm7369_vm1, %v1677_v48  ;;  %vm7370_vm11 = vmmov %vm7363_vm3  ;;  %v4940_v25 = vpop.permute.xlu1 %4939  ;;  %v4937_v62 = vunpack.i.h.bf16 %v4935_v59  ;;  %v4936_v53 = vunpack.i.l.bf16 %v4935_v59 }
 0x200   : > { %v2924_v26 = vsel %vm7370_vm11, %v6368_v0, %v4917_v4  ;;  %vm7371_vm13 = vmmov %vm7363_vm3  ;;  %v4907_v0 = vunpack.i.h.bf16 %v4905_v63  ;;  %v4942_v8 = vunpack.i.h.bf16 %v4940_v25  ;;  %v4941_v33 = vunpack.i.l.bf16 %v4940_v25 }
 0x201   : > { %v2923_v58 = vsel %vm7371_vm13, %v2539_v18, %v4916_v21  ;;  %vm7372_vm14 = vmmov %vm7369_vm1 }
 0x202   : > { %4506 = vmatprep.mubr.msk.bf16.mxu0 %vm7372_vm14, %v2977_v17  ;;  %vm7373_vm2 = vmmov %vm7364_vm7  ;;  %v4945_v42 = vpop.permute.xlu0 %4944  ;;  %v2926_v9 = vsel %vm7370_vm11, %v6440_v12, %v4942_v8 }
 0x203   : > { %v2955_v14 = vsel %vm7373_vm2, %v2923_v58, %v4926_v39  ;;  %vm7374_vm10 = vmmov %vm7373_vm2  ;;  %v4950_v11 = vpop.permute.xlu1 %4949  ;;  %v4946_v46 = vunpack.i.l.bf16 %v4945_v42  ;;  %v7398_v39 = vld [vmem:[#allocation15_spill] sm:$0xff] }
 0x204   : > { %v2956_v47 = vsel %vm7374_vm10, %v2924_v26, %v4927_v55  ;;  %vm7375_vm6 = vmmov %vm7373_vm2  ;;  %v4952_v27 = vunpack.i.h.bf16 %v4950_v11  ;;  %v4951_v54 = vunpack.i.l.bf16 %v4950_v11  ;;  %vm7390_vm10 = vnez %v7389_v52  ;;  %v5089_v52 = vld [vmem:[#allocation2 + $0xf7] sm:$0xff] }
 0x205   : > { %v1659_v22 = vsel %vm7375_vm6, %v6362_v34, %v4931_v13  ;;  %vm7376_vm4 = vmmov %vm7373_vm2  ;;  %v2978_v5 = vpack.c.bf16 %v2956_v47, %v2955_v14  ;;  %v5087_v34 = vld [vmem:[#allocation2 + $0xc7] sm:$0xff]  ;;  %v2543_v60 = vsel %vm7390_vm10, %v5088_v38, 0.0 }
 0x206   : > { %v1660_v48 = vsel %vm7376_vm4, %v6388_v50, %v4932_v41  ;;  %vm7377_vm3 = vmmov %vm7369_vm1  ;;  %v2541_v50 = vsel %vm7380_vm15, %v5087_v34, 0.0  ;;  %v4955_v19 = vpop.permute.xlu0 %4954 }
 0x207   : > { %v1681_v45 = vpack.c.bf16 %v1660_v48, %v1659_v22  ;;  %4507 = vmatmul.mubr.msk.bf16.gmra.mxu0 %vm7377_vm3, %v2978_v5  ;;  %vm7378_vm7 = vmmov %vm7369_vm1  ;;  %v4960_v44 = vpop.permute.xlu1 %4959  ;;  %v4957_v3 = vunpack.i.h.bf16 %v4955_v19  ;;  %v4956_v4 = vunpack.i.l.bf16 %v4955_v19  ;;  %v7402_v22 = vld [vmem:[#allocation6_spill] sm:$0xff]  ;;  %v7404_v5 = vld [vmem:[#allocation7_spill] sm:$0xff] }
 0x208   : > { %4459 = vmatmul.mubr.msk.bf16.gmra.mxu1 %vm7378_vm7, %v1678_v7  ;;  %vm7381_vm9 = vmmov %vm7369_vm1  ;;  %v4947_v7 = vunpack.i.h.bf16 %v4945_v42  ;;  %v4962_v21 = vunpack.i.h.bf16 %v4960_v44  ;;  %v4961_v12 = vunpack.i.l.bf16 %v4960_v44  ;;  %v7410_v42 = vld [vmem:[#allocation23_spill] sm:$0xff] }
 0x209   : > { %4462 = vmatprep.mubr.msk.bf16.mxu1 %vm7381_vm9, %v1679_v32  ;;  %vm7383_vm8 = vmmov %vm7373_vm2 }
 0x20a   : > { %v1657_v10 = vsel %vm7383_vm8, %v7382_v36, %v4906_v56  ;;  %vm7385_vm1 = vmmov %vm7373_vm2  ;;  %v4965_v26 = vpop.permute.xlu0 %4964  ;;  %v7407_v56 = vld [vmem:[#allocation14_spill] sm:$0xff] }
 0x20b   : > { %v1658_v63 = vsel %vm7385_vm1, %v7384_v6, %v4907_v0  ;;  %vm7386_vm13 = vmmov %vm7370_vm11  ;;  %v4970_v58 = vpop.permute.xlu1 %4969  ;;  %v4967_v14 = vunpack.i.h.bf16 %v4965_v26  ;;  %v4966_v47 = vunpack.i.l.bf16 %v4965_v26  ;;  %v2520_v26 = vld [vmem:[#allocation2 + $0x11f] sm:$0xff] }
 0x20c   : > { %v2925_v28 = vsel %vm7386_vm13, %v2541_v50, %v4941_v33  ;;  %vm7387_vm14 = vmmov %vm7385_vm1  ;;  %v1680_v32 = vpack.c.bf16 %v1658_v63, %v1657_v10  ;;  %v4972_v25 = vunpack.i.h.bf16 %v4970_v58  ;;  %v4971_v0 = vunpack.i.l.bf16 %v4970_v58 }
 0x20d   : > { %v2957_v20 = vsel %vm7387_vm14, %v2925_v28, %v4951_v54  ;;  %vm7388_vm2 = vmmov %vm7385_vm1 }
 0x20e   : > { %v2958_v40 = vsel %vm7388_vm2, %v2926_v9, %v4952_v27  ;;  %vm7392_vm6 = vmmov %vm7370_vm11 }
 0x20f   : > { %v2979_v31 = vpack.c.bf16 %v2958_v40, %v2957_v20  ;;  %v2928_v16 = vsel %vm7392_vm6, %v7391_v2, %v4947_v7  ;;  %vm7393_vm4 = vmmov %vm7392_vm6  ;;  %v4980_v35 = vpop.permute.xlu1 %4979 }
 0x210   : > { %v2927_v18 = vsel %vm7393_vm4, %v2543_v60, %v4946_v46  ;;  %vm7394_vm7 = vmmov %vm7385_vm1  ;;  %vm7411_vm4 = vnez %v7410_v42  ;;  %v4982_v36 = vunpack.i.h.bf16 %v4980_v35  ;;  %v4981_v10 = vunpack.i.l.bf16 %v4980_v35 }
 0x211   : > { %4510 = vmatprep.mubr.msk.bf16.mxu0 %vm7377_vm3, %v2979_v31  ;;  %v2959_v17 = vsel %vm7394_vm7, %v2927_v18, %v4956_v4  ;;  %vm7395_vm15 = vmmov %vm7385_vm1  ;;  %v2545_v11 = vsel %vm7411_vm4, %v6484_v1, 0.0  ;;  %v2547_v60 = vsel %vm7285_vm12, %v5089_v52, 0.0 }
 0x212   : > { %v2960_v23 = vsel %vm7395_vm15, %v2928_v16, %v4957_v3  ;;  %vm7397_vm9 = vmmov %vm7385_vm1 }
 0x213   : > { %v1663_v55 = vsel %vm7397_vm9, %v7396_v24, %v4961_v12  ;;  %vm7399_vm8 = vmmov %vm7385_vm1  ;;  %v2980_v13 = vpack.c.bf16 %v2960_v23, %v2959_v17  ;;  %v4985_v28 = vpop.permute.xlu1 %4984  ;;  %v2519_v24 = vld [vmem:[#allocation2 + $0x117] sm:$0xff] }
 0x214   : > { %v1664_v41 = vsel %vm7399_vm8, %v7398_v39, %v4962_v21  ;;  %vm7400_vm1 = vmmov %vm7377_vm3  ;;  %vm7412_vm3 = vcmask 261120   ;;  %v4987_v1 = vunpack.i.h.bf16 %v4985_v28  ;;  %v4986_v46 = vunpack.i.l.bf16 %v4985_v28 }
 0x215   : > { %4463 = vmatmul.mubr.msk.bf16.gmra.mxu1 %vm7400_vm1, %v1680_v32  ;;  %v1683_v51 = vpack.c.bf16 %v1664_v41, %v1663_v55  ;;  %vm7401_vm11 = vmmov %vm7400_vm1  ;;  %v2930_v6 = vsel %vm7412_vm3, %v6487_v15, %v4972_v25  ;;  %v7426_v41 = vld [vmem:[#allocation17_spill] sm:$0xff]  ;;  %v5061_v25 = vld [vmem:[%s7012_s5] sm:$0xff]  }
 0x216   : > { %4466 = vmatprep.mubr.msk.bf16.mxu1 %vm7401_vm11, %v1681_v45  ;;  %vm7403_vm13 = vmmov %vm7388_vm2  ;;  %v4975_v45 = vpop.permute.xlu0 %4974  ;;  %4524 = vmatprep.subr.bf16.mxu1 %v5061_v25 }
 0x217   : > { %v1661_v48 = vsel %vm7403_vm13, %v7402_v22, %v4936_v53  ;;  %vm7405_vm14 = vmmov %vm7388_vm2  ;;  %v4977_v7 = vunpack.i.h.bf16 %v4975_v45  ;;  %v4976_v20 = vunpack.i.l.bf16 %v4975_v45  ;;  %v4990_v38 = vpop.permute.xlu1 %4989  ;;  %v2549_v53 = vsel %vm6422_vm0, %v6519_v37, 0.0  ;;  %v7430_v37 = vld [vmem:[#allocation18_spill] sm:$0xff]  ;;  %4525 = vmatpush3.bf16.msra.mxu1 %v5061_v25 }
 0x218   : > { %v1662_v59 = vsel %vm7405_vm14, %v7404_v5, %v4937_v62  ;;  %vm7406_vm2 = vmmov %vm7400_vm1  ;;  %v4992_v21 = vunpack.i.h.bf16 %v4990_v38  ;;  %v4991_v12 = vunpack.i.l.bf16 %v4990_v38 }
 0x219   : > { %4511 = vmatmul.mubr.msk.bf16.gmra.mxu0 %vm7406_vm2, %v2980_v13  ;;  %vm7408_vm10 = vmmov %vm7394_vm7  ;;  %v1682_v50 = vpack.c.bf16 %v1662_v59, %v1661_v48 }
 0x21a   : > { %v1665_v8 = vsel %vm7408_vm10, %v7407_v56, %v4966_v47  ;;  %vm7409_vm6 = vmmov %vm7394_vm7  ;;  %v4995_v9 = vpop.permute.xlu0 %4994  ;;  %v2551_v56 = vsel %vm5804_vm5, %v2519_v24, 0.0 }
 0x21b   : > { %v1666_v33 = vsel %vm7409_vm6, %v6475_v29, %v4967_v14  ;;  %vm7413_vm7 = vmmov %vm7412_vm3  ;;  %v4997_v55 = vunpack.i.h.bf16 %v4995_v9  ;;  %v4996_v39 = vunpack.i.l.bf16 %v4995_v9 }
 0x21c   : > { %v1684_v34 = vpack.c.bf16 %v1666_v33, %v1665_v8  ;;  %v2929_v63 = vsel %vm7413_vm7, %v2545_v11, %v4971_v0  ;;  %vm7414_vm15 = vmmov %vm7409_vm6 }
 0x21d   : > { %v2961_v27 = vsel %vm7414_vm15, %v2929_v63, %v4981_v10  ;;  %vm7415_vm9 = vmmov %vm7409_vm6 }
 0x21e   : > { %v2962_v54 = vsel %vm7415_vm9, %v2930_v6, %v4982_v36  ;;  %vm7416_vm8 = vmmov %vm7400_vm1  ;;  %v5000_v32 = vpop.permute.xlu0 %4999 }
 0x21f   : > { %4467 = vmatmul.mubr.msk.bf16.gmra.mxu1 %vm7416_vm8, %v1682_v50  ;;  %v2981_v29 = vpack.c.bf16 %v2962_v54, %v2961_v27  ;;  %vm7417_vm11 = vmmov %vm7400_vm1  ;;  %v5002_v19 = vunpack.i.h.bf16 %v5000_v32  ;;  %v5001_v44 = vunpack.i.l.bf16 %v5000_v32 }
 0x220   : > { %4470 = vmatprep.mubr.msk.bf16.mxu1 %vm7400_vm1, %v1683_v51  ;;  %vm7418_vm13 = vmmov %vm7409_vm6 }
 0x221   : > { %4514 = vmatprep.mubr.msk.bf16.mxu0 %vm7417_vm11, %v2981_v29  ;;  %v1667_v15 = vsel %vm7418_vm13, %v6501_v57, %v4986_v46  ;;  %vm7419_vm14 = vmmov %vm7409_vm6 }
 0x222   : > { %v1668_v40 = vsel %vm7419_vm14, %v6498_v43, %v4987_v1  ;;  %vm7420_vm2 = vmmov %vm7412_vm3  ;;  %v5005_v2 = vpop.permute.xlu0 %5004 }
 0x223   : > { %v2932_v31 = vsel %vm7420_vm2, %v6536_v30, %v4977_v7  ;;  %vm7421_vm10 = vmmov %vm7420_vm2  ;;  %v1685_v4 = vpack.c.bf16 %v1668_v40, %v1667_v15  ;;  %v5010_v30 = vpop.permute.xlu1 %5009  ;;  %v5007_v16 = vunpack.i.h.bf16 %v5005_v2  ;;  %v5006_v18 = vunpack.i.l.bf16 %v5005_v2 }
 0x224   : > { %v2931_v3 = vsel %vm7421_vm10, %v2547_v60, %v4976_v20  ;;  %vm7422_vm4 = vmmov %vm7409_vm6  ;;  %v5012_v17 = vunpack.i.h.bf16 %v5010_v30  ;;  %v5011_v23 = vunpack.i.l.bf16 %v5010_v30 }
 0x225   : > { %v2963_v57 = vsel %vm7409_vm6, %v2931_v3, %v5001_v44  ;;  %v2964_v43 = vsel %vm7422_vm4, %v2932_v31, %v5002_v19  ;;  %vm7423_vm3 = vmmov %vm7400_vm1 }
 0x226   : > { %v2982_v62 = vpack.c.bf16 %v2964_v43, %v2963_v57  ;;  %vm7425_vm12 = vmmov %vm7400_vm1  ;;  %v5015_v59 = vpop.permute.xlu0 %5014 }
 0x227   : > { %4471 = vmatmul.mubr.msk.bf16.gmra.mxu1 %vm7423_vm3, %v1684_v34  ;;  %vm7427_vm7 = vmmov %vm7420_vm2  ;;  %v5017_v8 = vunpack.i.h.bf16 %v5015_v59  ;;  %v5016_v33 = vunpack.i.l.bf16 %v5015_v59 }
 0x228   : > { %4474 = vmatprep.mubr.msk.bf16.mxu1 %vm7425_vm12, %v1685_v4  ;;  %v2934_v13 = vsel %vm7427_vm7, %v7426_v41, %v4992_v21  ;;  %vm7428_vm15 = vmmov %vm7420_vm2 }
 0x229   : > { %v2933_v51 = vsel %vm7428_vm15, %v2549_v53, %v4991_v12  ;;  %vm7429_vm9 = vmmov %vm7400_vm1 }
 0x22a   : > { %4515 = vmatmul.mubr.msk.bf16.gmra.mxu0 %vm7429_vm9, %v2982_v62  ;;  %vm7431_vm0 = vmmov %vm7422_vm4 }
 0x22b   : > { %v1669_v58 = vsel %vm7431_vm0, %v7430_v37, %v5006_v18  ;;  %vm7432_vm8 = vmmov %vm7431_vm0 }
 0x22c   : > { %v1670_v14 = vsel %vm7432_vm8, %v6544_v49, %v5007_v16  ;;  %vm7433_vm1 = vmmov %vm7431_vm0 }
 0x22d   : > { %v2965_v47 = vsel %vm7433_vm1, %v2933_v51, %v5011_v23  ;;  %vm7434_vm11 = vmmov %vm7431_vm0  ;;  %v1686_v48 = vpack.c.bf16 %v1670_v14, %v1669_v58 }
 0x22e   : > { %v2966_v22 = vsel %vm7434_vm11, %v2934_v13, %v5012_v17  ;;  %vm7436_vm13 = vmmov %vm7420_vm2 }
 0x22f   : > { %v2983_v5 = vpack.c.bf16 %v2966_v22, %v2965_v47  ;;  %v2936_v34 = vsel %vm7436_vm13, %v2520_v26, %v4997_v55  ;;  %vm7437_vm14 = vmmov %vm7420_vm2 }
 0x230   : > { %v2935_v49 = vsel %vm7437_vm14, %v2551_v56, %v4996_v39  ;;  %vm7438_vm2 = vmmov %vm7423_vm3 }
 0x231   : > { %4518 = vmatprep.mubr.msk.bf16.mxu0 %vm7438_vm2, %v2983_v5  ;;  %vm7439_vm10 = vmmov %vm7431_vm0  ;;  %v6804_v5 = vld [vmem:[%s7011_s4] ss:$0 sm:$0xff] }
 0x232   : > { %v2967_v45 = vsel %vm7439_vm10, %v2935_v49, %v5016_v33  ;;  %vm7440_vm6 = vmmov %vm7431_vm0 }
 0x233   : > { %v2968_v35 = vsel %vm7440_vm6, %v2936_v34, %v5017_v8  ;;  %vm7441_vm4 = vmmov %vm7438_vm2 }
 0x234   : > { %4475 = vmatmul.mubr.msk.bf16.gmra.mxu1 %vm7441_vm4, %v1686_v48  ;;  %v2984_v50 = vpack.c.bf16 %v2968_v35, %v2967_v45  ;;  %vm7442_vm3 = vmmov %vm7438_vm2 }
 0x235   : > { %vm7443_vm5 = vmmov %vm7427_vm7 }
 0x236   : > { %4519 = vmatmul.mubr.msk.bf16.gmra.mxu0 %vm7442_vm3, %v2984_v50  ;;  %vm7444_vm12 = vmmov %vm7443_vm5 }
 0x237   : > { %vm7445_vm7 = vmmov %vm7443_vm5 }
 0x238   : > { %vm7446_vm15 = vmmov %vm7443_vm5 }
 0x239   : > { %vm7447_vm9 = vmmov %vm7443_vm5 }
 0x23a   : > { %vm7448_vm0 = vmmov %vm7443_vm5 }
 0x23b   : > { %vm7449_vm8 = vmmov %vm7448_vm0 }
 0x23c   : > { %vm7450_vm1 = vmmov %vm7448_vm0 }
 0x23d   : > { %vm7451_vm11 = vmmov %vm7448_vm0 }
 0x23e   : > { %vm7452_vm13 = vmmov %vm7448_vm0 }
 0x23f   : > { %vm7453_vm14 = vmmov %vm7448_vm0 }
 0x240   : > { %vm7454_vm2 = vmmov %vm7448_vm0 }
 0x241   : > { %vm7455_vm10 = vmmov %vm7448_vm0 }
 0x242   : > { %vm7456_vm6 = vmmov %vm7448_vm0 }
 0x243   : > { %vm7457_vm4 = vmmov %vm7448_vm0 }
 0x244   : > { %vm7458_vm3 = vmmov %vm7448_vm0 }
 0x24f   : > { %v4404_v42 = vpop.f32.mrf.mxu0 }
 0x251   : > { %v2117_v11 = vpop.f32.mrf.mxu0 }
 0x253   : > { %v4405_v36 = vpop.f32.mrf.mxu0 }
 0x255   : > { %v2120_v10 = vpop.f32.mrf.mxu0 }
 0x263   : > { %v4408_v6 = vpop.f32.mrf.mxu0 }
 0x265   : > { %v2133_v63 = vpop.f32.mrf.mxu0 }
 0x267   : > { %v6749_v27 = vpop.f32.mrf.mxu0 }
 0x269   : > { %v6751_v54 = vpop.f32.mrf.mxu0 }
 0x26e   : > { %v6753_v29 = vpop.f32.mrf.mxu0 }
 0x270   : > { %v6759_v7 = vpop.f32.mrf.mxu0 }
 0x272   : > { %v6765_v20 = vpop.f32.mrf.mxu0 }
 0x274   : > { %v6771_v32 = vpop.f32.mrf.mxu0 }
 0x276   : > { %v6755_v9 = vpop.f32.mrf.mxu1  ;;  %v4492_v52 = vpop.f32.mrf.mxu0 }
 0x278   : > { %v6757_v28 = vpop.f32.mrf.mxu1  ;;  %v3116_v31 = vpop.f32.mrf.mxu0 }
 0x27a   : > { %v6761_v1 = vpop.f32.mrf.mxu1  ;;  %v4493_v3 = vpop.f32.mrf.mxu0 }
 0x27c   : > { %v6763_v46 = vpop.f32.mrf.mxu1  ;;  %v3119_v12 = vpop.f32.mrf.mxu0 }
 0x27e   : > { %v6767_v15 = vpop.f32.mrf.mxu1 }
 0x280   : > { %v6769_v40 = vpop.f32.mrf.mxu1 }
 0x282   : > { %v6773_v38 = vpop.f32.mrf.mxu1 }
 0x284   : > { %v6775_v60 = vpop.f32.mrf.mxu1 }
 0x28b   : > { %v6777_v19 = vpop.f32.mrf.mxu1 }
 0x28d   : > { %v6779_v44 = vpop.f32.mrf.mxu1 }
 0x28f   : > { %v6781_v4 = vpop.f32.mrf.mxu1 }
 0x291   : > { %v6783_v21 = vpop.f32.mrf.mxu1  ;;  %v4496_v43 = vpop.f32.mrf.mxu0 }
 0x293   : > { %v3132_v53 = vpop.f32.mrf.mxu0 }
 0x295   : > { %v6785_v57 = vpop.f32.mrf.mxu1  ;;  %v4497_v16 = vpop.f32.mrf.mxu0 }
 0x297   : > { %v6787_v62 = vpop.f32.mrf.mxu1  ;;  %v3135_v23 = vpop.f32.mrf.mxu0 }
 0x299   : > { %v6789_v61 = vpop.f32.mrf.mxu1 }
 0x29b   : > { %v6791_v2 = vpop.f32.mrf.mxu1 }
 0x2a1   : > { %v6793_v30 = vpop.f32.mrf.mxu1 }
 0x2a3   : > { %v6795_v18 = vpop.f32.mrf.mxu1 }
 0x2a5   : > { %v6797_v17 = vpop.f32.mrf.mxu1 }
 0x2a7   : > { %v6799_v24 = vpop.f32.mrf.mxu1 }
 0x2aa   : > { %v4500_v55 = vpop.f32.mrf.mxu0 }
 0x2ac   : > { %v3148_v41 = vpop.f32.mrf.mxu0 }
 0x2ad   : > { %v4448_v39 = vpop.f32.mrf.mxu1 }
 0x2ae   : > { %v2371_v13 = vadd.f32 %v4448_v39, %v4404_v42  ;;  %v4501_v14 = vpop.f32.mrf.mxu0 }
 0x2af   : > { %v2362_v51 = vpop.f32.mrf.mxu1 }
 0x2b0   : > { %v2363_v26 = vadd.f32 %v2362_v51, %v2117_v11  ;;  %v3245_v22 = vadd.f32 %v4492_v52, %v2371_v13  ;;  %v3151_v33 = vpop.f32.mrf.mxu0 }
 0x2b1   : > { %v4449_v37 = vpop.f32.mrf.mxu1 }
 0x2b2   : > { %v3243_v58 = vadd.f32 %v3116_v31, %v2363_v26  ;;  %v2374_v47 = vadd.f32 %v4449_v37, %v4405_v36  ;;  %v3284_v49 = vadd.f32 %v6804_v5, %v3245_v22 }
 0x2b3   : > { %v2365_v48 = vpop.f32.mrf.mxu1 }
 0x2b4   : > { %v3246_v59 = vadd.f32 %v4493_v3, %v2374_v47  ;;  %v2366_v25 = vadd.f32 %v2365_v48, %v2120_v10  ;;  %v3282_v56 = vadd.f32 %v6804_v5, %v3243_v58  ;;  %v3316_v13 = vmax.f32 %v3284_v49, 0.0 }
 0x2b5   : > { %v4452_v0 = vpop.f32.mrf.mxu1 }
 0x2b6   : > { %v3285_v8 = vadd.f32 %v6804_v5, %v3246_v59  ;;  %v3244_v34 = vadd.f32 %v3119_v12, %v2366_v25  ;;  %v2387_v45 = vadd.f32 %v4452_v0, %v4408_v6  ;;  %v3314_v31 = vmax.f32 %v3282_v56, 0.0 }
 0x2b7   : > { %v2378_v35 = vpop.f32.mrf.mxu1 }
 0x2b8   : > { %v3283_v50 = vadd.f32 %v6804_v5, %v3244_v34  ;;  %v2379_v42 = vadd.f32 %v2378_v35, %v2133_v63  ;;  %v3317_v36 = vmax.f32 %v3285_v8, 0.0  ;;  %v3249_v51 = vadd.f32 %v4496_v43, %v2387_v45 }
 0x2b9   : > { %v4504_v11 = vpop.f32.mrf.mxu0  ;;  %v4453_v52 = vpop.f32.mrf.mxu1 }
 0x2ba   : > { %v3315_v3 = vmax.f32 %v3283_v50, 0.0  ;;  %v3247_v10 = vadd.f32 %v3132_v53, %v2379_v42  ;;  %v2390_v26 = vadd.f32 %v4453_v52, %v6749_v27  ;;  %v3347_v6 = vpack.c.bf16 %v3317_v36, %v3316_v13 }
 0x2bb   : > { %v3164_v39 = vpop.f32.mrf.mxu0  ;;  %v2381_v37 = vpop.f32.mrf.mxu1  ;;  %v3288_v53 = vadd.f32 %v6804_v5, %v3249_v51 }
 0x2bc   : > { %v3346_v12 = vpack.c.bf16 %v3315_v3, %v3314_v31  ;;  %v2382_v58 = vadd.f32 %v2381_v37, %v6751_v54  ;;  %v3250_v47 = vadd.f32 %v4497_v16, %v2390_v26  ;;  %v3286_v63 = vadd.f32 %v6804_v5, %v3247_v10 }
 0x2bd   : > { %v4505_v59 = vpop.f32.mrf.mxu0  ;;  %v3320_v45 = vmax.f32 %v3288_v53, 0.0 }
 0x2be   : > { %v4456_v22 = vpop.f32.mrf.mxu1  ;;  %v3248_v48 = vadd.f32 %v3135_v23, %v2382_v58  ;;  %4526 = vmatprep.mubr.msk.bf16.mxu1 %vm7443_vm5, %v3346_v12  ;;  %v3289_v25 = vadd.f32 %v6804_v5, %v3250_v47  ;;  %v3318_v8 = vmax.f32 %v3286_v63, 0.0 }
 0x2bf   : > { %4527 = vmatmul.mubr.msk.bf16.vlgmr.msra.gmra.mxu1 %vm7444_vm12, %v3347_v6  ;;  %v2403_v54 = vadd.f32 %v4456_v22, %v6753_v29  ;;  %v3167_v34 = vpop.f32.mrf.mxu0 }
 0x2c0   : > { %v2394_v43 = vpop.f32.mrf.mxu1  ;;  %v3287_v27 = vadd.f32 %v6804_v5, %v3248_v48  ;;  %v3321_v0 = vmax.f32 %v3289_v25, 0.0 }
 0x2c1   : > { %v2395_v16 = vadd.f32 %v2394_v43, %v6759_v7  ;;  %v3253_v36 = vadd.f32 %v4500_v55, %v2403_v54 }
 0x2c2   : > { %v4457_v56 = vpop.f32.mrf.mxu1  ;;  %v3319_v23 = vmax.f32 %v3287_v27, 0.0  ;;  %v3349_v3 = vpack.c.bf16 %v3321_v0, %v3320_v45 }
 0x2c3   : > { %v2406_v49 = vadd.f32 %v4457_v56, %v6765_v20  ;;  %v3251_v35 = vadd.f32 %v3148_v41, %v2395_v16  ;;  %v3292_v20 = vadd.f32 %v6804_v5, %v3253_v36 }
 0x2c4   : > { %v2397_v50 = vpop.f32.mrf.mxu1  ;;  %v3348_v42 = vpack.c.bf16 %v3319_v23, %v3318_v8 }
 0x2c5   : > { %v3254_v52 = vadd.f32 %v4501_v14, %v2406_v49  ;;  %v2398_v10 = vadd.f32 %v2397_v50, %v6771_v32  ;;  %v3290_v13 = vadd.f32 %v6804_v5, %v3251_v35  ;;  %v3324_v63 = vmax.f32 %v3292_v20, 0.0 }
 0x2c6   : > { %4530 = vmatprep.mubr.msk.bf16.mxu1 %vm7445_vm7, %v3348_v42 }
 0x2c7   : > { %v4508_v31 = vpop.f32.mrf.mxu0  ;;  %v3293_v7 = vadd.f32 %v6804_v5, %v3254_v52  ;;  %v3252_v51 = vadd.f32 %v3151_v33, %v2398_v10  ;;  %4531 = vmatmul.mubr.msk.bf16.gmra.mxu1 %vm7446_vm15, %v3349_v3  ;;  %v3322_v47 = vmax.f32 %v3290_v13, 0.0 }
 0x2c8   : > { %v4460_v29 = vpop.f32.mrf.mxu1 }
 0x2c9   : > { %v2419_v55 = vadd.f32 %v4460_v29, %v6755_v9  ;;  %v3180_v41 = vpop.f32.mrf.mxu0  ;;  %v3291_v32 = vadd.f32 %v6804_v5, %v3252_v51  ;;  %v3325_v12 = vmax.f32 %v3293_v7, 0.0 }
 0x2ca   : > { %v2410_v26 = vpop.f32.mrf.mxu1 }
 0x2cb   : > { %v2411_v14 = vadd.f32 %v2410_v26, %v6757_v28  ;;  %v3323_v22 = vmax.f32 %v3291_v32, 0.0  ;;  %v3257_v48 = vadd.f32 %v4504_v11, %v2419_v55  ;;  %v4509_v53 = vpop.f32.mrf.mxu0  ;;  %v3351_v54 = vpack.c.bf16 %v3325_v12, %v3324_v63 }
 0x2cc   : > { %v4461_v37 = vpop.f32.mrf.mxu1 }
 0x2cd   : > { %v3255_v58 = vadd.f32 %v3164_v39, %v2411_v14  ;;  %v2422_v6 = vadd.f32 %v4461_v37, %v6761_v1  ;;  %v3350_v9 = vpack.c.bf16 %v3323_v22, %v3322_v47  ;;  %v3296_v39 = vadd.f32 %v6804_v5, %v3257_v48  ;;  %v3183_v56 = vpop.f32.mrf.mxu0 }
 0x2ce   : > { %v2413_v33 = vpop.f32.mrf.mxu1 }
 0x2cf   : > { %v3258_v25 = vadd.f32 %v4505_v59, %v2422_v6  ;;  %v2414_v43 = vadd.f32 %v2413_v33, %v6763_v46  ;;  %v3294_v28 = vadd.f32 %v6804_v5, %v3255_v58  ;;  %4534 = vmatprep.mubr.msk.bf16.mxu1 %vm7447_vm9, %v3350_v9  ;;  %v3328_v36 = vmax.f32 %v3296_v39, 0.0 }
 0x2d0   : > { %4535 = vmatmul.mubr.msk.bf16.gmra.mxu1 %vm7448_vm0, %v3351_v54 }
 0x2d1   : > { %v3297_v16 = vadd.f32 %v6804_v5, %v3258_v25  ;;  %v3256_v0 = vadd.f32 %v3167_v34, %v2414_v43  ;;  %v3326_v23 = vmax.f32 %v3294_v28, 0.0 }
 0x2d3   : > { %v3295_v11 = vadd.f32 %v6804_v5, %v3256_v0  ;;  %v3329_v49 = vmax.f32 %v3297_v16, 0.0 }
 0x2d5   : > { %v4464_v27 = vpop.f32.mrf.mxu1  ;;  %v3327_v45 = vmax.f32 %v3295_v11, 0.0  ;;  %v3353_v7 = vpack.c.bf16 %v3329_v49, %v3328_v36 }
 0x2d6   : > { %v2435_v59 = vadd.f32 %v4464_v27, %v6767_v15 }
 0x2d7   : > { %v2426_v1 = vpop.f32.mrf.mxu1  ;;  %v3352_v52 = vpack.c.bf16 %v3327_v45, %v3326_v23 }
 0x2d8   : > { %v2427_v46 = vadd.f32 %v2426_v1, %v6769_v40  ;;  %v3261_v3 = vadd.f32 %v4508_v31, %v2435_v59 }
 0x2d9   : > { %v4465_v8 = vpop.f32.mrf.mxu1  ;;  %v4512_v34 = vpop.f32.mrf.mxu0  ;;  %4538 = vmatprep.mubr.msk.bf16.mxu1 %vm7449_vm8, %v3352_v52 }
 0x2da   : > { %v3259_v35 = vadd.f32 %v3180_v41, %v2427_v46  ;;  %v2438_v50 = vadd.f32 %v4465_v8, %v6773_v38  ;;  %v3300_v55 = vadd.f32 %v6804_v5, %v3261_v3  ;;  %4539 = vmatmul.mubr.msk.bf16.gmra.mxu1 %vm7450_vm1, %v3353_v7 }
 0x2db   : > { %v2429_v42 = vpop.f32.mrf.mxu1  ;;  %v3196_v13 = vpop.f32.mrf.mxu0 }
 0x2dc   : > { %v2430_v10 = vadd.f32 %v2429_v42, %v6775_v60  ;;  %v3262_v29 = vadd.f32 %v4509_v53, %v2438_v50  ;;  %v3298_v40 = vadd.f32 %v6804_v5, %v3259_v35  ;;  %v3332_v22 = vmax.f32 %v3300_v55, 0.0 }
 0x2dd   : > { %v4513_v58 = vpop.f32.mrf.mxu0 }
 0x2de   : > { %v3260_v51 = vadd.f32 %v3183_v56, %v2430_v10  ;;  %v3301_v20 = vadd.f32 %v6804_v5, %v3262_v29  ;;  %v3330_v32 = vmax.f32 %v3298_v40, 0.0 }
 0x2df   : > { %v4468_v15 = vpop.f32.mrf.mxu1  ;;  %v3199_v43 = vpop.f32.mrf.mxu0 }
 0x2e0   : > { %v2451_v26 = vadd.f32 %v4468_v15, %v6777_v19  ;;  %v3299_v31 = vadd.f32 %v6804_v5, %v3260_v51  ;;  %v3333_v37 = vmax.f32 %v3301_v20, 0.0 }
 0x2e1   : > { %v2442_v38 = vpop.f32.mrf.mxu1 }
 0x2e2   : > { %v3265_v41 = vadd.f32 %v4512_v34, %v2451_v26  ;;  %v2443_v60 = vadd.f32 %v2442_v38, %v6779_v44  ;;  %v3331_v12 = vmax.f32 %v3299_v31, 0.0  ;;  %v3355_v44 = vpack.c.bf16 %v3333_v37, %v3332_v22 }
 0x2e3   : > { %v4469_v14 = vpop.f32.mrf.mxu1 }
 0x2e4   : > { %v2454_v19 = vadd.f32 %v4469_v14, %v6781_v4  ;;  %v3263_v6 = vadd.f32 %v3196_v13, %v2443_v60  ;;  %v3354_v33 = vpack.c.bf16 %v3331_v12, %v3330_v32  ;;  %v3304_v63 = vadd.f32 %v6804_v5, %v3265_v41 }
 0x2e5   : > { %v2445_v47 = vpop.f32.mrf.mxu1 }
 0x2e6   : > { %v3266_v48 = vadd.f32 %v4513_v58, %v2454_v19  ;;  %v2446_v53 = vadd.f32 %v2445_v47, %v6783_v21  ;;  %4542 = vmatprep.mubr.msk.bf16.mxu1 %vm7451_vm11, %v3354_v33  ;;  %v3302_v4 = vadd.f32 %v6804_v5, %v3263_v6  ;;  %v3336_v16 = vmax.f32 %v3304_v63, 0.0 }
 0x2e7   : > { %v4472_v25 = vpop.f32.mrf.mxu1  ;;  %4543 = vmatmul.mubr.msk.bf16.gmra.mxu1 %vm7452_vm13, %v3355_v44  ;;  %v6883_v44 = vld [vmem:[%s7013_s6] ss:$0 sm:$0xff] }
 0x2e8   : > { %v3305_v9 = vadd.f32 %v6804_v5, %v3266_v48  ;;  %v2467_v27 = vadd.f32 %v4472_v25, %v6785_v57  ;;  %v3264_v54 = vadd.f32 %v3199_v43, %v2446_v53  ;;  %v3334_v8 = vmax.f32 %v3302_v4, 0.0 }
 0x2e9   : > { %v2458_v28 = vpop.f32.mrf.mxu1 }
 0x2ea   : > { %v3337_v0 = vmax.f32 %v3305_v9, 0.0  ;;  %v2459_v1 = vadd.f32 %v2458_v28, %v6787_v62  ;;  %v4516_v21 = vpop.f32.mrf.mxu0  ;;  %v3303_v39 = vadd.f32 %v6804_v5, %v3264_v54  ;;  %v5091_v54 = vld [vmem:[%s5275_s23] sm:$0xff]  }
 0x2eb   : > { %v3269_v56 = vadd.f32 %v4516_v21, %v2467_v27  ;;  %v4473_v11 = vpop.f32.mrf.mxu1  ;;  %v5090_v27 = vld [vmem:[%s5275_s23 + $0x8] sm:$0xff]   ;;  %v3594_v28 = vunpack.c.l.bf16 %v5091_v54  ;;  %v3595_v21 = vunpack.c.h.bf16 %v5091_v54 }
 0x2ec   : > { %v3357_v59 = vpack.c.bf16 %v3337_v0, %v3336_v16  ;;  %v2470_v57 = vadd.f32 %v4473_v11, %v6789_v61  ;;  %v3212_v46 = vpop.f32.mrf.mxu0  ;;  %v3335_v23 = vmax.f32 %v3303_v39, 0.0  ;;  %v3597_v0 = vunpack.c.h.bf16 %v5090_v27 }
 0x2ed   : > { %v3267_v49 = vadd.f32 %v3212_v46, %v2459_v1  ;;  %v2461_v45 = vpop.f32.mrf.mxu1  ;;  %v3308_v62 = vadd.f32 %v6804_v5, %v3269_v56 }
 0x2ee   : > { %v2462_v35 = vadd.f32 %v2461_v45, %v6791_v2  ;;  %v4517_v34 = vpop.f32.mrf.mxu0  ;;  %v3356_v50 = vpack.c.bf16 %v3335_v23, %v3334_v8  ;;  %v5092_v23 = vld [vmem:[%s5275_s23 + $0x18] sm:$0xff]  }
 0x2ef   : > { %v3270_v42 = vadd.f32 %v4517_v34, %v2470_v57  ;;  %v3306_v10 = vadd.f32 %v6804_v5, %v3267_v49  ;;  %v3340_v40 = vmax.f32 %v3308_v62, 0.0  ;;  %v3600_v49 = vunpack.c.l.bf16 %v5092_v23 }
 0x2f0   : > { %v3215_v3 = vpop.f32.mrf.mxu0  ;;  %4546 = vmatprep.mubr.msk.bf16.mxu1 %vm7453_vm14, %v3356_v50 }
 0x2f1   : > { %v3309_v61 = vadd.f32 %v6804_v5, %v3270_v42  ;;  %v3268_v29 = vadd.f32 %v3215_v3, %v2462_v35  ;;  %4547 = vmatmul.mubr.msk.bf16.gmra.mxu1 %vm7454_vm2, %v3357_v59  ;;  %v3338_v55 = vmax.f32 %v3306_v10, 0.0  ;;  %v5093_v42 = vld [vmem:[%s5275_s23 + $0x10] sm:$0xff]  }
 0x2f3   : > { %v3341_v13 = vmax.f32 %v3309_v61, 0.0  ;;  %v3307_v51 = vadd.f32 %v6804_v5, %v3268_v29 }
 0x2f4   : > { %v4476_v36 = vpop.f32.mrf.mxu1 }
 0x2f5   : > { %v2483_v52 = vadd.f32 %v4476_v36, %v6793_v30  ;;  %v3359_v31 = vpack.c.bf16 %v3341_v13, %v3340_v40  ;;  %v3339_v41 = vmax.f32 %v3307_v51, 0.0  ;;  %v3598_v36 = vunpack.c.l.bf16 %v5093_v42 }
 0x2f6   : > { %v2474_v15 = vpop.f32.mrf.mxu1  ;;  %v4520_v2 = vpop.f32.mrf.mxu0  ;;  %v3599_v13 = vunpack.c.h.bf16 %v5093_v42 }
 0x2f7   : > { %v2475_v7 = vadd.f32 %v2474_v15, %v6795_v18  ;;  %v3273_v26 = vadd.f32 %v4520_v2, %v2483_v52  ;;  %v3358_v37 = vpack.c.bf16 %v3339_v41, %v3338_v55  ;;  %v3601_v52 = vunpack.c.h.bf16 %v5092_v23 }
 0x2f8   : > { %v4477_v30 = vpop.f32.mrf.mxu1  ;;  %v3228_v38 = vpop.f32.mrf.mxu0 }
 0x2f9   : > { %v2486_v20 = vadd.f32 %v4477_v30, %v6797_v17  ;;  %v3271_v60 = vadd.f32 %v3228_v38, %v2475_v7  ;;  %v3312_v12 = vadd.f32 %v6804_v5, %v3273_v26  ;;  %4550 = vmatprep.mubr.msk.bf16.mxu1 %vm7455_vm10, %v3358_v37 }
 0x2fa   : > { %v2477_v14 = vpop.f32.mrf.mxu1  ;;  %v4521_v18 = vpop.f32.mrf.mxu0  ;;  %4551 = vmatmul.mubr.msk.bf16.gmra.mxu1 %vm7456_vm6, %v3359_v31 }
 0x2fb   : > { %v2478_v32 = vadd.f32 %v2477_v14, %v6799_v24  ;;  %v3274_v58 = vadd.f32 %v4521_v18, %v2486_v20  ;;  %v3310_v6 = vadd.f32 %v6804_v5, %v3271_v60  ;;  %v3344_v22 = vmax.f32 %v3312_v12, 0.0  ;;  %v5094_v14 = vld [vmem:[%s5275_s23 + $0x28] sm:$0xff]  }
 0x2fc   : > { %v3231_v19 = vpop.f32.mrf.mxu0 }
 0x2fd   : > { %v3313_v47 = vadd.f32 %v6804_v5, %v3274_v58  ;;  %v3272_v17 = vadd.f32 %v3231_v19, %v2478_v32  ;;  %v3342_v63 = vmax.f32 %v3310_v6, 0.0  ;;  %v3604_v32 = vunpack.c.l.bf16 %v5094_v14  ;;  %v5095_v6 = vld [vmem:[%s5275_s23 + $0x20] sm:$0xff]  }
 0x2ff   : > { %v3345_v33 = vmax.f32 %v3313_v47, 0.0  ;;  %v3311_v24 = vadd.f32 %v6804_v5, %v3272_v17  ;;  %v3596_v5 = vunpack.c.l.bf16 %v5090_v27  ;;  %v3602_v47 = vunpack.c.l.bf16 %v5095_v6 }
 0x300   : > { %v3605_v17 = vunpack.c.h.bf16 %v5094_v14 }
 0x301   : > { %v3361_v48 = vpack.c.bf16 %v3345_v33, %v3344_v22  ;;  %v3343_v53 = vmax.f32 %v3311_v24, 0.0 }
 0x303   : > { %v3360_v25 = vpack.c.bf16 %v3343_v53, %v3342_v63 }
 0x305   : > { %4554 = vmatprep.mubr.msk.bf16.mxu1 %vm7457_vm4, %v3360_v25 }
 0x306   : > { %4555 = vmatmul.mubr.msk.bf16.gmra.mxu1 %vm7458_vm3, %v3361_v48  ;;  %v3603_v48 = vunpack.c.h.bf16 %v5095_v6 }
 0x37f   : > { %v4528_v43 = vpop.f32.mrf.mxu1 }
 0x380   : > { %v3476_v9 = vadd.f32 %v4528_v43, %v6883_v44 }
 0x381   : > { %v3467_v4 = vpop.f32.mrf.mxu1 }
 0x382   : > { %v3468_v16 = vadd.f32 %v6883_v44, %v3467_v4  ;;  %v3628_v39 = vadd.f32 %v3596_v5, %v3476_v9  ;;  %v5096_v5 = vld [vmem:[%s5275_s23 + $0x38] sm:$0xff]  }
 0x383   : > { %v4529_v1 = vpop.f32.mrf.mxu1  ;;  %v3608_v4 = vunpack.c.l.bf16 %v5096_v5 }
 0x384   : > { %v3479_v56 = vadd.f32 %v4529_v1, %v6883_v44  ;;  %v3626_v59 = vadd.f32 %v3594_v28, %v3468_v16  ;;  %v3660_v45 = vmax.f32 %v3628_v39, 0.0 }
 0x385   : > { %v3470_v11 = vpop.f32.mrf.mxu1 }
 0x386   : > { %v3629_v57 = vadd.f32 %v3597_v0, %v3479_v56  ;;  %v3471_v46 = vadd.f32 %v6883_v44, %v3470_v11  ;;  %v3658_v3 = vmax.f32 %v3626_v59, 0.0  ;;  %v3609_v56 = vunpack.c.h.bf16 %v5096_v5 }
 0x387   : > { %v4532_v8 = vpop.f32.mrf.mxu1 }
 0x388   : > { %v3661_v35 = vmax.f32 %v3629_v57, 0.0  ;;  %v3627_v34 = vadd.f32 %v3595_v21, %v3471_v46  ;;  %v3492_v50 = vadd.f32 %v4532_v8, %v6883_v44  ;;  %v5097_v21 = vld [vmem:[%s5275_s23 + $0x30] sm:$0xff]  }
 0x389   : > { %v3483_v62 = vpop.f32.mrf.mxu1  ;;  %v3606_v39 = vunpack.c.l.bf16 %v5097_v21 }
 0x38a   : > { %v4147_v10 = vpack.c.bf16 %v3661_v35, %v3660_v45  ;;  %v3659_v61 = vmax.f32 %v3627_v34, 0.0  ;;  %v3484_v29 = vadd.f32 %v6883_v44, %v3483_v62  ;;  %v3632_v2 = vadd.f32 %v3600_v49, %v3492_v50 }
 0x38b   : > { %v4533_v15 = vpop.f32.mrf.mxu1  ;;  %v3607_v35 = vunpack.c.h.bf16 %v5097_v21 }
 0x38c   : > { %4219 = vst [vmem:[%s6898_s29 + $0x8] sm:$0xff] %v4147_v10   ;;  %v4142_v7 = vpack.c.bf16 %v3659_v61, %v3658_v3  ;;  %v3495_v40 = vadd.f32 %v4533_v15, %v6883_v44  ;;  %v3630_v26 = vadd.f32 %v3598_v36, %v3484_v29  ;;  %v3664_v38 = vmax.f32 %v3632_v2, 0.0  ;;  %v5099_v2 = vld [vmem:[%s5275_s23 + $0x40] sm:$0xff]  }
 0x38d   : > { %v3486_v51 = vpop.f32.mrf.mxu1 }
 0x38e   : > { %4143 = vst [vmem:[%s6898_s29] sm:$0xff] %v4142_v7   ;;  %v3633_v30 = vadd.f32 %v3601_v52, %v3495_v40  ;;  %v3487_v20 = vadd.f32 %v6883_v44, %v3486_v51  ;;  %v3662_v18 = vmax.f32 %v3630_v26, 0.0  ;;  %v5098_v52 = vld [vmem:[%s5275_s23 + $0x48] sm:$0xff]   ;;  %v3610_v40 = vunpack.c.l.bf16 %v5099_v2 }
 0x38f   : > { %v3612_v3 = vunpack.c.l.bf16 %v5098_v52 }
 0x390   : > { %v3665_v55 = vmax.f32 %v3633_v30, 0.0  ;;  %v3631_v31 = vadd.f32 %v3599_v13, %v3487_v20  ;;  %v4536_v41 = vpop.f32.mrf.mxu1  ;;  %v3613_v13 = vunpack.c.h.bf16 %v5098_v52 }
 0x391   : > { %v3508_v60 = vadd.f32 %v4536_v41, %v6883_v44 }
 0x392   : > { %v4157_v37 = vpack.c.bf16 %v3665_v55, %v3664_v38  ;;  %v3663_v12 = vmax.f32 %v3631_v31, 0.0  ;;  %v3499_v58 = vpop.f32.mrf.mxu1 }
 0x393   : > { %v3500_v19 = vadd.f32 %v6883_v44, %v3499_v58  ;;  %v3636_v24 = vadd.f32 %v3604_v32, %v3508_v60  ;;  %v3611_v60 = vunpack.c.h.bf16 %v5099_v2  ;;  %v5100_v58 = vld [vmem:[%s5275_s23 + $0x58] sm:$0xff]  }
 0x394   : > { %4221 = vst [vmem:[%s6898_s29 + $0x18] sm:$0xff] %v4157_v37   ;;  %v4152_v22 = vpack.c.bf16 %v3663_v12, %v3662_v18  ;;  %v4537_v33 = vpop.f32.mrf.mxu1 }
 0x395   : > { %v3511_v63 = vadd.f32 %v4537_v33, %v6883_v44  ;;  %v3634_v25 = vadd.f32 %v3602_v47, %v3500_v19  ;;  %v3668_v54 = vmax.f32 %v3636_v24, 0.0  ;;  %v3616_v19 = vunpack.c.l.bf16 %v5100_v58  ;;  %v5101_v24 = vld [vmem:[%s5275_s23 + $0x50] sm:$0xff]  }
 0x396   : > { %4220 = vst [vmem:[%s6898_s29 + $0x10] sm:$0xff] %v4152_v22   ;;  %v3502_v53 = vpop.f32.mrf.mxu1 }
 0x397   : > { %v3637_v43 = vadd.f32 %v3605_v17, %v3511_v63  ;;  %v3503_v9 = vadd.f32 %v6883_v44, %v3502_v53  ;;  %v3666_v11 = vmax.f32 %v3634_v25, 0.0  ;;  %v3614_v63 = vunpack.c.l.bf16 %v5101_v24 }
 0x399   : > { %v3669_v28 = vmax.f32 %v3637_v43, 0.0  ;;  %v3635_v16 = vadd.f32 %v3603_v48, %v3503_v9  ;;  %v3617_v48 = vunpack.c.h.bf16 %v5100_v58 }
 0x39a   : > { %v4540_v27 = vpop.f32.mrf.mxu1 }
 0x39b   : > { %v3524_v0 = vadd.f32 %v4540_v27, %v6883_v44  ;;  %v4167_v59 = vpack.c.bf16 %v3669_v28, %v3668_v54  ;;  %v3667_v57 = vmax.f32 %v3635_v16, 0.0  ;;  %v3615_v28 = vunpack.c.h.bf16 %v5101_v24 }
 0x39c   : > { %v3515_v1 = vpop.f32.mrf.mxu1 }
 0x39d   : > { %v3516_v46 = vadd.f32 %v6883_v44, %v3515_v1  ;;  %4223 = vst [vmem:[%s6898_s29 + $0x28] sm:$0xff] %v4167_v59   ;;  %v4162_v23 = vpack.c.bf16 %v3667_v57, %v3666_v11  ;;  %v3640_v49 = vadd.f32 %v3608_v4, %v3524_v0 }
 0x39e   : > { %v4541_v8 = vpop.f32.mrf.mxu1 }
 0x39f   : > { %v3527_v45 = vadd.f32 %v4541_v8, %v6883_v44  ;;  %4222 = vst [vmem:[%s6898_s29 + $0x20] sm:$0xff] %v4162_v23   ;;  %v3638_v50 = vadd.f32 %v3606_v39, %v3516_v46  ;;  %v3672_v10 = vmax.f32 %v3640_v49, 0.0  ;;  %v5103_v49 = vld [vmem:[%s5275_s23 + $0x60] sm:$0xff]  }
 0x3a0   : > { %v3518_v34 = vpop.f32.mrf.mxu1 }
 0x3a1   : > { %v3641_v62 = vadd.f32 %v3609_v56, %v3527_v45  ;;  %v3519_v42 = vadd.f32 %v6883_v44, %v3518_v34  ;;  %v3670_v51 = vmax.f32 %v3638_v50, 0.0  ;;  %v5102_v56 = vld [vmem:[%s5275_s23 + $0x68] sm:$0xff]   ;;  %v3618_v45 = vunpack.c.l.bf16 %v5103_v49 }
 0x3a2   : > { %v3620_v11 = vunpack.c.l.bf16 %v5102_v56 }
 0x3a3   : > { %v3673_v61 = vmax.f32 %v3641_v62, 0.0  ;;  %v3639_v29 = vadd.f32 %v3607_v35, %v3519_v42  ;;  %v3621_v35 = vunpack.c.h.bf16 %v5102_v56 }
 0x3a5   : > { %v4177_v26 = vpack.c.bf16 %v3673_v61, %v3672_v10  ;;  %v3671_v30 = vmax.f32 %v3639_v29, 0.0  ;;  %v3619_v61 = vunpack.c.h.bf16 %v5103_v49 }
 0x3a7   : > { %v4544_v36 = vpop.f32.mrf.mxu1  ;;  %4225 = vst [vmem:[%s6898_s29 + $0x38] sm:$0xff] %v4177_v26   ;;  %v4172_v55 = vpack.c.bf16 %v3671_v30, %v3670_v51 }
 0x3a8   : > { %v3540_v15 = vadd.f32 %v4544_v36, %v6883_v44 }
 0x3a9   : > { %v3531_v7 = vpop.f32.mrf.mxu1  ;;  %4224 = vst [vmem:[%s6898_s29 + $0x30] sm:$0xff] %v4172_v55  }
 0x3aa   : > { %v3532_v20 = vadd.f32 %v6883_v44, %v3531_v7  ;;  %v3644_v31 = vadd.f32 %v3612_v3, %v3540_v15 }
 0x3ab   : > { %v4545_v38 = vpop.f32.mrf.mxu1 }
 0x3ac   : > { %v3543_v41 = vadd.f32 %v4545_v38, %v6883_v44  ;;  %v3642_v32 = vadd.f32 %v3610_v40, %v3532_v20  ;;  %v3676_v6 = vmax.f32 %v3644_v31, 0.0  ;;  %v5105_v31 = vld [vmem:[%s5275_s23 + $0x70] sm:$0xff]  }
 0x3ad   : > { %v3534_v14 = vpop.f32.mrf.mxu1 }
 0x3ae   : > { %v3645_v18 = vadd.f32 %v3613_v13, %v3543_v41  ;;  %v3535_v37 = vadd.f32 %v6883_v44, %v3534_v14  ;;  %v3674_v53 = vmax.f32 %v3642_v32, 0.0  ;;  %v5104_v13 = vld [vmem:[%s5275_s23 + $0x78] sm:$0xff]   ;;  %v3622_v41 = vunpack.c.l.bf16 %v5105_v31  ;;  %s4138_s23 = sshll.u32 %s5234_s28, 11  ;;  %s5106_s28 = scalar_lea.vmem %s6960_s8, 2048 }
 0x3af   : > { %v3624_v51 = vunpack.c.l.bf16 %v5104_v13  ;;  %s6957_s20 = scalar_lea.hbm %s7014_s7, %s4138_s23  ;;  %p5107_p11 = scmp.ne.s32.totalorder %s6960_s8, %s5106_s28 }
 0x3b0   : > { %v3677_v47 = vmax.f32 %v3645_v18, 0.0  ;;  %v3643_v17 = vadd.f32 %v3611_v60, %v3535_v37  ;;  %v3625_v60 = vunpack.c.h.bf16 %v5104_v13  ;;  %p5114_p1 = scmp.lt.s32.totalorder %s5112_s17, %s5106_s28 }
 0x3b1   : > { %v4548_v12 = vpop.f32.mrf.mxu1  ;;  %p5108_p12 = pnand %p5107_p11, %p5251_p5 }
 0x3b2   : > { %v3556_v22 = vadd.f32 %v4548_v12, %v6883_v44  ;;  %v4187_v25 = vpack.c.bf16 %v3677_v47, %v3676_v6  ;;  %v3675_v43 = vmax.f32 %v3643_v17, 0.0  ;;  %v3623_v47 = vunpack.c.h.bf16 %v5105_v31  ;;  %p5115_p2 = por %p5114_p1, %p5113_p0 }
 0x3b3   : > { %v3547_v33 = vpop.f32.mrf.mxu1  ;;  %p5109_p13 = pneg %p5108_p12 }
 0x3b4   : > { %v3548_v9 = vadd.f32 %v6883_v44, %v3547_v33  ;;  %4227 = vst [vmem:[%s6898_s29 + $0x48] sm:$0xff] %v4187_v25   ;;  %v4182_v5 = vpack.c.bf16 %v3675_v43, %v3674_v53  ;;  %v3648_v4 = vadd.f32 %v3616_v19, %v3556_v22 }
 0x3b5   : > { %v4549_v27 = vpop.f32.mrf.mxu1  ;;  %p5116_p3 = pnand %p5115_p2, %p5109_p13 }
 0x3b6   : > { %v3559_v54 = vadd.f32 %v4549_v27, %v6883_v44  ;;  %4226 = vst [vmem:[%s6898_s29 + $0x40] sm:$0xff] %v4182_v5   ;;  %v3646_v0 = vadd.f32 %v3614_v63, %v3548_v9  ;;  %v3680_v59 = vmax.f32 %v3648_v4, 0.0 }
 0x3b7   : > { %v3550_v16 = vpop.f32.mrf.mxu1 }
 0x3b8   : > { %v3649_v1 = vadd.f32 %v3617_v48, %v3559_v54  ;;  %v3551_v21 = vadd.f32 %v6883_v44, %v3550_v16  ;;  %v3678_v34 = vmax.f32 %v3646_v0, 0.0 }
 0x3ba   : > { %v4552_v39 = vpop.f32.mrf.mxu1  ;;  %v3681_v57 = vmax.f32 %v3649_v1, 0.0  ;;  %v3647_v46 = vadd.f32 %v3615_v28, %v3551_v21 }
 0x3bb   : > { %v3572_v8 = vadd.f32 %v4552_v39, %v6883_v44 }
 0x3bc   : > { %v3563_v23 = vpop.f32.mrf.mxu1  ;;  %v4197_v50 = vpack.c.bf16 %v3681_v57, %v3680_v59  ;;  %v3679_v62 = vmax.f32 %v3647_v46, 0.0 }
 0x3bd   : > { %v3564_v42 = vadd.f32 %v6883_v44, %v3563_v23  ;;  %v3652_v3 = vadd.f32 %v3620_v11, %v3572_v8 }
 0x3be   : > { %v4553_v36 = vpop.f32.mrf.mxu1  ;;  %4229 = vst [vmem:[%s6898_s29 + $0x58] sm:$0xff] %v4197_v50   ;;  %v4192_v52 = vpack.c.bf16 %v3679_v62, %v3678_v34 }
 0x3bf   : > { %v3575_v10 = vadd.f32 %v4553_v36, %v6883_v44  ;;  %v3650_v15 = vadd.f32 %v3618_v45, %v3564_v42  ;;  %v3684_v26 = vmax.f32 %v3652_v3, 0.0 }
 0x3c0   : > { %v3566_v29 = vpop.f32.mrf.mxu1  ;;  %4228 = vst [vmem:[%s6898_s29 + $0x50] sm:$0xff] %v4192_v52  }
 0x3c1   : > { %v3653_v7 = vadd.f32 %v3621_v35, %v3575_v10  ;;  %v3567_v2 = vadd.f32 %v6883_v44, %v3566_v29  ;;  %v3682_v14 = vmax.f32 %v3650_v15, 0.0 }
 0x3c3   : > { %v3685_v30 = vmax.f32 %v3653_v7, 0.0  ;;  %v3651_v20 = vadd.f32 %v3619_v61, %v3567_v2 }
 0x3c5   : > { %v4207_v32 = vpack.c.bf16 %v3685_v30, %v3684_v26  ;;  %v3683_v18 = vmax.f32 %v3651_v20, 0.0 }
 0x3c6   : > { %v4556_v40 = vpop.f32.mrf.mxu1 }
 0x3c7   : > { %v3588_v38 = vadd.f32 %v4556_v40, %v6883_v44  ;;  %4231 = vst [vmem:[%s6898_s29 + $0x68] sm:$0xff] %v4207_v32   ;;  %v4202_v58 = vpack.c.bf16 %v3683_v18, %v3682_v14 }
 0x3c8   : > { %v3579_v55 = vpop.f32.mrf.mxu1 }
 0x3c9   : > { %v3580_v37 = vadd.f32 %v6883_v44, %v3579_v55  ;;  %v3656_v19 = vadd.f32 %v3624_v51, %v3588_v38  ;;  %4230 = vst [vmem:[%s6898_s29 + $0x60] sm:$0xff] %v4202_v58  }
 0x3ca   : > { %v4557_v12 = vpop.f32.mrf.mxu1 }
 0x3cb   : > { %v3591_v6 = vadd.f32 %v4557_v12, %v6883_v44  ;;  %v3654_v22 = vadd.f32 %v3622_v41, %v3580_v37  ;;  %v3688_v63 = vmax.f32 %v3656_v19, 0.0 }
 0x3cc   : > { %v3582_v17 = vpop.f32.mrf.mxu1 }
 0x3cd   : > { %v3657_v33 = vadd.f32 %v3625_v60, %v3591_v6  ;;  %v3583_v24 = vadd.f32 %v6883_v44, %v3582_v17  ;;  %v3686_v25 = vmax.f32 %v3654_v22, 0.0 }
 0x3cf   : > { %v3689_v48 = vmax.f32 %v3657_v33, 0.0  ;;  %v3655_v53 = vadd.f32 %v3623_v47, %v3583_v24 }
 0x3d1   : > { %v4217_v43 = vpack.c.bf16 %v3689_v48, %v3688_v63  ;;  %v3687_v9 = vmax.f32 %v3655_v53, 0.0 }
 0x3d3   : > { %4233 = vst [vmem:[%s6898_s29 + $0x78] sm:$0xff] %v4217_v43   ;;  %v4212_v27 = vpack.c.bf16 %v3687_v9, %v3686_v25 }
 0x3d5   : > { %4232 = vst [vmem:[%s6898_s29 + $0x70] sm:$0xff] %v4212_v27  }
 0x3d6   : > { %5119 = shalt.err (!%p5116_p3)
}
 0x3d7   : > { %s5120_s19 = scalar_lea.hbm %s6957_s20, 2048  ;;  %s5124_s29 = scalar_lea.hbm %s7014_s7, 4096 }
 0x3d8   : > { %p5121_p4 = scmp.ne.s32.totalorder %s6957_s20, %s5120_s19  ;;  %p5125_p9 = scmp.lt.s32.totalorder %s6957_s20, %s7014_s7 }
 0x3d9   : > { %p5126_p10 = scmp.lt.s32.totalorder %s5124_s29, %s5120_s19 }
 0x3da   : > { %p5122_p7 = pnand %p5121_p4, %p5251_p5 }
 0x3db   : > { %p5127_p11 = por %p5126_p10, %p5125_p9 }
 0x3dc   : > { %p5123_p8 = pneg %p5122_p7 }
 0x3de   : > { %p5128_p12 = pnand %p5127_p11, %p5123_p8 }
 0x3e0   : > { %5131 = shalt.err (!%p5128_p12)
}
 0x3e1   : > { %s5172_s13 = smov 4  }
 0x3e2   : > { %4570 = dma.vmem_to_hbm [thread:$0]  (%p5251_p5), %s6960_s8, 2048, %s6957_s20, %s6965_s14, %s5170_s18, %s5170_s18, %s5172_s13  }
 0x3e3 PF: > { %p4576_p13 = scmp.ge.s32.totalorder %s5166_s27, 2  ;;  %s3879_s28 = sand.u32 1, %s5154_s24  }
 0x3e4   : > { %s3880_s15 = scalar_lea.sflag [#allocation4], %s3879_s28 }
 0x3e5   : > { %p4573_p0 = pnand %p4576_p13, %p5255_p6 }
 0x3e7   : > { %p4574_p1 = pneg %p4573_p0 }
 0x3e9   : > { %5149 = dma.done.wait (%p4574_p1), %s3880_s15, 2048  }
 0x3ea   : > { %5151 = vsyncadd (%p4574_p1), %s3880_s15, 4294965248  ;;  %p17_p2 = scmp.ge.s32.totalorder %s5238_s30, 4   ;;  %s7459_s24 = smov %s5158_s25 }
 0x3eb   : > { %s7460_s25 = smov %s5162_s26  ;;  %s7461_s26 = smov %s5249_s10 }
 0x3ec   : > { %s7462_s27 = smov %s5238_s30  ;;  %19 = sbr.rel (!%p17_p2) target bundleno = 3 (0x3), region = 85 }
 0x3f1   :  { %3885 = vsyncpa [#allocation4], 1 }
 0x3f2   :  { %3887 = vsyncpa [#allocation4 + $0x1], 1 }

</bundles_post_ra>
